<compile_context>
chip_gen: v7x
topology: tpu7x:2x2x1
jax: 0.10.0
libtpu: 0.0.40
codegen_flags: <defaults>
</compile_context>

<pallas_src>
import functools

import jax
import jax.numpy as jnp
from jax.experimental import pallas as pl
from jax.experimental.pallas import tpu as pltpu


# ----------------------------- activations ---------------------------------
def _act(x, nl):
    if nl == 'RE':
        return jnp.maximum(x, 0.0)
    elif nl == 'HS':
        return x * jnp.clip(x + 3.0, 0.0, 6.0) * (1.0 / 6.0)   # Hswish
    else:
        raise NotImplementedError(nl)


# --------------------------- fused block kernel -----------------------------
def fused_mb_kernel(x_ref, w1_ref, s1_ref, b1_ref,
                    wdw_ref, s2_ref, b2_ref,
                    sew1_ref, sew2_ref,
                    w2_ref, s3_ref, b3_ref,
                    o_ref, xpad_ref, *,
                    k, stride, nl, use_se, use_res,
                    H, W, Hout, Wout, pad):
    latC = wdw_ref.shape[1]
    x_c = x_ref[0]                                   # (Cin, H*W), channel-major NCHW tile

    # ---- stage 1: 1x1 expand conv (matmul) + folded BN + act ----
    xT = x_c.T                                       # small in-VMEM transpose -> (H*W, Cin)
    y1 = jnp.dot(xT, w1_ref[...], preferred_element_type=jnp.float32)   # (H*W, latC)
    y1 = _act(y1 * s1_ref[...] + b1_ref[...], nl)

    # ---- stage 2: depthwise kxk conv via zero-padded VMEM scratch ----
    xpad_ref[...] = jnp.zeros(xpad_ref.shape, xpad_ref.dtype)
    xpad_ref[pad:pad + H, pad:pad + W, :] = y1.reshape(H, W, latC)
    xp = xpad_ref[...]                               # (Hp, Wp, latC)
    wd = wdw_ref[...]                                # (k*k, latC)

    def tap(dy, dx):
        win = jax.lax.slice(
            xp,
            (dy, dx, 0),
            (dy + (Hout - 1) * stride + 1, dx + (Wout - 1) * stride + 1, latC),
            (stride, stride, 1))
        return win * wd[dy * k + dx:dy * k + dx + 1, :]

    acc = tap(0, 0)                                  # seed with first tap (no zeros+add)
    for dy in range(k):
        for dx in range(k):
            if dy == 0 and dx == 0:
                continue
            acc = acc + tap(dy, dx)

    y2 = acc.reshape(Hout * Wout, latC) * s2_ref[...] + b2_ref[...]   # folded BN2

    if use_se:
        pooled = jnp.mean(y2, axis=0, keepdims=True)                  # (1, latC)
        h = jnp.maximum(
            jnp.dot(pooled, sew1_ref[...], preferred_element_type=jnp.float32), 0.0)
        s = jnp.dot(h, sew2_ref[...], preferred_element_type=jnp.float32)
        s = jnp.clip(s + 3.0, 0.0, 6.0) * (1.0 / 6.0)                 # Hsigmoid
        y2 = y2 * s
    y2 = _act(y2, nl)

    # ---- stage 3: 1x1 project conv + folded BN (+ residual), channel-major out ----
    y3 = jnp.dot(y2, w2_ref[...], preferred_element_type=jnp.float32)  # (Hout*Wout, outC)
    y3t = y3.T                                       # (outC, Hout*Wout) -> lane-dense store
    y3t = y3t * s3_ref[...] + b3_ref[...]
    if use_res:
        y3t = y3t + x_c
    o_ref[0] = y3t.astype(o_ref.dtype)


# ------------------------------- wrapper ------------------------------------
def mobile_bottleneck(x_nchw, params, *, kernel, stride, se, nl):
    assert stride in (1, 2) and kernel in (3, 5)
    B, Cin, H, W = x_nchw.shape
    latC = params['w_pw1'].shape[1]
    outC = params['w_pw2'].shape[1]
    Cr = params['se_w1'].shape[1]
    pad = (kernel - 1) // 2
    Hout = (H + 2 * pad - kernel) // stride + 1
    Wout = (W + 2 * pad - kernel) // stride + 1
    Hp, Wp = H + 2 * pad, W + 2 * pad
    use_res = (stride == 1 and Cin == outC)

    # Free row-major reshapes only -- no HBM transpose, no pad.
    x_flat = x_nchw.reshape(B, Cin, H * W)
    bn3_scale_t = params['bn3_scale'].reshape(outC, 1)
    bn3_shift_t = params['bn3_shift'].reshape(outC, 1)

    kern = functools.partial(
        fused_mb_kernel, k=kernel, stride=stride, nl=nl, use_se=se,
        use_res=use_res, H=H, W=W, Hout=Hout, Wout=Wout, pad=pad)

    out = pl.pallas_call(
        kern,
        grid=(B,),
        in_specs=[
            pl.BlockSpec((1, Cin, H * W), lambda b: (b, 0, 0)),
            pl.BlockSpec((Cin, latC), lambda b: (0, 0)),
            pl.BlockSpec((1, latC), lambda b: (0, 0)),
            pl.BlockSpec((1, latC), lambda b: (0, 0)),
            pl.BlockSpec((kernel * kernel, latC), lambda b: (0, 0)),
            pl.BlockSpec((1, latC), lambda b: (0, 0)),
            pl.BlockSpec((1, latC), lambda b: (0, 0)),
            pl.BlockSpec((latC, Cr), lambda b: (0, 0)),
            pl.BlockSpec((Cr, latC), lambda b: (0, 0)),
            pl.BlockSpec((latC, outC), lambda b: (0, 0)),
            pl.BlockSpec((outC, 1), lambda b: (0, 0)),
            pl.BlockSpec((outC, 1), lambda b: (0, 0)),
        ],
        out_specs=pl.BlockSpec((1, outC, Hout * Wout), lambda b: (b, 0, 0)),
        out_shape=jax.ShapeDtypeStruct((B, outC, Hout * Wout), jnp.float32),
        scratch_shapes=[pltpu.VMEM((Hp, Wp, latC), jnp.float32)],
        compiler_params=pltpu.CompilerParams(
            dimension_semantics=("parallel",),
            vmem_limit_bytes=32 * 1024 * 1024),
    )(x_flat, params['w_pw1'], params['bn1_scale'], params['bn1_shift'],
      params['w_dw'], params['bn2_scale'], params['bn2_shift'],
      params['se_w1'], params['se_w2'],
      params['w_pw2'], bn3_scale_t, bn3_shift_t)

    return out.reshape(B, outC, Hout, Wout)          # free reshape back to NCHW


# ------------------------ deterministic parameters ---------------------------
def make_params(key, inC, latC, outC, kernel, reduction=4):
    ks = jax.random.split(key, 20)

    def rn(k, shape, s=0.1):
        return (s * jax.random.normal(k, shape, jnp.float32)).astype(jnp.float32)

    def bn_fold(k0, k1, k2, k3, C):
        # BN in eval mode, folded into scale/shift (deterministic synthetic stats)
        gamma = 1.0 + rn(k0, (C,))
        beta = rn(k1, (C,))
        mean = rn(k2, (C,))
        var = jax.random.uniform(k3, (C,), jnp.float32, 0.5, 1.5)
        scale = gamma / jnp.sqrt(var + 1e-5)
        shift = beta - mean * scale
        return scale.reshape(1, C), shift.reshape(1, C)

    p = {}
    p['w_pw1'] = rn(ks[0], (inC, latC))                       # 1x1 conv (inC->latC)
    p['bn1_scale'], p['bn1_shift'] = bn_fold(ks[1], ks[2], ks[3], ks[4], latC)
    p['w_dw'] = rn(ks[5], (kernel * kernel, latC))            # depthwise kxk, per-channel
    p['bn2_scale'], p['bn2_shift'] = bn_fold(ks[6], ks[7], ks[8], ks[9], latC)
    p['se_w1'] = rn(ks[10], (latC, latC // reduction))        # SE fc1 (no bias)
    p['se_w2'] = rn(ks[11], (latC // reduction, latC))        # SE fc2 (no bias)
    p['w_pw2'] = rn(ks[12], (latC, outC))                     # 1x1 conv (latC->outC)
    p['bn3_scale'], p['bn3_shift'] = bn_fold(ks[13], ks[14], ks[15], ks[16], outC)
    return p


# ------------------------- pure-JAX reference --------------------------------
def ref_forward(x_nchw, params, *, kernel, stride, se, nl):
    def act(v):
        return jnp.maximum(v, 0.) if nl == 'RE' else v * jnp.clip(v + 3., 0., 6.) / 6.

    B, Cin, H, W = x_nchw.shape
    latC = params['w_pw1'].shape[1]
    outC = params['w_pw2'].shape[1]
    pad = (kernel - 1) // 2
    x = jnp.transpose(x_nchw, (0, 2, 3, 1))

    y = jnp.einsum('bhwc,cd->bhwd', x, params['w_pw1'])
    y = act(y * params['bn1_scale'][0] + params['bn1_shift'][0])

    y = jax.lax.conv_general_dilated(
        y, params['w_dw'].reshape(kernel, kernel, 1, latC),
        window_strides=(stride, stride), padding=[(pad, pad), (pad, pad)],
        dimension_numbers=('NHWC', 'HWIO', 'NHWC'), feature_group_count=latC)
    y = y * params['bn2_scale'][0] + params['bn2_shift'][0]
    if se:
        pooled = jnp.mean(y, axis=(1, 2))
        h = jnp.maximum(pooled @ params['se_w1'], 0.)
        s = jnp.clip(h @ params['se_w2'] + 3., 0., 6.) / 6.
        y = y * s[:, None, None, :]
    y = act(y)

    y = jnp.einsum('bhwc,cd->bhwd', y, params['w_pw2'])
    y = y * params['bn3_scale'][0] + params['bn3_shift'][0]
    out = jnp.transpose(y, (0, 3, 1, 2))
    if stride == 1 and Cin == outC:
        out = out + x_nchw
    return out


if __name__ == "__main__":
    key = jax.random.PRNGKey(0)
    kx1, kp1, kx2, kp2 = jax.random.split(key, 4)

    # config 1: MobileBottleneck(16, 16, 32, kernel=3, stride=1, se=True, nl='HS')
    #           -> residual connection active
    B, inC, H, W = 2, 16, 16, 16
    latC, outC, kernel, stride, se, nl = 32, 16, 3, 1, True, 'HS'
    x = jax.random.normal(kx1, (B, inC, H, W), jnp.float32)
    params = make_params(kp1, inC, latC, outC, kernel)

    out = jax.block_until_ready(
        mobile_bottleneck(x, params, kernel=kernel, stride=stride, se=se, nl=nl))
    ref = ref_forward(x, params, kernel=kernel, stride=stride, se=se, nl=nl)
    assert out.shape == (B, outC, H, W), out.shape
    assert jnp.allclose(out, ref, atol=1e-4, rtol=1e-4), \
        float(jnp.max(jnp.abs(out - ref)))

    # config 2: MobileBottleneck(8, 24, 32, kernel=3, stride=1, se=False, nl='RE')
    #           -> no SE, no residual branch
    inC2, latC2, outC2 = 8, 32, 24
    x2 = jax.random.normal(kx2, (B, inC2, H, W), jnp.float32)
    params2 = make_params(kp2, inC2, latC2, outC2, kernel)

    out2 = jax.block_until_ready(
        mobile_bottleneck(x2, params2, kernel=kernel, stride=1, se=False, nl='RE'))
    ref2 = ref_forward(x2, params2, kernel=kernel, stride=1, se=False, nl='RE')
    assert out2.shape == (B, outC2, H, W), out2.shape
    assert jnp.allclose(out2, ref2, atol=1e-4, rtol=1e-4), \
        float(jnp.max(jnp.abs(out2 - ref2)))

    print("KERNEL_OK")
</pallas_src>

<mosaic_0001>
module attributes {stable_mosaic.version = 11 : i64} {
  func.func @fused_mb_kernel(%arg0: i32, %arg1: memref<1x16x256xf32, #tpu.memory_space<vmem>>, %arg2: memref<16x32xf32, #tpu.memory_space<vmem>>, %arg3: memref<1x32xf32, #tpu.memory_space<vmem>>, %arg4: memref<1x32xf32, #tpu.memory_space<vmem>>, %arg5: memref<9x32xf32, #tpu.memory_space<vmem>>, %arg6: memref<1x32xf32, #tpu.memory_space<vmem>>, %arg7: memref<1x32xf32, #tpu.memory_space<vmem>>, %arg8: memref<32x8xf32, #tpu.memory_space<vmem>>, %arg9: memref<8x32xf32, #tpu.memory_space<vmem>>, %arg10: memref<32x16xf32, #tpu.memory_space<vmem>>, %arg11: memref<16x1xf32, #tpu.memory_space<vmem>>, %arg12: memref<16x1xf32, #tpu.memory_space<vmem>>, %arg13: memref<1x16x256xf32, #tpu.memory_space<vmem>>, %arg14: memref<18x18x32xf32, #tpu.memory_space<vmem>>) attributes {dimension_semantics = [#tpu.dimension_semantics<parallel>], iteration_bounds = array<i64: 2>, scalar_prefetch = 0 : i64, scratch_operands = 1 : i64, tpu.core_type = #tpu.core_type<tc>, window_params = [{transform_indices = @transform_0, window_bounds = array<i64: 1, 16, 256>}, {pipeline_mode = #tpu.pipeline_mode<synchronous>, transform_indices = @transform_1, window_bounds = array<i64: 16, 32>}, {pipeline_mode = #tpu.pipeline_mode<synchronous>, transform_indices = @transform_2, window_bounds = array<i64: 1, 32>}, {pipeline_mode = #tpu.pipeline_mode<synchronous>, transform_indices = @transform_3, window_bounds = array<i64: 1, 32>}, {pipeline_mode = #tpu.pipeline_mode<synchronous>, transform_indices = @transform_4, window_bounds = array<i64: 9, 32>}, {pipeline_mode = #tpu.pipeline_mode<synchronous>, transform_indices = @transform_5, window_bounds = array<i64: 1, 32>}, {pipeline_mode = #tpu.pipeline_mode<synchronous>, transform_indices = @transform_6, window_bounds = array<i64: 1, 32>}, {pipeline_mode = #tpu.pipeline_mode<synchronous>, transform_indices = @transform_7, window_bounds = array<i64: 32, 8>}, {pipeline_mode = #tpu.pipeline_mode<synchronous>, transform_indices = @transform_8, window_bounds = array<i64: 8, 32>}, {pipeline_mode = #tpu.pipeline_mode<synchronous>, transform_indices = @transform_9, window_bounds = array<i64: 32, 16>}, {pipeline_mode = #tpu.pipeline_mode<synchronous>, transform_indices = @transform_10, window_bounds = array<i64: 16, 1>}, {pipeline_mode = #tpu.pipeline_mode<synchronous>, transform_indices = @transform_11, window_bounds = array<i64: 16, 1>}, {transform_indices = @transform_12, window_bounds = array<i64: 1, 16, 256>}]} {
    %c0 = arith.constant 0 : index
    %c0_0 = arith.constant 0 : index
    %c0_1 = arith.constant 0 : index
    %0 = vector.load %arg1[%c0, %c0_0, %c0_1] : memref<1x16x256xf32, #tpu.memory_space<vmem>>, vector<1x16x256xf32>
    %1 = vector.shape_cast %0 : vector<1x16x256xf32> to vector<16x256xf32>
    %2 = tpu.transpose %1, [1, 0] : vector<16x256xf32> -> vector<256x16xf32>
    %c0_2 = arith.constant 0 : index
    %c0_3 = arith.constant 0 : index
    %3 = vector.load %arg2[%c0_2, %c0_3] : memref<16x32xf32, #tpu.memory_space<vmem>>, vector<16x32xf32>
    %cst = arith.constant dense<0.000000e+00> : vector<256x32xf32>
    %4 = tpu.matmul %2, %3, %cst {dimension_numbers = #tpu.dot_dimension_numbers<[1], [0], [0], [1], [0, 0, 1, 1], [], []>} : vector<256x16xf32>, vector<16x32xf32>, vector<256x32xf32> -> vector<256x32xf32>
    %c0_4 = arith.constant 0 : index
    %c0_5 = arith.constant 0 : index
    %5 = vector.load %arg3[%c0_4, %c0_5] : memref<1x32xf32, #tpu.memory_space<vmem>>, vector<1x32xf32>
    %6 = vector.broadcast %5 : vector<1x32xf32> to vector<256x32xf32>
    %7 = arith.mulf %4, %6 : vector<256x32xf32>
    %c0_6 = arith.constant 0 : index
    %c0_7 = arith.constant 0 : index
    %8 = vector.load %arg4[%c0_6, %c0_7] : memref<1x32xf32, #tpu.memory_space<vmem>>, vector<1x32xf32>
    %9 = vector.broadcast %8 : vector<1x32xf32> to vector<256x32xf32>
    %10 = arith.addf %7, %9 : vector<256x32xf32>
    %cst_8 = arith.constant 3.000000e+00 : f32
    %11 = vector.broadcast %cst_8 : f32 to vector<256x32xf32>
    %12 = arith.addf %10, %11 : vector<256x32xf32>
    %cst_9 = arith.constant 0.000000e+00 : f32
    %cst_10 = arith.constant 6.000000e+00 : f32
    %13 = vector.broadcast %cst_9 : f32 to vector<256x32xf32>
    %14 = arith.maximumf %13, %12 : vector<256x32xf32>
    %15 = vector.broadcast %cst_10 : f32 to vector<256x32xf32>
    %16 = arith.minimumf %15, %14 : vector<256x32xf32>
    %17 = arith.mulf %10, %16 : vector<256x32xf32>
    %cst_11 = arith.constant 0.166666672 : f32
    %18 = vector.broadcast %cst_11 : f32 to vector<256x32xf32>
    %19 = arith.mulf %17, %18 : vector<256x32xf32>
    %cst_12 = arith.constant 0.000000e+00 : f32
    %20 = vector.broadcast %cst_12 : f32 to vector<18x18x32xf32>
    %c0_13 = arith.constant 0 : index
    %c0_14 = arith.constant 0 : index
    %c0_15 = arith.constant 0 : index
    %21 = vector.load %arg14[%c0_13, %c0_14, %c0_15] : memref<18x18x32xf32, #tpu.memory_space<vmem>>, vector<18x18x32xf32>
    tpu.vector_store %arg14[%c0_13, %c0_14, %c0_15], %20 {strides = array<i32>} : memref<18x18x32xf32, #tpu.memory_space<vmem>>, vector<18x18x32xf32>,
    %22 = vector.shape_cast %19 : vector<256x32xf32> to vector<16x16x32xf32>
    %c1 = arith.constant 1 : index
    %c1_16 = arith.constant 1 : index
    %c0_17 = arith.constant 0 : index
    %23 = vector.load %arg14[%c1, %c1_16, %c0_17] : memref<18x18x32xf32, #tpu.memory_space<vmem>>, vector<16x16x32xf32>
    tpu.vector_store %arg14[%c1, %c1_16, %c0_17], %22 {strides = array<i32>} : memref<18x18x32xf32, #tpu.memory_space<vmem>>, vector<16x16x32xf32>,
    %c0_18 = arith.constant 0 : index
    %c0_19 = arith.constant 0 : index
    %c0_20 = arith.constant 0 : index
    %24 = vector.load %arg14[%c0_18, %c0_19, %c0_20] : memref<18x18x32xf32, #tpu.memory_space<vmem>>, vector<18x18x32xf32>
    %c0_21 = arith.constant 0 : index
    %c0_22 = arith.constant 0 : index
    %25 = vector.load %arg5[%c0_21, %c0_22] : memref<9x32xf32, #tpu.memory_space<vmem>>, vector<9x32xf32>
    %26 = vector.extract_strided_slice %24 {offsets = [0, 0, 0], sizes = [16, 16, 32], strides = [1, 1, 1]} : vector<18x18x32xf32> to vector<16x16x32xf32>
    %27 = vector.extract_strided_slice %25 {offsets = [0, 0], sizes = [1, 32], strides = [1, 1]} : vector<9x32xf32> to vector<1x32xf32>
    %28 = vector.shape_cast %27 : vector<1x32xf32> to vector<1x1x32xf32>
    %29 = vector.broadcast %28 : vector<1x1x32xf32> to vector<16x16x32xf32>
    %30 = arith.mulf %26, %29 : vector<16x16x32xf32>
    %31 = vector.extract_strided_slice %24 {offsets = [0, 1, 0], sizes = [16, 16, 32], strides = [1, 1, 1]} : vector<18x18x32xf32> to vector<16x16x32xf32>
    %32 = vector.extract_strided_slice %25 {offsets = [1, 0], sizes = [1, 32], strides = [1, 1]} : vector<9x32xf32> to vector<1x32xf32>
    %33 = vector.shape_cast %32 : vector<1x32xf32> to vector<1x1x32xf32>
    %34 = vector.broadcast %33 : vector<1x1x32xf32> to vector<16x16x32xf32>
    %35 = arith.mulf %31, %34 : vector<16x16x32xf32>
    %36 = arith.addf %30, %35 : vector<16x16x32xf32>
    %37 = vector.extract_strided_slice %24 {offsets = [0, 2, 0], sizes = [16, 16, 32], strides = [1, 1, 1]} : vector<18x18x32xf32> to vector<16x16x32xf32>
    %38 = vector.extract_strided_slice %25 {offsets = [2, 0], sizes = [1, 32], strides = [1, 1]} : vector<9x32xf32> to vector<1x32xf32>
    %39 = vector.shape_cast %38 : vector<1x32xf32> to vector<1x1x32xf32>
    %40 = vector.broadcast %39 : vector<1x1x32xf32> to vector<16x16x32xf32>
    %41 = arith.mulf %37, %40 : vector<16x16x32xf32>
    %42 = arith.addf %36, %41 : vector<16x16x32xf32>
    %43 = vector.extract_strided_slice %24 {offsets = [1, 0, 0], sizes = [16, 16, 32], strides = [1, 1, 1]} : vector<18x18x32xf32> to vector<16x16x32xf32>
    %44 = vector.extract_strided_slice %25 {offsets = [3, 0], sizes = [1, 32], strides = [1, 1]} : vector<9x32xf32> to vector<1x32xf32>
    %45 = vector.shape_cast %44 : vector<1x32xf32> to vector<1x1x32xf32>
    %46 = vector.broadcast %45 : vector<1x1x32xf32> to vector<16x16x32xf32>
    %47 = arith.mulf %43, %46 : vector<16x16x32xf32>
    %48 = arith.addf %42, %47 : vector<16x16x32xf32>
    %49 = vector.extract_strided_slice %24 {offsets = [1, 1, 0], sizes = [16, 16, 32], strides = [1, 1, 1]} : vector<18x18x32xf32> to vector<16x16x32xf32>
    %50 = vector.extract_strided_slice %25 {offsets = [4, 0], sizes = [1, 32], strides = [1, 1]} : vector<9x32xf32> to vector<1x32xf32>
    %51 = vector.shape_cast %50 : vector<1x32xf32> to vector<1x1x32xf32>
    %52 = vector.broadcast %51 : vector<1x1x32xf32> to vector<16x16x32xf32>
    %53 = arith.mulf %49, %52 : vector<16x16x32xf32>
    %54 = arith.addf %48, %53 : vector<16x16x32xf32>
    %55 = vector.extract_strided_slice %24 {offsets = [1, 2, 0], sizes = [16, 16, 32], strides = [1, 1, 1]} : vector<18x18x32xf32> to vector<16x16x32xf32>
    %56 = vector.extract_strided_slice %25 {offsets = [5, 0], sizes = [1, 32], strides = [1, 1]} : vector<9x32xf32> to vector<1x32xf32>
    %57 = vector.shape_cast %56 : vector<1x32xf32> to vector<1x1x32xf32>
    %58 = vector.broadcast %57 : vector<1x1x32xf32> to vector<16x16x32xf32>
    %59 = arith.mulf %55, %58 : vector<16x16x32xf32>
    %60 = arith.addf %54, %59 : vector<16x16x32xf32>
    %61 = vector.extract_strided_slice %24 {offsets = [2, 0, 0], sizes = [16, 16, 32], strides = [1, 1, 1]} : vector<18x18x32xf32> to vector<16x16x32xf32>
    %62 = vector.extract_strided_slice %25 {offsets = [6, 0], sizes = [1, 32], strides = [1, 1]} : vector<9x32xf32> to vector<1x32xf32>
    %63 = vector.shape_cast %62 : vector<1x32xf32> to vector<1x1x32xf32>
    %64 = vector.broadcast %63 : vector<1x1x32xf32> to vector<16x16x32xf32>
    %65 = arith.mulf %61, %64 : vector<16x16x32xf32>
    %66 = arith.addf %60, %65 : vector<16x16x32xf32>
    %67 = vector.extract_strided_slice %24 {offsets = [2, 1, 0], sizes = [16, 16, 32], strides = [1, 1, 1]} : vector<18x18x32xf32> to vector<16x16x32xf32>
    %68 = vector.extract_strided_slice %25 {offsets = [7, 0], sizes = [1, 32], strides = [1, 1]} : vector<9x32xf32> to vector<1x32xf32>
    %69 = vector.shape_cast %68 : vector<1x32xf32> to vector<1x1x32xf32>
    %70 = vector.broadcast %69 : vector<1x1x32xf32> to vector<16x16x32xf32>
    %71 = arith.mulf %67, %70 : vector<16x16x32xf32>
    %72 = arith.addf %66, %71 : vector<16x16x32xf32>
    %73 = vector.extract_strided_slice %24 {offsets = [2, 2, 0], sizes = [16, 16, 32], strides = [1, 1, 1]} : vector<18x18x32xf32> to vector<16x16x32xf32>
    %74 = vector.extract_strided_slice %25 {offsets = [8, 0], sizes = [1, 32], strides = [1, 1]} : vector<9x32xf32> to vector<1x32xf32>
    %75 = vector.shape_cast %74 : vector<1x32xf32> to vector<1x1x32xf32>
    %76 = vector.broadcast %75 : vector<1x1x32xf32> to vector<16x16x32xf32>
    %77 = arith.mulf %73, %76 : vector<16x16x32xf32>
    %78 = arith.addf %72, %77 : vector<16x16x32xf32>
    %79 = vector.shape_cast %78 : vector<16x16x32xf32> to vector<256x32xf32>
    %c0_23 = arith.constant 0 : index
    %c0_24 = arith.constant 0 : index
    %80 = vector.load %arg6[%c0_23, %c0_24] : memref<1x32xf32, #tpu.memory_space<vmem>>, vector<1x32xf32>
    %81 = vector.broadcast %80 : vector<1x32xf32> to vector<256x32xf32>
    %82 = arith.mulf %79, %81 : vector<256x32xf32>
    %c0_25 = arith.constant 0 : index
    %c0_26 = arith.constant 0 : index
    %83 = vector.load %arg7[%c0_25, %c0_26] : memref<1x32xf32, #tpu.memory_space<vmem>>, vector<1x32xf32>
    %84 = vector.broadcast %83 : vector<1x32xf32> to vector<256x32xf32>
    %85 = arith.addf %82, %84 : vector<256x32xf32>
    %cst_27 = arith.constant dense<0.000000e+00> : vector<32xf32>
    %86 = vector.multi_reduction <add>, %85, %cst_27 [0] : vector<256x32xf32> to vector<32xf32>
    %87 = vector.shape_cast %86 : vector<32xf32> to vector<1x32xf32>
    %cst_28 = arith.constant 2.560000e+02 : f32
    %88 = vector.broadcast %cst_28 : f32 to vector<1x32xf32>
    %89 = arith.divf %87, %88 : vector<1x32xf32>
    %c0_29 = arith.constant 0 : index
    %c0_30 = arith.constant 0 : index
    %90 = vector.load %arg8[%c0_29, %c0_30] : memref<32x8xf32, #tpu.memory_space<vmem>>, vector<32x8xf32>
    %cst_31 = arith.constant dense<0.000000e+00> : vector<1x8xf32>
    %91 = tpu.matmul %89, %90, %cst_31 {dimension_numbers = #tpu.dot_dimension_numbers<[1], [0], [0], [1], [0, 0, 1, 1], [], []>} : vector<1x32xf32>, vector<32x8xf32>, vector<1x8xf32> -> vector<1x8xf32>
    %cst_32 = arith.constant 0.000000e+00 : f32
    %92 = vector.broadcast %cst_32 : f32 to vector<1x8xf32>
    %93 = arith.maximumf %91, %92 : vector<1x8xf32>
    %c0_33 = arith.constant 0 : index
    %c0_34 = arith.constant 0 : index
    %94 = vector.load %arg9[%c0_33, %c0_34] : memref<8x32xf32, #tpu.memory_space<vmem>>, vector<8x32xf32>
    %cst_35 = arith.constant dense<0.000000e+00> : vector<1x32xf32>
    %95 = tpu.matmul %93, %94, %cst_35 {dimension_numbers = #tpu.dot_dimension_numbers<[1], [0], [0], [1], [0, 0, 1, 1], [], []>} : vector<1x8xf32>, vector<8x32xf32>, vector<1x32xf32> -> vector<1x32xf32>
    %cst_36 = arith.constant 3.000000e+00 : f32
    %96 = vector.broadcast %cst_36 : f32 to vector<1x32xf32>
    %97 = arith.addf %95, %96 : vector<1x32xf32>
    %cst_37 = arith.constant 0.000000e+00 : f32
    %cst_38 = arith.constant 6.000000e+00 : f32
    %98 = vector.broadcast %cst_37 : f32 to vector<1x32xf32>
    %99 = arith.maximumf %98, %97 : vector<1x32xf32>
    %100 = vector.broadcast %cst_38 : f32 to vector<1x32xf32>
    %101 = arith.minimumf %100, %99 : vector<1x32xf32>
    %cst_39 = arith.constant 0.166666672 : f32
    %102 = vector.broadcast %cst_39 : f32 to vector<1x32xf32>
    %103 = arith.mulf %101, %102 : vector<1x32xf32>
    %104 = vector.broadcast %103 : vector<1x32xf32> to vector<256x32xf32>
    %105 = arith.mulf %85, %104 : vector<256x32xf32>
    %cst_40 = arith.constant 3.000000e+00 : f32
    %106 = vector.broadcast %cst_40 : f32 to vector<256x32xf32>
    %107 = arith.addf %105, %106 : vector<256x32xf32>
    %cst_41 = arith.constant 0.000000e+00 : f32
    %cst_42 = arith.constant 6.000000e+00 : f32
    %108 = vector.broadcast %cst_41 : f32 to vector<256x32xf32>
    %109 = arith.maximumf %108, %107 : vector<256x32xf32>
    %110 = vector.broadcast %cst_42 : f32 to vector<256x32xf32>
    %111 = arith.minimumf %110, %109 : vector<256x32xf32>
    %112 = arith.mulf %105, %111 : vector<256x32xf32>
    %cst_43 = arith.constant 0.166666672 : f32
    %113 = vector.broadcast %cst_43 : f32 to vector<256x32xf32>
    %114 = arith.mulf %112, %113 : vector<256x32xf32>
    %c0_44 = arith.constant 0 : index
    %c0_45 = arith.constant 0 : index
    %115 = vector.load %arg10[%c0_44, %c0_45] : memref<32x16xf32, #tpu.memory_space<vmem>>, vector<32x16xf32>
    %cst_46 = arith.constant dense<0.000000e+00> : vector<256x16xf32>
    %116 = tpu.matmul %114, %115, %cst_46 {dimension_numbers = #tpu.dot_dimension_numbers<[1], [0], [0], [1], [0, 0, 1, 1], [], []>} : vector<256x32xf32>, vector<32x16xf32>, vector<256x16xf32> -> vector<256x16xf32>
    %117 = tpu.transpose %116, [1, 0] : vector<256x16xf32> -> vector<16x256xf32>
    %c0_47 = arith.constant 0 : index
    %c0_48 = arith.constant 0 : index
    %118 = vector.load %arg11[%c0_47, %c0_48] : memref<16x1xf32, #tpu.memory_space<vmem>>, vector<16x1xf32>
    %119 = vector.broadcast %118 : vector<16x1xf32> to vector<16x256xf32>
    %120 = arith.mulf %117, %119 : vector<16x256xf32>
    %c0_49 = arith.constant 0 : index
    %c0_50 = arith.constant 0 : index
    %121 = vector.load %arg12[%c0_49, %c0_50] : memref<16x1xf32, #tpu.memory_space<vmem>>, vector<16x1xf32>
    %122 = vector.broadcast %121 : vector<16x1xf32> to vector<16x256xf32>
    %123 = arith.addf %120, %122 : vector<16x256xf32>
    %124 = arith.addf %123, %1 : vector<16x256xf32>
    %c0_51 = arith.constant 0 : index
    %c0_52 = arith.constant 0 : index
    %c0_53 = arith.constant 0 : index
    %125 = vector.load %arg13[%c0_51, %c0_52, %c0_53] : memref<1x16x256xf32, #tpu.memory_space<vmem>>, vector<1x16x256xf32>
    %126 = vector.shape_cast %125 : vector<1x16x256xf32> to vector<16x256xf32>
    %127 = vector.shape_cast %124 : vector<16x256xf32> to vector<1x16x256xf32>
    tpu.vector_store %arg13[%c0_51, %c0_52, %c0_53], %127 {strides = array<i32>} : memref<1x16x256xf32, #tpu.memory_space<vmem>>, vector<1x16x256xf32>,
    return
  }
  func.func @transform_0(%arg0: i32) -> (i32, i32, i32) {
    %c0_i32 = arith.constant 0 : i32
    %c0_i32_0 = arith.constant 0 : i32
    %c0_i32_1 = arith.constant 0 : i32
    return %arg0, %c0_i32, %c0_i32_0 : i32, i32, i32
  }
  func.func @transform_1(%arg0: i32) -> (i32, i32) {
    %c0_i32 = arith.constant 0 : i32
    %c0_i32_0 = arith.constant 0 : i32
    %c0_i32_1 = arith.constant 0 : i32
    return %c0_i32, %c0_i32_0 : i32, i32
  }
  func.func @transform_2(%arg0: i32) -> (i32, i32) {
    %c0_i32 = arith.constant 0 : i32
    %c0_i32_0 = arith.constant 0 : i32
    %c0_i32_1 = arith.constant 0 : i32
    return %c0_i32, %c0_i32_0 : i32, i32
  }
  func.func @transform_3(%arg0: i32) -> (i32, i32) {
    %c0_i32 = arith.constant 0 : i32
    %c0_i32_0 = arith.constant 0 : i32
    %c0_i32_1 = arith.constant 0 : i32
    return %c0_i32, %c0_i32_0 : i32, i32
  }
  func.func @transform_4(%arg0: i32) -> (i32, i32) {
    %c0_i32 = arith.constant 0 : i32
    %c0_i32_0 = arith.constant 0 : i32
    %c0_i32_1 = arith.constant 0 : i32
    return %c0_i32, %c0_i32_0 : i32, i32
  }
  func.func @transform_5(%arg0: i32) -> (i32, i32) {
    %c0_i32 = arith.constant 0 : i32
    %c0_i32_0 = arith.constant 0 : i32
    %c0_i32_1 = arith.constant 0 : i32
    return %c0_i32, %c0_i32_0 : i32, i32
  }
  func.func @transform_6(%arg0: i32) -> (i32, i32) {
    %c0_i32 = arith.constant 0 : i32
    %c0_i32_0 = arith.constant 0 : i32
    %c0_i32_1 = arith.constant 0 : i32
    return %c0_i32, %c0_i32_0 : i32, i32
  }
  func.func @transform_7(%arg0: i32) -> (i32, i32) {
    %c0_i32 = arith.constant 0 : i32
    %c0_i32_0 = arith.constant 0 : i32
    %c0_i32_1 = arith.constant 0 : i32
    return %c0_i32, %c0_i32_0 : i32, i32
  }
  func.func @transform_8(%arg0: i32) -> (i32, i32) {
    %c0_i32 = arith.constant 0 : i32
    %c0_i32_0 = arith.constant 0 : i32
    %c0_i32_1 = arith.constant 0 : i32
    return %c0_i32, %c0_i32_0 : i32, i32
  }
  func.func @transform_9(%arg0: i32) -> (i32, i32) {
    %c0_i32 = arith.constant 0 : i32
    %c0_i32_0 = arith.constant 0 : i32
    %c0_i32_1 = arith.constant 0 : i32
    return %c0_i32, %c0_i32_0 : i32, i32
  }
  func.func @transform_10(%arg0: i32) -> (i32, i32) {
    %c0_i32 = arith.constant 0 : i32
    %c0_i32_0 = arith.constant 0 : i32
    %c0_i32_1 = arith.constant 0 : i32
    return %c0_i32, %c0_i32_0 : i32, i32
  }
  func.func @transform_11(%arg0: i32) -> (i32, i32) {
    %c0_i32 = arith.constant 0 : i32
    %c0_i32_0 = arith.constant 0 : i32
    %c0_i32_1 = arith.constant 0 : i32
    return %c0_i32, %c0_i32_0 : i32, i32
  }
  func.func @transform_12(%arg0: i32) -> (i32, i32, i32) {
    %c0_i32 = arith.constant 0 : i32
    %c0_i32_0 = arith.constant 0 : i32
    %c0_i32_1 = arith.constant 0 : i32
    return %arg0, %c0_i32, %c0_i32_0 : i32, i32, i32
  }
}

</mosaic_0001>

<bundles_post_ra>
// kernel: tpu_custom_call.1
= control target key start
LH: loop header
LB: loop body
LE: loop exit
PB: predicated region body
PF: predicated region fallthrough
CT: control target
= control target key end

     0   :  { %s7011_s0 = inlined_call_operand.vmem [shape: f32[2,16,256], index: 0, kind: input, shape index: {}]   ;;  %s7012_s1 = inlined_call_operand.vmem [shape: f32[16,32], index: 1, kind: input, shape index: {}]   ;;  %s7013_s2 = inlined_call_operand.vmem [shape: f32[1,32], index: 2, kind: input, shape index: {}]   ;;  %s7014_s3 = inlined_call_operand.vmem [shape: f32[1,32], index: 3, kind: input, shape index: {}]   ;;  %s7015_s4 = inlined_call_operand.vmem [shape: f32[9,32], index: 4, kind: input, shape index: {}]   ;;  %s7016_s5 = inlined_call_operand.vmem [shape: f32[1,32], index: 5, kind: input, shape index: {}]   ;;  %s7017_s6 = inlined_call_operand.vmem [shape: f32[1,32], index: 6, kind: input, shape index: {}]   ;;  %s7018_s7 = inlined_call_operand.vmem [shape: f32[32,8], index: 7, kind: input, shape index: {}]   ;;  %s7019_s8 = inlined_call_operand.vmem [shape: f32[8,32], index: 8, kind: input, shape index: {}]   ;;  %s7020_s9 = inlined_call_operand.vmem [shape: f32[32,16], index: 9, kind: input, shape index: {}]   ;;  %s7021_s10 = inlined_call_operand.vmem [shape: f32[16,1], index: 10, kind: input, shape index: {}]   ;;  %s7022_s11 = inlined_call_operand.vmem [shape: f32[16,1], index: 11, kind: input, shape index: {}]   ;;  %s7023_s12 = inlined_call_operand.hbm [shape: f32[2,16,256], index: 12, kind: output, shape index: {}]  }
   0x1   :  { %7120 = sst [smem:[#allocation90_spill]] %s7011_s0 }
   0x2   :  { %7121 = sst [smem:[#allocation91_spill]] %s7012_s1 }
   0x3   :  { %7122 = sst [smem:[#allocation92_spill]] %s7013_s2 }
   0x4   :  { %17 = vsyncpa [#allocation4], 0 }
   0x5   :  { %19 = vsyncpa [#allocation4 + $0x1], 0  ;;  %s4328_s21 = smov 0   ;;  %s4330_s22 = smov 0  }
   0x6   :  { %s4332_s23 = smov 0   ;;  %s4334_s24 = smov 0  }
   0x7 LB: > { %s4349_s25 = sadd.s32 4294967295, %s4254_s24   ;;  %s3831_s26 = sadd.s32 4294967294, %s4254_s24   ;;  %s4254_s24 = sphi %s4334_s24, %s7432_s24   ;;  %s4250_s23 = sphi %s4332_s23, %s7431_s23   ;;  %s4246_s22 = sphi %s4330_s22, %s7430_s22   ;;  %s4242_s21 = sphi %s4328_s21, %s7429_s21  }
   0x8   : > { %s4353_s27 = sadd.s32 1, %s4254_s24   ;;  %s289_s28 = sadd.s32 1, %s4250_s23 }
   0x9   : > { %s286_s29 = ssub.s32 %s4254_s24, %s4353_s27  ;;  %p299_p0 = scmp.ne.s32.totalorder %s4250_s23, %s4246_s22 }
   0xa   : > { %p287_p1 = scmp.eq.s32.totalorder %s286_s29, 0  ;;  %p300_p2 = scmp.eq.s32.totalorder %s4349_s25, 1 }
   0xb   : > { %p305_p3 = scmp.ne.s32.totalorder %s4246_s22, %s4242_s21  ;;  %p306_p4 = scmp.eq.s32.totalorder %s3831_s26, 1 }
   0xc   : > { %s4364_s30 = scalar_select %p287_p1, %s4250_s23, %s289_s28  }
   0xd   : > { %p4366_p5 = por %p300_p2, %p299_p0  ;;  %p4370_p6 = por %p306_p4, %p305_p3 }
   0xe   : > { %p3834_p7 = scmp.ge.s32.totalorder %s4254_s24, 1  ;;  %p365_p8 = scmp.lt.s32.totalorder %s4254_s24, 3 }
  0x10   : > { %p366_p9 = pnand %p3834_p7, %p365_p8 }
  0x12   : > { %369 = sbr.rel (%p366_p9) target bundleno = 1653 (0x675), region = 68 }
  0x19   : > { %p407_p10 = scmp.lt.s32.totalorder %s4349_s25, 1  ;;  %s7125_s0 = sld [smem:[#allocation90_spill]]  ;;  %v7025_v7 = vmov 0.0   ;;  %vm482_vm0 = vcmask 130048   ;;  %vm1042_vm1 = vcmask 261120   ;;  %vm1045_vm2 = vcmask 254976  }
  0x1a   : > { %s7126_s1 = sld [smem:[#allocation91_spill]]  ;;  %4056 = vmatprep.subr.mxu1 %v7025_v7  ;;  %1048 = vst.msk [vmem:[#allocation2 + $0x20] sm:$0xff] %vm1042_vm1, %v7025_v7  ;;  %1043 = vst.msk [vmem:[#allocation2] sm:$0xff] %vm1042_vm1, %v7025_v7  ;;  %s7127_s2 = sld [smem:[#allocation92_spill]]  ;;  %v4542_v42 = vld [vmem:[%s7014_s3] ss:$0 sm:$0xff] }
  0x1b   : > { %s408_s15 = scalar_select %p407_p10, %s4349_s25, 1  ;;  %1049 = vst.msk [vmem:[#allocation2 + $0x28] sm:$0x3] %vm1045_vm2, %v7025_v7  ;;  %1046 = vst.msk [vmem:[#allocation2 + $0x10] sm:$0x3] %vm1045_vm2, %v7025_v7  ;;  %vm1323_vm3 = vcmask 1046528  }
  0x1c   : > { %1044 = vst.msk [vmem:[#allocation2 + $0x8] sm:$0xff] %vm1042_vm1, %v7025_v7  ;;  %1047 = vst.msk [vmem:[#allocation2 + $0x18] sm:$0xff] %vm1042_vm1, %v7025_v7  ;;  %vm1568_vm4 = vcmask 1045504   ;;  %vm4258_vm5 = vmmov 0   ;;  %vm3053_vm6 = vcmask 64512   ;;  %s404_s17 = sand.u32 1, %s4246_s22  }
  0x1d   : > { %s3914_s16 = sshll.u32 %s408_s15, 5  ;;  %1050 = vst.msk [vmem:[#allocation2 + $0x30] sm:$0xff] %vm1042_vm1, %v7025_v7  ;;  %1051 = vst.msk [vmem:[#allocation2 + $0x38] sm:$0xff] %vm1042_vm1, %v7025_v7  ;;  %s3835_s18 = sshll.u32 %s404_s17, 5 }
  0x1e   : > { %1052 = vst.msk [vmem:[#allocation2 + $0x40] sm:$0x3] %vm1045_vm2, %v7025_v7  ;;  %1055 = vst.msk [vmem:[#allocation2 + $0x58] sm:$0x3] %vm1045_vm2, %v7025_v7  ;;  %s406_s20 = scalar_lea.vmem [#allocation3], %s3835_s18  ;;  %s3915_s28 = sshll.u32 %s4349_s25, 9 }
  0x1f   : > { %s4381_s19 = scalar_lea.vmem %s7125_s0, %s3914_s16  ;;  %1053 = vst.msk [vmem:[#allocation2 + $0x48] sm:$0xff] %vm1042_vm1, %v7025_v7  ;;  %1054 = vst.msk [vmem:[#allocation2 + $0x50] sm:$0xff] %vm1042_vm1, %v7025_v7  ;;  %s3769_s26 = sshll.u32 %s406_s20, 4  ;;  %s6960_s26 = int_to_ptr.vmem [resolvable:$true] %s3769_s26 }
  0x20   : > { %v480_v0 = vld [vmem:[%s7126_s1] sm:$0xff]  ;;  %v481_v1 = vld [vmem:[%s7126_s1 + $0x8] sm:$0xff]  ;;  %v414_v5 = vld [vmem:[%s4381_s19 + $0x10] sm:$0xff]  ;;  %1056 = vst.msk [vmem:[#allocation2 + $0x60] sm:$0xff] %vm1042_vm1, %v7025_v7  ;;  %s6966_s16 = scalar_lea.hbm %s7023_s12, %s3915_s28  ;;  %s6970_s18 = scalar_lea.sflag [#allocation4], %s404_s17 }
  0x21   : > { %v412_v2 = vld [vmem:[%s4381_s19] sm:$0xff]  ;;  %v413_v3 = vld [vmem:[%s4381_s19 + $0x8] sm:$0xff]  ;;  %v4117_v4 = vpack.c.bf16 %v481_v1, %v480_v0  ;;  %v415_v6 = vld [vmem:[%s4381_s19 + $0x18] sm:$0xff]  ;;  %1057 = vst.msk [vmem:[#allocation2 + $0x68] sm:$0xff] %vm1042_vm1, %v7025_v7  ;;  %s4192_s0 = scalar_lea.vmem %s6960_s26, 512  ;;  %s4260_s25 = smov [#allocation3]  }
  0x22   : > { %416 = vxpose.xlu0.b32.start [1/2] (short) %v412_v2, 128  ;;  %448 = vxpose.xlu1.b32.start [1/2] (short) %v413_v3, 128  ;;  %1058 = vst.msk [vmem:[#allocation2 + $0x70] sm:$0x3] %vm1045_vm2, %v7025_v7  ;;  %1061 = vst.msk [vmem:[#allocation2 + $0x88] sm:$0x3] %vm1045_vm2, %v7025_v7  ;;  %v4537_v40 = vld [vmem:[%s7127_s2] ss:$0 sm:$0xff]  ;;  %p4193_p11 = scmp.ne.s32.totalorder %s6960_s26, %s4192_s0 }
  0x23   : > { %4118 = vmatprep.subr.bf16.mxu0 %v4117_v4  ;;  %1059 = vst.msk [vmem:[#allocation2 + $0x78] sm:$0xff] %vm1042_vm1, %v7025_v7  ;;  %1060 = vst.msk [vmem:[#allocation2 + $0x80] sm:$0xff] %vm1042_vm1, %v7025_v7  ;;  %s4196_s1 = sshll.u32 %s4260_s25, 4  ;;  %s4197_s1 = int_to_ptr.vmem [resolvable:$false] %s4196_s1 }
  0x24   : > { %4120 = vmatpush3.bf16.msra.mxu0 %v4117_v4  ;;  %1062 = vst.msk [vmem:[#allocation2 + $0x90] sm:$0xff] %vm1042_vm1, %v7025_v7  ;;  %1063 = vst.msk [vmem:[#allocation2 + $0x98] sm:$0xff] %vm1042_vm1, %v7025_v7  ;;  %p4194_p12 = pnand %p4193_p11, %p4366_p5  ;;  %p4199_p0 = scmp.lt.s32.totalorder %s6960_s26, %s4197_s1 }
  0x25   : > { %1064 = vst.msk [vmem:[#allocation2 + $0xa0] sm:$0x3] %vm1045_vm2, %v7025_v7  ;;  %1067 = vst.msk [vmem:[#allocation2 + $0xb8] sm:$0x3] %vm1045_vm2, %v7025_v7 }
  0x26   : > { %417 = vxpose.xlu0.b32.end [2/2] (short) %v414_v5, 128  ;;  %449 = vxpose.xlu1.b32.end [2/2] (short) %v415_v6, 128  ;;  %1065 = vst.msk [vmem:[#allocation2 + $0xa8] sm:$0xff] %vm1042_vm1, %v7025_v7  ;;  %1066 = vst.msk [vmem:[#allocation2 + $0xb0] sm:$0xff] %vm1042_vm1, %v7025_v7  ;;  %p4195_p13 = pneg %p4194_p12 }
  0x27   : > { %1068 = vst.msk [vmem:[#allocation2 + $0xc0] sm:$0xff] %vm1042_vm1, %v7025_v7  ;;  %1069 = vst.msk [vmem:[#allocation2 + $0xc8] sm:$0xff] %vm1042_vm1, %v7025_v7 }
  0x28   : > { %1070 = vst.msk [vmem:[#allocation2 + $0xd0] sm:$0x3] %vm1045_vm2, %v7025_v7  ;;  %1073 = vst.msk [vmem:[#allocation2 + $0xe8] sm:$0x3] %vm1045_vm2, %v7025_v7 }
  0x29   : > { %1071 = vst.msk [vmem:[#allocation2 + $0xd8] sm:$0xff] %vm1042_vm1, %v7025_v7  ;;  %1072 = vst.msk [vmem:[#allocation2 + $0xe0] sm:$0xff] %vm1042_vm1, %v7025_v7 }
  0x2a   : > { %1074 = vst.msk [vmem:[#allocation2 + $0xf0] sm:$0xff] %vm1042_vm1, %v7025_v7  ;;  %1075 = vst.msk [vmem:[#allocation2 + $0xf8] sm:$0xff] %vm1042_vm1, %v7025_v7 }
  0x2b   : > { %1076 = vst.msk [vmem:[#allocation2 + $0x100] sm:$0x3] %vm1045_vm2, %v7025_v7  ;;  %1079 = vst.msk [vmem:[#allocation2 + $0x118] sm:$0x3] %vm1045_vm2, %v7025_v7 }
  0x2c   : > { %1077 = vst.msk [vmem:[#allocation2 + $0x108] sm:$0xff] %vm1042_vm1, %v7025_v7  ;;  %1078 = vst.msk [vmem:[#allocation2 + $0x110] sm:$0xff] %vm1042_vm1, %v7025_v7 }
  0x2d   : > { %1080 = vst.msk [vmem:[#allocation2 + $0x120] sm:$0xff] %vm1042_vm1, %v7025_v7  ;;  %1081 = vst.msk [vmem:[#allocation2 + $0x128] sm:$0xff] %vm1042_vm1, %v7025_v7 }
  0x2e   : > { %1082 = vst.msk [vmem:[#allocation2 + $0x130] sm:$0x3] %vm1045_vm2, %v7025_v7  ;;  %1085 = vst.msk [vmem:[#allocation2 + $0x148] sm:$0x3] %vm1045_vm2, %v7025_v7 }
  0x2f   : > { %1083 = vst.msk [vmem:[#allocation2 + $0x138] sm:$0xff] %vm1042_vm1, %v7025_v7  ;;  %1084 = vst.msk [vmem:[#allocation2 + $0x140] sm:$0xff] %vm1042_vm1, %v7025_v7 }
  0x30   : > { %1086 = vst.msk [vmem:[#allocation2 + $0x150] sm:$0xff] %vm1042_vm1, %v7025_v7  ;;  %1087 = vst.msk [vmem:[#allocation2 + $0x158] sm:$0xff] %vm1042_vm1, %v7025_v7 }
  0x31   : > { %1088 = vst.msk [vmem:[#allocation2 + $0x160] sm:$0x3] %vm1045_vm2, %v7025_v7  ;;  %1091 = vst.msk [vmem:[#allocation2 + $0x178] sm:$0x3] %vm1045_vm2, %v7025_v7 }
  0x32   : > { %1089 = vst.msk [vmem:[#allocation2 + $0x168] sm:$0xff] %vm1042_vm1, %v7025_v7  ;;  %1090 = vst.msk [vmem:[#allocation2 + $0x170] sm:$0xff] %vm1042_vm1, %v7025_v7 }
  0x33   : > { %1092 = vst.msk [vmem:[#allocation2 + $0x180] sm:$0xff] %vm1042_vm1, %v7025_v7  ;;  %1093 = vst.msk [vmem:[#allocation2 + $0x188] sm:$0xff] %vm1042_vm1, %v7025_v7 }
  0x34   : > { %1094 = vst.msk [vmem:[#allocation2 + $0x190] sm:$0x3] %vm1045_vm2, %v7025_v7  ;;  %1097 = vst.msk [vmem:[#allocation2 + $0x1a8] sm:$0x3] %vm1045_vm2, %v7025_v7 }
  0x35   : > { %1095 = vst.msk [vmem:[#allocation2 + $0x198] sm:$0xff] %vm1042_vm1, %v7025_v7  ;;  %1096 = vst.msk [vmem:[#allocation2 + $0x1a0] sm:$0xff] %vm1042_vm1, %v7025_v7 }
  0xa2   : > { %v432_v8 = vpop.trf.xlu0  ;;  %v464_v9 = vpop.trf.xlu1 }
  0xa3   : > { %3997 = vmatprep.mubr.msk.f32.mxu0 %vm482_vm0, %v432_v8 }
  0xa6   : > { %v433_v10 = vpop.trf.xlu0  ;;  %v465_v11 = vpop.trf.xlu1 }
  0xa7   : > { %3998 = vmatmul.mubr.msk.f32.vlgmr.msra.gmra.mrb[0].mxu0 %vm482_vm0, %v433_v10 }
  0xaa   : > { %v434_v12 = vpop.trf.xlu0  ;;  %v466_v14 = vpop.trf.xlu1 }
  0xab   : > { %4000 = vmatprep.mubr.msk.f32.mxu0 %vm482_vm0, %v434_v12 }
  0xae   : > { %v435_v13 = vpop.trf.xlu0  ;;  %v467_v16 = vpop.trf.xlu1 }
  0xaf   : > { %4001 = vmatmul.mubr.msk.f32.gmra.mrb[2].mxu0 %vm482_vm0, %v435_v13  ;;  %v1187_v13 = vlaneseq }
  0xb2   : > { %v436_v15 = vpop.trf.xlu0  ;;  %v468_v19 = vpop.trf.xlu1 }
  0xb3   : > { %4003 = vmatprep.mubr.msk.f32.mxu0 %vm482_vm0, %v436_v15 }
  0xb6   : > { %v437_v17 = vpop.trf.xlu0  ;;  %v469_v21 = vpop.trf.xlu1 }
  0xb7   : > { %4004 = vmatmul.mubr.msk.f32.gmra.mrb[4].mxu0 %vm482_vm0, %v437_v17 }
  0xba   : > { %v438_v18 = vpop.trf.xlu0  ;;  %v470_v24 = vpop.trf.xlu1 }
  0xbb   : > { %4006 = vmatprep.mubr.msk.f32.mxu0 %vm482_vm0, %v438_v18  ;;  %v4566_v18 = vld [vmem:[%s7015_s4] sm:$0xff] }
  0xbe   : > { %v439_v20 = vpop.trf.xlu0  ;;  %v471_v26 = vpop.trf.xlu1 }
  0xbf   : > { %4007 = vmatmul.mubr.msk.f32.gmra.mrb[6].mxu0 %vm482_vm0, %v439_v20 }
  0xc2   : > { %v440_v22 = vpop.trf.xlu0  ;;  %v472_v29 = vpop.trf.xlu1 }
  0xc3   : > { %4009 = vmatprep.mubr.msk.f32.mxu0 %vm482_vm0, %v440_v22 }
  0xc6   : > { %v441_v23 = vpop.trf.xlu0  ;;  %v473_v31 = vpop.trf.xlu1 }
  0xc7   : > { %4010 = vmatmul.mubr.msk.f32.gmra.mrb[8].mxu0 %vm482_vm0, %v441_v23 }
  0xca   : > { %v442_v25 = vpop.trf.xlu0  ;;  %v474_v34 = vpop.trf.xlu1 }
  0xcb   : > { %4012 = vmatprep.mubr.msk.f32.mxu0 %vm482_vm0, %v442_v25  ;;  %v1131_v25 = vld [vmem:[#allocation2] sm:$0xff] }
  0xce   : > { %v443_v27 = vpop.trf.xlu0  ;;  %v475_v35 = vpop.trf.xlu1 }
  0xcf   : > { %4013 = vmatmul.mubr.msk.f32.gmra.mrb[10].mxu0 %vm482_vm0, %v443_v27  ;;  %v1133_v27 = vld [vmem:[#allocation2 + $0x10] sm:$0x3] }
  0xd2   : > { %v444_v28 = vpop.trf.xlu0  ;;  %v476_v36 = vpop.trf.xlu1 }
  0xd3   : > { %4015 = vmatprep.mubr.msk.f32.mxu0 %vm482_vm0, %v444_v28 }
  0xd6   : > { %v445_v30 = vpop.trf.xlu0  ;;  %v477_v37 = vpop.trf.xlu1 }
  0xd7   : > { %4016 = vmatmul.mubr.msk.f32.gmra.mrb[12].mxu0 %vm482_vm0, %v445_v30 }
  0xda   : > { %v446_v32 = vpop.trf.xlu0  ;;  %v478_v38 = vpop.trf.xlu1 }
  0xdb   : > { %4018 = vmatprep.mubr.msk.f32.mxu0 %vm482_vm0, %v446_v32 }
  0xde   : > { %v447_v33 = vpop.trf.xlu0  ;;  %v479_v39 = vpop.trf.xlu1 }
  0xdf   : > { %4019 = vmatmul.mubr.msk.f32.gmra.mrb[14].mxu0 %vm482_vm0, %v447_v33 }
  0xe0   : > { %4021 = vmatprep.mubr.msk.f32.mxu0 %vm482_vm0, %v464_v9 }
  0xe3   : > { %4022 = vmatmul.mubr.msk.f32.gmra.mrb[16].mxu0 %vm482_vm0, %v465_v11 }
  0xe4   : > { %4024 = vmatprep.mubr.msk.f32.mxu0 %vm482_vm0, %v466_v14 }
  0xe7   : > { %4025 = vmatmul.mubr.msk.f32.gmra.mrb[18].mxu0 %vm482_vm0, %v467_v16  ;;  %v4560_v16 = vshrl.u32 %v1187_v13, 7 }
  0xe8   : > { %4027 = vmatprep.mubr.msk.f32.mxu0 %vm482_vm0, %v468_v19 }
  0xe9   : > { %7128 = vst [vmem:[#allocation6_spill] sm:$0xff] %v4560_v16  ;;  %v1225_v17 = vsub.s32 1, %v4560_v16 }
  0xeb   : > { %4028 = vmatmul.mubr.msk.f32.gmra.mrb[20].mxu0 %vm482_vm0, %v469_v21  ;;  %v4575_v23 = vrot.slane %v4566_v18, %v1225_v17 }
  0xec   : > { %4030 = vmatprep.mubr.msk.f32.mxu0 %vm482_vm0, %v470_v24  ;;  %v1470_v24 = vsub.s32 2, %v4560_v16 }
  0xed   : > { %v1227_v32 = vmul.f32 %v4575_v23, %v1131_v25 }
  0xee   : > { %v4581_v30 = vrot.slane %v4566_v18, %v1470_v24  ;;  %v2271_v24 = vsub.s32 6, %v4560_v16 }
  0xef   : > { %4031 = vmatmul.mubr.msk.f32.gmra.mrb[22].mxu0 %vm482_vm0, %v471_v26  ;;  %v1132_v26 = vld [vmem:[#allocation2 + $0x8] sm:$0xff] }
  0xf0   : > { %4033 = vmatprep.mubr.msk.f32.mxu0 %vm482_vm0, %v472_v29  ;;  %v1228_v33 = vmul.f32 %v4575_v23, %v1132_v26 }
  0xf3   : > { %4034 = vmatmul.mubr.msk.f32.gmra.mrb[24].mxu0 %vm482_vm0, %v473_v31  ;;  %v7024_v31 = vsub.s32 0, %v4560_v16 }
  0xf4   : > { %4036 = vmatprep.mubr.msk.f32.mxu0 %vm482_vm0, %v474_v34 }
  0xf7   : > { %4037 = vmatmul.mubr.msk.f32.gmra.mrb[26].mxu0 %vm482_vm0, %v475_v35  ;;  %v1229_v35 = vmul.f32 %v4575_v23, %v1133_v27 }
  0xf8   : > { %4039 = vmatprep.mubr.msk.f32.mxu0 %vm482_vm0, %v476_v36 }
  0xfb   : > { %4040 = vmatmul.mubr.msk.f32.gmra.mrb[28].mxu0 %vm482_vm0, %v477_v37 }
  0xfc   : > { %4042 = vmatprep.mubr.msk.f32.mxu0 %vm482_vm0, %v478_v38 }
  0xff   : > { %4043 = vmatmul.mubr.msk.f32.gmra.mrb[30].mxu0 %vm482_vm0, %v479_v39  ;;  %v4594_v39 = vrot.slane %v4566_v18, %v7024_v31 }
 0x17a   : > { %v3999_v41 = vpop.f32.mrb[0].mxu0 }
 0x17b   : > { %v812_v43 = vmul.f32 %v3999_v41, %v4537_v40  ;;  %v645_v44 = vpop.f32.mrb[1].mxu0  ;;  %v1324_v41 = vrot.slane %v1227_v32, 1 }
 0x17c   : > { %v811_v45 = vmul.f32 %v4537_v40, %v645_v44  ;;  %v1472_v44 = vmul.f32 %v4581_v30, %v1131_v25 }
 0x17d   : > { %v851_v46 = vadd.f32 %v4542_v42, %v812_v43  ;;  %v1325_v43 = vrot.slane %v1228_v33, 1 }
 0x17e   : > { %v850_v47 = vadd.f32 %v4542_v42, %v811_v45  ;;  %v1473_v45 = vmul.f32 %v4581_v30, %v1132_v26 }
 0x17f   : > { %v883_v48 = vadd.f32 3.0, %v851_v46 }
 0x180   : > { %v882_v49 = vadd.f32 3.0, %v850_v47 }
 0x181   : > { %v915_v50 = vmax.f32 %v883_v48, 0.0  ;;  %v1327_v48 = vrot.slane %v1229_v35, 1 }
 0x182   : > { %v914_v51 = vmax.f32 %v882_v49, 0.0  ;;  %v4002_v52 = vpop.f32.mrb[2].mxu0  ;;  %v2027_v49 = vsub.s32 5, %v4560_v16 }
 0x183   : > { %v947_v53 = vmin.f32 %v915_v50, 6.0  ;;  %v814_v54 = vmul.f32 %v4002_v52, %v4537_v40  ;;  %v655_v55 = vpop.f32.mrb[3].mxu0 }
 0x184   : > { %v946_v56 = vmin.f32 %v914_v51, 6.0  ;;  %v813_v57 = vmul.f32 %v4537_v40, %v655_v55  ;;  %v1191_v55 = vmul.f32 %v4594_v39, %v1131_v25 }
 0x185   : > { %v979_v58 = vmul.f32 %v947_v53, %v851_v46  ;;  %v853_v59 = vadd.f32 %v4542_v42, %v814_v54  ;;  %v1474_v46 = vmul.f32 %v4581_v30, %v1133_v27 }
 0x186   : > { %v978_v60 = vmul.f32 %v946_v56, %v850_v47  ;;  %v852_v61 = vadd.f32 %v4542_v42, %v813_v57  ;;  %v1783_v47 = vsub.s32 4, %v4560_v16  ;;  %v1192_v56 = vmul.f32 %v4594_v39, %v1132_v26 }
 0x187   : > { %v1011_v62 = vmul.f32 0.16666667, %v979_v58  ;;  %v885_v63 = vadd.f32 3.0, %v853_v59  ;;  %v1326_v57 = vsel %vm1323_vm3, %v1324_v41, %v1325_v43  ;;  %v1569_v58 = vrot.slane %v1472_v44, 2 }
 0x188   : > { %v1010_v0 = vmul.f32 0.16666667, %v978_v60  ;;  %v884_v1 = vadd.f32 3.0, %v852_v61  ;;  %v1572_v60 = vrot.slane %v1474_v46, 2 }
 0x189   : > { %1100 = vst.msk [vmem:[#allocation2 + $0x21] sm:$0xff] %vm1042_vm1, %v1011_v62  ;;  %v917_v2 = vmax.f32 %v885_v63, 0.0 }
 0x18a   : > { %1099 = vst.msk [vmem:[#allocation2 + $0x19] sm:$0xff] %vm1042_vm1, %v1010_v0  ;;  %v916_v3 = vmax.f32 %v884_v1, 0.0  ;;  %v4005_v4 = vpop.f32.mrb[4].mxu0  ;;  %v4611_v0 = vrot.slane %v4566_v18, %v1783_v47  ;;  %v1328_v1 = vsel %vm1323_vm3, %v1325_v43, %v1327_v48 }
 0x18b   : > { %v949_v5 = vmin.f32 %v917_v2, 6.0  ;;  %v665_v6 = vpop.f32.mrb[5].mxu0  ;;  %v816_v21 = vmul.f32 %v4005_v4, %v4537_v40 }
 0x18c   : > { %v948_v8 = vmin.f32 %v916_v3, 6.0  ;;  %v815_v22 = vmul.f32 %v4537_v40, %v665_v6  ;;  %7129 = vst [vmem:[#allocation7_spill] sm:$0xff] %v4611_v0  ;;  %v1715_v6 = vsub.s32 3, %v4560_v16 }
 0x18d   : > { %v981_v9 = vmul.f32 %v949_v5, %v853_v59  ;;  %v855_v28 = vadd.f32 %v4542_v42, %v816_v21  ;;  %v1570_v59 = vrot.slane %v1473_v45, 2  ;;  %v2339_v21 = vsub.s32 7, %v4560_v16 }
 0x18e   : > { %v980_v10 = vmul.f32 %v948_v8, %v852_v61  ;;  %v854_v29 = vadd.f32 %v4542_v42, %v815_v22  ;;  %v4623_v8 = vrot.slane %v4566_v18, %v2027_v49  ;;  %v4631_v35 = vrot.slane %v4566_v18, %v1715_v6 }
 0x18f   : > { %v1013_v11 = vmul.f32 0.16666667, %v981_v9  ;;  %v887_v37 = vadd.f32 3.0, %v855_v28  ;;  %v1436_v9 = vadd.f32 %v1326_v57, %v1191_v55  ;;  %v1571_v13 = vsel %vm1568_vm4, %v1569_v58, %v1570_v59 }
 0x190   : > { %v1012_v12 = vmul.f32 0.16666667, %v980_v10  ;;  %v886_v38 = vadd.f32 3.0, %v854_v29  ;;  %v1136_v52 = vld [vmem:[#allocation2 + $0x28] sm:$0x3]  ;;  %7130 = vst [vmem:[#allocation8_spill] sm:$0xff] %v4623_v8  ;;  %v1573_v17 = vsel %vm1568_vm4, %v1570_v59, %v1572_v60  ;;  %v4645_v45 = vrot.slane %v4566_v18, %v2339_v21 }
 0x191   : > { %1102 = vst.msk [vmem:[#allocation2 + $0x39] sm:$0xff] %vm1042_vm1, %v1013_v11  ;;  %v919_v50 = vmax.f32 %v887_v37, 0.0  ;;  %v4601_v53 = vld [vmem:[#allocation2 + $0x18] sm:$0xff]  ;;  %v4603_v54 = vld [vmem:[#allocation2 + $0x20] sm:$0xff]  ;;  %v1232_v3 = vmul.f32 %v4575_v23, %v1136_v52  ;;  %v1787_v22 = vmul.f32 %v4611_v0, %v1136_v52  ;;  %7131 = vst [vmem:[#allocation9_spill] sm:$0xff] %v4631_v35  ;;  %v1477_v41 = vmul.f32 %v4581_v30, %v1136_v52 }
 0x192   : > { %1101 = vst.msk [vmem:[#allocation2 + $0x31] sm:$0xff] %vm1042_vm1, %v1012_v12  ;;  %v4556_v14 = vpop.f32.mrb[6].mxu0  ;;  %v918_v51 = vmax.f32 %v886_v38, 0.0  ;;  %v1230_v4 = vmul.f32 %v4575_v23, %v4601_v53  ;;  %v1231_v5 = vmul.f32 %v4575_v23, %v4603_v54  ;;  %v1437_v12 = vadd.f32 %v1328_v1, %v1192_v56  ;;  %7132 = vst [vmem:[#allocation10_spill] sm:$0xff] %v4645_v45 }
 0x193   : > { %v4558_v15 = vpop.f32.mrb[7].mxu0  ;;  %v951_v61 = vmin.f32 %v919_v50, 6.0  ;;  %v1332_v27 = vrot.slane %v1232_v3, 1  ;;  %v818_v37 = vmul.f32 %v4556_v14, %v4537_v40  ;;  %v1681_v43 = vadd.f32 %v1571_v13, %v1436_v9 }
 0x194   : > { %v950_v62 = vmin.f32 %v918_v51, 6.0  ;;  %v1329_v32 = vrot.slane %v1230_v4, 1  ;;  %v1330_v33 = vrot.slane %v1231_v5, 1  ;;  %v817_v38 = vmul.f32 %v4537_v40, %v4558_v15 }
 0x195   : > { %v983_v10 = vmul.f32 %v951_v61, %v855_v28  ;;  %v1785_v28 = vmul.f32 %v4611_v0, %v4601_v53  ;;  %v1682_v44 = vadd.f32 %v1573_v17, %v1437_v12  ;;  %v1884_v47 = vrot.slane %v1787_v22, 1 }
 0x196   : > { %v982_v11 = vmul.f32 %v950_v62, %v854_v29  ;;  %v1786_v29 = vmul.f32 %v4611_v0, %v4603_v54  ;;  %v1475_v48 = vmul.f32 %v4581_v30, %v4601_v53  ;;  %v1476_v49 = vmul.f32 %v4581_v30, %v4603_v54 }
 0x197   : > { %v1015_v25 = vmul.f32 0.16666667, %v983_v10  ;;  %v4654_v14 = vrot.slane %v4566_v18, %v2271_v24  ;;  %v1331_v50 = vsel %vm1323_vm3, %v1329_v32, %v1330_v33  ;;  %v1333_v51 = vsel %vm1323_vm3, %v1330_v33, %v1332_v27 }
 0x198   : > { %v1014_v26 = vmul.f32 0.16666667, %v982_v11  ;;  %v1717_v55 = vmul.f32 %v4631_v35, %v4601_v53  ;;  %v1718_v56 = vmul.f32 %v4631_v35, %v4603_v54  ;;  %v1881_v57 = vrot.slane %v1785_v28, 1  ;;  %v1139_v10 = vld [vmem:[#allocation2 + $0x40] sm:$0x3] }
 0x199   : > { %1104 = vst.msk [vmem:[#allocation2 + $0x51] sm:$0xff] %vm1042_vm1, %v1015_v25  ;;  %7133 = vst [vmem:[#allocation11_spill] sm:$0xff] %v4654_v14  ;;  %v1882_v58 = vrot.slane %v1786_v29, 1  ;;  %v4665_v59 = vadd.f32 %v4542_v42, %v818_v37  ;;  %v4668_v18 = vadd.f32 %v4542_v42, %v817_v38  ;;  %v1577_v60 = vrot.slane %v1477_v41, 2 }
 0x19a   : > { %v4568_v19 = vpop.f32.mrb[8].mxu0  ;;  %1103 = vst.msk [vmem:[#allocation2 + $0x49] sm:$0xff] %vm1042_vm1, %v1014_v26  ;;  %v2031_v61 = vmul.f32 %v4623_v8, %v1136_v52  ;;  %v1193_v62 = vmul.f32 %v4594_v39, %v4601_v53  ;;  %v1194_v1 = vmul.f32 %v4594_v39, %v4603_v54  ;;  %v1574_v4 = vrot.slane %v1475_v48, 2 }
 0x19b   : > { %v4570_v20 = vpop.f32.mrb[9].mxu0  ;;  %v1575_v5 = vrot.slane %v1476_v49, 2  ;;  %v2029_v6 = vmul.f32 %v4623_v8, %v4601_v53  ;;  %v2030_v9 = vmul.f32 %v4623_v8, %v4603_v54  ;;  %v1749_v13 = vadd.f32 %v1717_v55, %v1681_v43 }
 0x19c   : > { %v1438_v52 = vadd.f32 %v1331_v50, %v1193_v62  ;;  %v1439_v12 = vadd.f32 %v1333_v51, %v1194_v1  ;;  %v1750_v17 = vadd.f32 %v1718_v56, %v1682_v44  ;;  %v1883_v21 = vsel %vm1323_vm3, %v1881_v57, %v1882_v58  ;;  %v4718_v56 = vld [vmem:[#allocation2 + $0x30] sm:$0xff]  ;;  %v4720_v57 = vld [vmem:[#allocation2 + $0x38] sm:$0xff] }
 0x19d   : > { %v1885_v22 = vsel %vm1323_vm3, %v1882_v58, %v1884_v47  ;;  %v889_v24 = vadd.f32 3.0, %v4665_v59  ;;  %v888_v25 = vadd.f32 3.0, %v4668_v18  ;;  %v2128_v26 = vrot.slane %v2031_v61, 2 }
 0x19e   : > { %v4688_v53 = vmul.f32 %v4575_v23, %v1139_v10  ;;  %v820_v54 = vmul.f32 %v4568_v19, %v4537_v40  ;;  %v819_v27 = vmul.f32 %v4537_v40, %v4570_v20  ;;  %v1576_v33 = vsel %vm1568_vm4, %v1574_v4, %v1575_v5  ;;  %v4705_v19 = vld [vmem:[%s7015_s4 + $0x8] ss:$0 sm:$0xff] }
 0x19f   : > { %v1578_v28 = vsel %vm1568_vm4, %v1575_v5, %v1577_v60  ;;  %v2125_v29 = vrot.slane %v2029_v6, 2  ;;  %v2126_v37 = vrot.slane %v2030_v9, 2  ;;  %v4700_v41 = vadd.f32 %v1576_v33, %v1438_v52 }
 0x1a0   : > { %v1993_v43 = vadd.f32 %v1883_v21, %v1749_v13  ;;  %v1994_v44 = vadd.f32 %v1885_v22, %v1750_v17  ;;  %v4709_v47 = vadd.f32 %v1578_v28, %v1439_v12  ;;  %v4712_v48 = vmul.f32 %v4581_v30, %v1139_v10 }
 0x1a1   : > { %v921_v49 = vmax.f32 %v889_v24, 0.0  ;;  %v920_v50 = vmax.f32 %v888_v25, 0.0  ;;  %v4716_v55 = vmul.f32 %v4611_v0, %v1139_v10  ;;  %v859_v58 = vadd.f32 %v4542_v42, %v820_v54 }
 0x1a2   : > { %v4586_v34 = vpop.f32.mrb[10].mxu0  ;;  %v2127_v60 = vsel %vm1568_vm4, %v2125_v29, %v2126_v37  ;;  %v2129_v61 = vsel %vm1568_vm4, %v2126_v37, %v2128_v26  ;;  %v2343_v62 = vmul.f32 %v4645_v45, %v1139_v10  ;;  %v4728_v1 = vmul.f32 %v4705_v19, %v1139_v10 }
 0x1a3   : > { %v4589_v36 = vpop.f32.mrb[11].mxu0  ;;  %v822_v20 = vmul.f32 %v4586_v34, %v4537_v40  ;;  %v858_v34 = vadd.f32 %v4542_v42, %v819_v27  ;;  %v2237_v4 = vadd.f32 %v2127_v60, %v1993_v43  ;;  %v2238_v5 = vadd.f32 %v2129_v61, %v1994_v44 }
 0x1a4   : > { %v4731_v6 = vmul.f32 %v4623_v8, %v1139_v10  ;;  %v2341_v52 = vmul.f32 %v4645_v45, %v4718_v56  ;;  %v2342_v12 = vmul.f32 %v4645_v45, %v4720_v57  ;;  %v953_v13 = vmin.f32 %v921_v49, 6.0 }
 0x1a5   : > { %v4734_v9 = vadd.f32 %v4542_v42, %v822_v20  ;;  %v952_v17 = vmin.f32 %v920_v50, 6.0  ;;  %v1788_v22 = vmul.f32 %v4611_v0, %v4718_v56  ;;  %v4746_v10 = vmul.f32 %v4611_v0, %v4720_v57 }
 0x1a6   : > { %v891_v24 = vadd.f32 3.0, %v859_v58  ;;  %v890_v25 = vadd.f32 3.0, %v858_v34  ;;  %v2440_v27 = vrot.slane %v2343_v62, 1  ;;  %v2684_v33 = vrot.slane %v4728_v1, 2 }
 0x1a7   : > { %v4754_v28 = vmul.f32 %v4575_v23, %v4718_v56  ;;  %v1719_v29 = vmul.f32 %v4631_v35, %v4718_v56  ;;  %v2273_v37 = vmul.f32 %v4654_v14, %v4718_v56  ;;  %v2274_v43 = vmul.f32 %v4654_v14, %v4720_v57 }
 0x1a8   : > { %v893_v44 = vadd.f32 3.0, %v4734_v9  ;;  %v2437_v20 = vrot.slane %v2341_v52, 1  ;;  %v2438_v49 = vrot.slane %v2342_v12, 1  ;;  %v985_v50 = vmul.f32 %v953_v13, %v4665_v59 }
 0x1a9   : > { %v984_v60 = vmul.f32 %v952_v17, %v4668_v18  ;;  %v1886_v61 = vrot.slane %v1788_v22, 1  ;;  %v1887_v62 = vrot.slane %v4746_v10, 1  ;;  %v923_v1 = vmax.f32 %v891_v24, 0.0 }
 0x1aa   : > { %v4608_v63 = vpop.f32.mrb[12].mxu0  ;;  %v922_v31 = vmax.f32 %v890_v25, 0.0  ;;  %v2585_v51 = vmul.f32 %v4705_v19, %v4718_v56  ;;  %v2586_v54 = vmul.f32 %v4705_v19, %v4720_v57  ;;  %v1017_v16 = vmul.f32 0.16666667, %v985_v50 }
 0x1ab   : > { %v4614_v2 = vpop.f32.mrb[13].mxu0  ;;  %v1016_v52 = vmul.f32 0.16666667, %v984_v60  ;;  %v1234_v59 = vmul.f32 %v4575_v23, %v4720_v57  ;;  %v4776_v18 = vmul.f32 %v4581_v30, %v4718_v56  ;;  %v2305_v12 = vadd.f32 %v2273_v37, %v2237_v4 }
 0x1ac   : > { %v925_v13 = vmax.f32 %v893_v44, 0.0  ;;  %v1720_v22 = vmul.f32 %v4631_v35, %v4720_v57  ;;  %v2032_v10 = vmul.f32 %v4623_v8, %v4718_v56  ;;  %v2306_v24 = vadd.f32 %v2274_v43, %v2238_v5  ;;  %1106 = vst.msk [vmem:[#allocation2 + $0x69] sm:$0xff] %vm1042_vm1, %v1017_v16 }
 0x1ad   : > { %v2439_v25 = vsel %vm1323_vm3, %v2437_v20, %v2438_v49  ;;  %1105 = vst.msk [vmem:[#allocation2 + $0x61] sm:$0xff] %vm1042_vm1, %v1016_v52  ;;  %v4789_v50 = vmul.f32 %v4623_v8, %v4720_v57  ;;  %v2441_v4 = vsel %vm1323_vm3, %v2438_v49, %v2440_v27  ;;  %v955_v37 = vmin.f32 %v923_v1, 6.0  ;;  %v4797_v27 = vld [vmem:[#allocation2 + $0x48] sm:$0xff] }
 0x1ae   : > { %v954_v44 = vmin.f32 %v922_v31, 6.0  ;;  %v1888_v5 = vsel %vm1323_vm3, %v1886_v61, %v1887_v62  ;;  %v2681_v43 = vrot.slane %v2585_v51, 2  ;;  %v2682_v20 = vrot.slane %v2586_v54, 2  ;;  %v4799_v31 = vld [vmem:[#allocation2 + $0x50] sm:$0xff] }
 0x1af   : > { %v987_v16 = vmul.f32 %v955_v37, %v859_v58  ;;  %v957_v52 = vmin.f32 %v925_v13, 6.0  ;;  %v2131_v49 = vrot.slane %v4789_v50, 2  ;;  %v1752_v54 = vadd.f32 %v1720_v22, %v4709_v47  ;;  %v4823_v13 = vld [vmem:[%s7016_s5] ss:$0 sm:$0xff] }
 0x1b0   : > { %v2344_v1 = vmul.f32 %v4645_v45, %v4797_v27  ;;  %v2133_v47 = vrot.slane %v4731_v6, 2  ;;  %v1196_v22 = vmul.f32 %v4594_v39, %v4720_v57  ;;  %v1579_v6 = vrot.slane %v4776_v18, 2 }
 0x1b1   : > { %v989_v51 = vmul.f32 %v957_v52, %v4734_v9 }
 0x1b2   : > { %v4647_v46 = vpop.f32.mrb[14].mxu0  ;;  %v2442_v18 = vrot.slane %v2344_v1, 1 }
 0x1b3   : > { %v4656_v15 = vpop.f32.mrb[15].mxu0  ;;  %v1021_v9 = vmul.f32 0.16666667, %v989_v51 }
 0x1b5   : > { %1110 = vst.msk [vmem:[#allocation2 + $0x99] sm:$0xff] %vm1042_vm1, %v1021_v9 }
 0x1b6   : > { %v4675_v3 = vpop.f32.mrb[16].mxu0 }
 0x1b7   : > { %v4681_v11 = vpop.f32.mrb[17].mxu0 }
 0x1b8   : > { %7134 = vst [vmem:[#allocation12_spill] sm:$0xff] %v4681_v11  ;;  %v2550_v11 = vadd.f32 %v2441_v4, %v2306_v24 }
 0x1ba   : > { %v4694_v32 = vpop.f32.mrb[18].mxu0 }
 0x1bb   : > { %7135 = vst [vmem:[#allocation13_spill] sm:$0xff] %v4694_v32  ;;  %v4698_v38 = vpop.f32.mrb[19].mxu0  ;;  %v2130_v32 = vrot.slane %v2032_v10, 2  ;;  %v4830_v10 = vld [vmem:[#allocation2 + $0x58] sm:$0x3] }
 0x1bc   : > { %7136 = vst [vmem:[#allocation14_spill] sm:$0xff] %v4698_v38  ;;  %v1335_v38 = vrot.slane %v1234_v59, 1  ;;  %v4810_v59 = vmul.f32 %v4645_v45, %v4799_v31 }
 0x1be   : > { %v4740_v21 = vpop.f32.mrb[20].mxu0  ;;  %v2443_v4 = vrot.slane %v4810_v59, 1 }
 0x1bf   : > { %7137 = vst [vmem:[#allocation15_spill] sm:$0xff] %v4740_v21  ;;  %v4748_v26 = vpop.f32.mrb[21].mxu0  ;;  %v1334_v21 = vrot.slane %v4754_v28, 1  ;;  %v2685_v28 = vsel %vm1568_vm4, %v2682_v20, %v2684_v33  ;;  %v7141_v33 = vrot.slane %v4716_v55, 1  ;;  %v2132_v55 = vsel %vm1568_vm4, %v2130_v32, %v2131_v49 }
 0x1c0   : > { %7138 = vst [vmem:[#allocation16_spill] sm:$0xff] %v4748_v26  ;;  %v986_v26 = vmul.f32 %v954_v44, %v858_v34  ;;  %v2683_v34 = vsel %vm1568_vm4, %v2681_v43, %v2682_v20  ;;  %v2588_v20 = vmul.f32 %v4705_v19, %v4797_v27 }
 0x1c2   : > { %v4766_v7 = vpop.f32.mrb[22].mxu0 }
 0x1c3   : > { %7139 = vst [vmem:[#allocation17_spill] sm:$0xff] %v4766_v7  ;;  %v4778_v17 = vpop.f32.mrb[23].mxu0  ;;  %v2549_v7 = vadd.f32 %v2439_v25, %v2305_v12  ;;  %v2794_v12 = vadd.f32 %v2685_v28, %v2550_v11  ;;  %v1336_v11 = vsel %vm1323_vm3, %v1334_v21, %v1335_v38  ;;  %v4846_v21 = vld [vmem:[%s7017_s6] ss:$0 sm:$0xff] }
 0x1c4   : > { %7140 = vst [vmem:[#allocation18_spill] sm:$0xff] %v4778_v17  ;;  %v1751_v17 = vadd.f32 %v1719_v29, %v4700_v41  ;;  %v1019_v41 = vmul.f32 0.16666667, %v987_v16  ;;  %v1018_v29 = vmul.f32 0.16666667, %v986_v26  ;;  %v1479_v26 = vmul.f32 %v4581_v30, %v4720_v57 }
 0x1c5   : > { %v2793_v61 = vadd.f32 %v2683_v34, %v2549_v7  ;;  %v1890_v7 = vsel %vm1323_vm3, %v1887_v62, %v7141_v33  ;;  %v7142_v62 = vrot.slane %v4688_v53, 1  ;;  %v2833_v32 = vmul.f32 %v4823_v13, %v2794_v12 }
 0x1c6   : > { %v4792_v60 = vpop.f32.mrb[24].mxu0  ;;  %v1995_v58 = vadd.f32 %v1888_v5, %v1751_v17  ;;  %1108 = vst.msk [vmem:[#allocation2 + $0x81] sm:$0xff] %vm1042_vm1, %v1019_v41  ;;  %1107 = vst.msk [vmem:[#allocation2 + $0x79] sm:$0xff] %vm1042_vm1, %v1018_v29  ;;  %v1195_v17 = vmul.f32 %v4594_v39, %v4718_v56  ;;  %v2275_v56 = vmul.f32 %v4654_v14, %v4797_v27  ;;  %v1580_v37 = vrot.slane %v1479_v26, 2 }
 0x1c7   : > { %v1338_v24 = vsel %vm1323_vm3, %v1335_v38, %v7142_v62  ;;  %v1996_v50 = vadd.f32 %v1890_v7, %v1752_v54  ;;  %v2832_v57 = vmul.f32 %v4823_v13, %v2793_v61  ;;  %v2346_v53 = vmul.f32 %v4645_v45, %v4830_v10  ;;  %v4852_v44 = vpop.f32.mrb[25].mxu0 }
 0x1c8   : > { %v2239_v25 = vadd.f32 %v2132_v55, %v1995_v58  ;;  %v821_v38 = vmul.f32 %v4537_v40, %v4589_v36  ;;  %v1582_v5 = vrot.slane %v4712_v48, 2  ;;  %v1440_v43 = vadd.f32 %v1336_v11, %v1195_v17 }
 0x1c9   : > { %v2589_v16 = vmul.f32 %v4705_v19, %v4799_v31  ;;  %v1441_v52 = vadd.f32 %v1338_v24, %v1196_v22  ;;  %v2134_v41 = vsel %vm1568_vm4, %v2131_v49, %v2133_v47  ;;  %v4861_v51 = vadd.f32 %v4846_v21, %v2832_v57 }
 0x1ca   : > { %v2307_v29 = vadd.f32 %v2275_v56, %v2239_v25  ;;  %v2240_v54 = vadd.f32 %v2134_v41, %v1996_v50  ;;  %v2276_v36 = vmul.f32 %v4654_v14, %v4799_v31  ;;  %v2444_v48 = vsel %vm1323_vm3, %v2442_v18, %v2443_v4  ;;  %v4866_v58 = vpop.f32.mrb[26].mxu0 }
 0x1cb   : > { %7143 = vst [vmem:[#allocation19_spill] sm:$0xff] %v4861_v51  ;;  %v4869_v34 = vadd.f32 %v4846_v21, %v2833_v32  ;;  %v2445_v28 = vrot.slane %v2346_v53, 1  ;;  %v1581_v61 = vsel %vm1568_vm4, %v1579_v6, %v1580_v37  ;;  %v4873_v49 = vadd.f32 %v4542_v42, %v821_v38  ;;  %v4875_v1 = vpop.f32.mrb[27].mxu0 }
 0x1cc   : > { %v1583_v59 = vsel %vm1568_vm4, %v1580_v37, %v1582_v5  ;;  %v1685_v9 = vadd.f32 %v1581_v61, %v1440_v43  ;;  %v2686_v47 = vrot.slane %v2588_v20, 2  ;;  %v2687_v26 = vrot.slane %v2589_v16, 2 }
 0x1cd   : > { %7144 = vst [vmem:[#allocation20_spill] sm:$0xff] %v4869_v34  ;;  %v2590_v33 = vmul.f32 %v4705_v19, %v4830_v10  ;;  %v1686_v7 = vadd.f32 %v1583_v59, %v1441_v52  ;;  %v2551_v12 = vadd.f32 %v2444_v48, %v2307_v29  ;;  %v824_v17 = vmul.f32 %v4608_v63, %v4537_v40 }
 0x1ce   : > { %v2903_v22 = vsel %vm1042_vm1, %v4861_v51, 0.0  ;;  %v1236_v6 = vmul.f32 %v4575_v23, %v4797_v27  ;;  %v1237_v55 = vmul.f32 %v4575_v23, %v4799_v31  ;;  %v2308_v11 = vadd.f32 %v2276_v36, %v2240_v54  ;;  %v4888_v62 = vpop.f32.mrb[28].mxu0 }
 0x1cf   : > { %7145 = vst [vmem:[#allocation21_spill] sm:$0xff] %v4888_v62  ;;  %v2904_v24 = vsel %vm1042_vm1, %v4869_v34, 0.0  ;;  %v1238_v25 = vmul.f32 %v4575_v23, %v4830_v10  ;;  %v2446_v63 = vsel %vm1323_vm3, %v2443_v4, %v2445_v28  ;;  %v892_v56 = vadd.f32 3.0, %v4873_v49  ;;  %v4896_v50 = vpop.f32.mrb[29].mxu0 }
 0x1d0   : > { %7146 = vst [vmem:[#allocation22_spill] sm:$0xff] %v4896_v50  ;;  %v1791_v57 = vmul.f32 %v4611_v0, %v4797_v27  ;;  %v1792_v18 = vmul.f32 %v4611_v0, %v4799_v31  ;;  %v2688_v37 = vsel %vm1568_vm4, %v2686_v47, %v2687_v26  ;;  %v823_v32 = vmul.f32 %v4537_v40, %v4614_v2 }
 0x1d1   : > { %v1793_v53 = vmul.f32 %v4611_v0, %v4830_v10  ;;  %v2689_v38 = vrot.slane %v2590_v33, 2  ;;  %v2795_v4 = vadd.f32 %v2688_v37, %v2551_v12  ;;  %v4908_v5 = vadd.f32 %v4542_v42, %v824_v17 }
 0x1d2   : > { %v1483_v43 = vmul.f32 %v4581_v30, %v4830_v10  ;;  %v1339_v20 = vrot.slane %v1236_v6, 1  ;;  %v1340_v16 = vrot.slane %v1237_v55, 1  ;;  %v2552_v52 = vadd.f32 %v2446_v63, %v2308_v11  ;;  %v4918_v36 = vpop.f32.mrb[30].mxu0 }
 0x1d3   : > { %v1342_v41 = vrot.slane %v1238_v25, 1  ;;  %v2037_v29 = vmul.f32 %v4623_v8, %v4830_v10  ;;  %v1481_v2 = vmul.f32 %v4581_v30, %v4797_v27  ;;  %v1721_v54 = vmul.f32 %v4631_v35, %v4797_v27  ;;  %7147 = vst [vmem:[#allocation23_spill] sm:$0xff] %v4918_v36  ;;  %v4924_v47 = vpop.f32.mrb[31].mxu0 }
 0x1d4   : > { %v1482_v48 = vmul.f32 %v4581_v30, %v4799_v31  ;;  %v1722_v28 = vmul.f32 %v4631_v35, %v4799_v31  ;;  %v1891_v61 = vrot.slane %v1791_v57, 1  ;;  %v1892_v59 = vrot.slane %v1792_v18, 1  ;;  %7148 = vst [vmem:[#allocation24_spill] sm:$0xff] %v4924_v47 }
 0x1d5   : > { %v1894_v33 = vrot.slane %v1793_v53, 1  ;;  %v1197_v10 = vmul.f32 %v4594_v39, %v4797_v27  ;;  %v2690_v12 = vsel %vm1568_vm4, %v2687_v26, %v2689_v38  ;;  %v2834_v17 = vmul.f32 %v4823_v13, %v2795_v4 }
 0x1d6   : > { %v1341_v6 = vsel %vm1323_vm3, %v1339_v20, %v1340_v16  ;;  %v2035_v55 = vmul.f32 %v4623_v8, %v4797_v27  ;;  %v2036_v11 = vmul.f32 %v4623_v8, %v4799_v31  ;;  %v2796_v25 = vadd.f32 %v2690_v12, %v2552_v52 }
 0x1d7   : > { %v1587_v63 = vrot.slane %v1483_v43, 2  ;;  %v1198_v57 = vmul.f32 %v4594_v39, %v4799_v31  ;;  %v1343_v18 = vsel %vm1323_vm3, %v1340_v16, %v1342_v41  ;;  %v1753_v37 = vadd.f32 %v1721_v54, %v1685_v9 }
 0x1d8   : > { %v1584_v53 = vrot.slane %v1481_v2, 2  ;;  %v1585_v26 = vrot.slane %v1482_v48, 2  ;;  %v1754_v38 = vadd.f32 %v1722_v28, %v1686_v7  ;;  %v1893_v4 = vsel %vm1323_vm3, %v1891_v61, %v1892_v59  ;;  %v1145_v2 = vld [vmem:[#allocation2 + $0x70] sm:$0x3] }
 0x1d9   : > { %v1442_v20 = vadd.f32 %v1341_v6, %v1197_v10  ;;  %v1895_v34 = vsel %vm1323_vm3, %v1892_v59, %v1894_v33  ;;  %v4941_v27 = vadd.f32 %v4846_v21, %v2834_v17  ;;  %v924_v51 = vmax.f32 %v892_v56, 0.0  ;;  %v4964_v10 = vld [vmem:[#allocation2 + $0x60] sm:$0xff]  ;;  %v4966_v17 = vld [vmem:[#allocation2 + $0x68] sm:$0xff] }
 0x1da   : > { %v1443_v52 = vadd.f32 %v1343_v18, %v1198_v57  ;;  %v2135_v43 = vrot.slane %v2035_v55, 2  ;;  %v2136_v12 = vrot.slane %v2036_v11, 2  ;;  %v2835_v31 = vmul.f32 %v4823_v13, %v2796_v25 }
 0x1db   : > { %7149 = vst [vmem:[#allocation25_spill] sm:$0xff] %v4941_v27  ;;  %v2905_v47 = vadd.f32 %v2904_v24, %v2903_v22  ;;  %v2138_v16 = vrot.slane %v2037_v29, 2  ;;  %v1997_v9 = vadd.f32 %v1893_v4, %v1753_v37  ;;  %v1998_v41 = vadd.f32 %v1895_v34, %v1754_v38 }
 0x1dc   : > { %v1586_v7 = vsel %vm1568_vm4, %v1584_v53, %v1585_v26  ;;  %v4946_v54 = vadd.f32 3.0, %v4908_v5  ;;  %v826_v48 = vmul.f32 %v4647_v46, %v4537_v40  ;;  %v2906_v56 = vsel %vm1042_vm1, %v4941_v27, 0.0 }
 0x1dd   : > { %v1588_v28 = vsel %vm1568_vm4, %v1585_v26, %v1587_v63  ;;  %v956_v61 = vmin.f32 %v924_v51, 6.0  ;;  %v4954_v22 = vadd.f32 %v4542_v42, %v823_v32  ;;  %v4957_v34 = vadd.f32 %v4846_v21, %v2835_v31 }
 0x1de   : > { %v1687_v24 = vadd.f32 %v1586_v7, %v1442_v20  ;;  %v1688_v29 = vadd.f32 %v1588_v28, %v1443_v52  ;;  %v2137_v59 = vsel %vm1568_vm4, %v2135_v43, %v2136_v12  ;;  %v1241_v33 = vmul.f32 %v4575_v23, %v1145_v2 }
 0x1df   : > { %7150 = vst [vmem:[#allocation26_spill] sm:$0xff] %v4957_v34  ;;  %v4962_v46 = vmul.f32 %v4581_v30, %v1145_v2  ;;  %v2139_v51 = vsel %vm1568_vm4, %v2136_v12, %v2138_v16  ;;  %v2241_v32 = vadd.f32 %v2137_v59, %v1997_v9  ;;  %v2907_v6 = vadd.f32 %v2906_v56, %v2905_v47 }
 0x1e0   : > { %v1796_v55 = vmul.f32 %v4611_v0, %v1145_v2  ;;  %v2242_v11 = vadd.f32 %v2139_v51, %v1998_v41  ;;  %v927_v25 = vmax.f32 %v4946_v54, 0.0  ;;  %v988_v63 = vmul.f32 %v956_v61, %v4873_v49 }
 0x1e1   : > { %v894_v57 = vadd.f32 3.0, %v4954_v22  ;;  %v4974_v18 = vadd.f32 %v4542_v42, %v826_v48  ;;  %v4978_v37 = vmul.f32 %v4537_v40, %v4656_v15  ;;  %v2908_v53 = vsel %vm1042_vm1, %v4957_v34, 0.0 }
 0x1e2   : > { %v4983_v47 = vmul.f32 %v4623_v8, %v1145_v2  ;;  %v1239_v26 = vmul.f32 %v4575_v23, %v4964_v10  ;;  %v1240_v49 = vmul.f32 %v4575_v23, %v4966_v17  ;;  %v1347_v38 = vrot.slane %v1241_v33, 1 }
 0x1e3   : > { %v2349_v4 = vmul.f32 %v4645_v45, %v1145_v2  ;;  %v4992_v40 = vmul.f32 %v4705_v19, %v1145_v2  ;;  %v4994_v15 = vadd.f32 %v2908_v53, %v2907_v6  ;;  %v1899_v20 = vrot.slane %v1796_v55, 1 }
 0x1e4   : > { %v1199_v52 = vmul.f32 %v4594_v39, %v4964_v10  ;;  %v5000_v43 = vmul.f32 %v4581_v30, %v4964_v10  ;;  %v5004_v12 = vmul.f32 %v4581_v30, %v4966_v17  ;;  %v1723_v31 = vmul.f32 %v4631_v35, %v4964_v10 }
 0x1e5   : > { %7151 = vst [vmem:[#allocation27_spill] sm:$0xff] %v4994_v15  ;;  %v2347_v16 = vmul.f32 %v4645_v45, %v4964_v10  ;;  %v2348_v9 = vmul.f32 %v4645_v45, %v4966_v17  ;;  %v1344_v41 = vrot.slane %v1239_v26, 1  ;;  %v1345_v2 = vrot.slane %v1240_v49, 1 }
 0x1e6   : > { %v1794_v7 = vmul.f32 %v4611_v0, %v4964_v10  ;;  %v1795_v54 = vmul.f32 %v4611_v0, %v4966_v17  ;;  %v2450_v56 = vrot.slane %v2349_v4, 1  ;;  %v2694_v28 = vrot.slane %v4992_v40, 2 }
 0x1e7   : > { %v1200_v61 = vmul.f32 %v4594_v39, %v4966_v17  ;;  %v1724_v33 = vmul.f32 %v4631_v35, %v4966_v17  ;;  %v2277_v51 = vmul.f32 %v4654_v14, %v4964_v10  ;;  %v2278_v6 = vmul.f32 %v4654_v14, %v4966_v17 }
 0x1e8   : > { %v2447_v53 = vrot.slane %v2347_v16, 1  ;;  %v2448_v26 = vrot.slane %v2348_v9, 1  ;;  %v1020_v49 = vmul.f32 0.16666667, %v988_v63  ;;  %v1346_v4 = vsel %vm1323_vm3, %v1344_v41, %v1345_v2 }
 0x1e9   : > { %v1755_v40 = vadd.f32 %v1723_v31, %v1687_v24  ;;  %v1896_v48 = vrot.slane %v1794_v7, 1  ;;  %v1897_v42 = vrot.slane %v1795_v54, 1  ;;  %v1348_v59 = vsel %vm1323_vm3, %v1345_v2, %v1347_v38  ;;  %v1148_v54 = vld [vmem:[#allocation2 + $0x88] sm:$0x3] }
 0x1ea   : > { %v2591_v34 = vmul.f32 %v4705_v19, %v4964_v10  ;;  %v2592_v27 = vmul.f32 %v4705_v19, %v4966_v17  ;;  %1109 = vst.msk [vmem:[#allocation2 + $0x91] sm:$0xff] %vm1042_vm1, %v1020_v49  ;;  %v959_v15 = vmin.f32 %v927_v25, 6.0  ;;  %v1756_v55 = vadd.f32 %v1724_v33, %v1688_v29  ;;  %v5042_v25 = vld [vmem:[#allocation2 + $0x78] sm:$0xff] }
 0x1eb   : > { %v2309_v16 = vadd.f32 %v2277_v51, %v2241_v32  ;;  %v2310_v9 = vadd.f32 %v2278_v6, %v2242_v11  ;;  %v926_v63 = vmax.f32 %v894_v57, 0.0  ;;  %v1444_v36 = vadd.f32 %v1346_v4, %v1199_v52  ;;  %v5044_v57 = vld [vmem:[#allocation2 + $0x80] sm:$0xff] }
 0x1ec   : > { %v2449_v24 = vsel %vm1323_vm3, %v2447_v53, %v2448_v26  ;;  %v2451_v31 = vsel %vm1323_vm3, %v2448_v26, %v2450_v56  ;;  %v991_v38 = vmul.f32 %v959_v15, %v4908_v5  ;;  %v1445_v41 = vadd.f32 %v1348_v59, %v1200_v61 }
 0x1ed   : > { %v1898_v2 = vsel %vm1323_vm3, %v1896_v48, %v1897_v42  ;;  %v1900_v7 = vsel %vm1323_vm3, %v1897_v42, %v1899_v20  ;;  %v958_v50 = vmin.f32 %v926_v63, 6.0  ;;  %v2038_v29 = vmul.f32 %v4623_v8, %v4964_v10 }
 0x1ee   : > { %v2691_v32 = vrot.slane %v2591_v34, 2  ;;  %v2692_v11 = vrot.slane %v2592_v27, 2  ;;  %v1023_v52 = vmul.f32 0.16666667, %v991_v38  ;;  %v2039_v5 = vmul.f32 %v4623_v8, %v4966_v17 }
 0x1ef   : > { %v2553_v15 = vadd.f32 %v2449_v24, %v2309_v16  ;;  %v2554_v56 = vadd.f32 %v2451_v31, %v2310_v9  ;;  %v990_v48 = vmul.f32 %v958_v50, %v4954_v22  ;;  %v1999_v42 = vadd.f32 %v1898_v2, %v1755_v40 }
 0x1f0   : > { %v2000_v20 = vadd.f32 %v1900_v7, %v1756_v55  ;;  %v1244_v61 = vmul.f32 %v4575_v23, %v1148_v54  ;;  %v5051_v10 = vmul.f32 %v4581_v30, %v1148_v54  ;;  %1112 = vst.msk [vmem:[#allocation2 + $0xb1] sm:$0xff] %vm1042_vm1, %v1023_v52  ;;  %v5055_v27 = vmul.f32 %v4611_v0, %v1148_v54 }
 0x1f1   : > { %v1242_v34 = vmul.f32 %v4575_v23, %v5042_v25  ;;  %v1243_v17 = vmul.f32 %v4575_v23, %v5044_v57  ;;  %v1022_v59 = vmul.f32 0.16666667, %v990_v48  ;;  %v2693_v50 = vsel %vm1568_vm4, %v2691_v32, %v2692_v11 }
 0x1f2   : > { %v2695_v22 = vsel %vm1568_vm4, %v2692_v11, %v2694_v28  ;;  %v5064_v33 = vmul.f32 %v4623_v8, %v1148_v54  ;;  %v5067_v51 = vmul.f32 %v4645_v45, %v1148_v54  ;;  %v2140_v6 = vrot.slane %v2038_v29, 2 }
 0x1f3   : > { %v2797_v55 = vadd.f32 %v2693_v50, %v2553_v15  ;;  %v2798_v53 = vadd.f32 %v2695_v22, %v2554_v56  ;;  %v5070_v26 = vmul.f32 %v4705_v19, %v1148_v54  ;;  %1111 = vst.msk [vmem:[#allocation2 + $0xa9] sm:$0xff] %vm1042_vm1, %v1022_v59  ;;  %v2141_v49 = vrot.slane %v2039_v5, 2 }
 0x1f4   : > { %v1352_v4 = vrot.slane %v1244_v61, 1  ;;  %v5076_v28 = vmul.f32 %v4581_v30, %v5042_v25  ;;  %v1904_v16 = vrot.slane %v5055_v27, 1  ;;  %v1349_v9 = vrot.slane %v1242_v34, 1 }
 0x1f5   : > { %v1350_v63 = vrot.slane %v1243_v17, 1  ;;  %v5081_v24 = vmul.f32 %v4581_v30, %v5044_v57  ;;  %v2455_v38 = vrot.slane %v5067_v51, 1  ;;  %v1201_v2 = vmul.f32 %v4594_v39, %v5042_v25 }
 0x1f6   : > { %v1202_v7 = vmul.f32 %v4594_v39, %v5044_v57  ;;  %v2836_v54 = vmul.f32 %v4823_v13, %v2797_v55  ;;  %v2837_v29 = vmul.f32 %v4823_v13, %v2798_v53  ;;  %v2699_v32 = vrot.slane %v5070_v26, 2 }
 0x1f7   : > { %v7152_v11 = vrot.slane %v5004_v12, 2  ;;  %v7153_v52 = vrot.slane %v5000_v43, 2  ;;  %v7154_v15 = vrot.slane %v4962_v46, 2  ;;  %v1594_v61 = vrot.slane %v5076_v28, 2 }
 0x1f8   : > { %v2350_v27 = vmul.f32 %v4645_v45, %v5042_v25  ;;  %v2351_v34 = vmul.f32 %v4645_v45, %v5044_v57  ;;  %v1351_v17 = vsel %vm1323_vm3, %v1349_v9, %v1350_v63  ;;  %v1595_v43 = vrot.slane %v5081_v24, 2 }
 0x1f9   : > { %v1591_v5 = vsel %vm1568_vm4, %v7153_v52, %v7152_v11  ;;  %v7155_v56 = vmov %v7152_v11  ;;  %v1797_v59 = vmul.f32 %v4611_v0, %v5042_v25  ;;  %v1798_v46 = vmul.f32 %v4611_v0, %v5044_v57 }
 0x1fa   : > { %v1593_v48 = vsel %vm1568_vm4, %v7155_v56, %v7154_v15  ;;  %v1689_v12 = vadd.f32 %v1591_v5, %v1444_v36  ;;  %v1725_v22 = vmul.f32 %v4631_v35, %v5042_v25  ;;  %v2142_v51 = vsel %vm1568_vm4, %v2140_v6, %v2141_v49 }
 0x1fb   : > { %v1690_v50 = vadd.f32 %v1593_v48, %v1445_v41  ;;  %v1726_v55 = vmul.f32 %v4631_v35, %v5044_v57  ;;  %v7156_v53 = vrot.slane %v4983_v47, 2  ;;  %v2243_v9 = vadd.f32 %v2142_v51, %v1999_v42 }
 0x1fc   : > { %v2279_v11 = vmul.f32 %v4654_v14, %v5042_v25  ;;  %v2280_v36 = vmul.f32 %v4654_v14, %v5044_v57  ;;  %v2452_v41 = vrot.slane %v2350_v27, 1  ;;  %v2453_v5 = vrot.slane %v2351_v34, 1 }
 0x1fd   : > { %v2144_v26 = vsel %vm1568_vm4, %v2141_v49, %v7156_v53  ;;  %v5126_v15 = vadd.f32 %v4846_v21, %v2836_v54  ;;  %v5129_v6 = vadd.f32 %v4846_v21, %v2837_v29  ;;  %v1901_v56 = vrot.slane %v1797_v59, 1 }
 0x1fe   : > { %v2244_v52 = vadd.f32 %v2144_v26, %v2000_v20  ;;  %v1902_v47 = vrot.slane %v1798_v46, 1  ;;  %v1353_v49 = vsel %vm1323_vm3, %v1350_v63, %v1352_v4  ;;  %v2594_v42 = vmul.f32 %v4705_v19, %v5042_v25 }
 0x1ff   : > { %7157 = vst [vmem:[#allocation28_spill] sm:$0xff] %v5126_v15  ;;  %7158 = vst [vmem:[#allocation29_spill] sm:$0xff] %v5129_v6  ;;  %v2595_v20 = vmul.f32 %v4705_v19, %v5044_v57  ;;  %v897_v48 = vadd.f32 3.0, %v4974_v18  ;;  %v1446_v27 = vadd.f32 %v1351_v17, %v1201_v2  ;;  %v2041_v54 = vmul.f32 %v4623_v8, %v5042_v25  ;;  %v1151_v17 = vld [vmem:[#allocation2 + $0xa0] sm:$0x3] }
 0x200   : > { %v5141_v29 = vmul.f32 %v4623_v8, %v5044_v57  ;;  %v2311_v34 = vadd.f32 %v2279_v11, %v2243_v9  ;;  %v1757_v59 = vadd.f32 %v1725_v22, %v1689_v12  ;;  %v1758_v46 = vadd.f32 %v1726_v55, %v1690_v50  ;;  %v5150_v57 = vld [vmem:[%s7014_s3] ss:$0 sm:$0xff] }
 0x201   : > { %v2312_v4 = vadd.f32 %v2280_v36, %v2244_v52  ;;  %v2454_v63 = vsel %vm1323_vm3, %v2452_v41, %v2453_v5  ;;  %v1447_v51 = vadd.f32 %v1353_v49, %v1202_v7  ;;  %v1903_v53 = vsel %vm1323_vm3, %v1901_v56, %v1902_v47 }
 0x202   : > { %v1905_v26 = vsel %vm1323_vm3, %v1902_v47, %v1904_v16  ;;  %v2456_v2 = vsel %vm1323_vm3, %v2453_v5, %v2455_v38  ;;  %v2696_v31 = vrot.slane %v2594_v42, 2  ;;  %v2697_v25 = vrot.slane %v2595_v20, 2  ;;  %v5179_v20 = vld [vmem:[%s7127_s2] ss:$0 sm:$0xff]  ;;  %s4198_s2 = scalar_lea.vmem %s4197_s1, 1024 }
 0x203   : > { %v929_v40 = vmax.f32 %v897_v48, 0.0  ;;  %v864_v12 = vadd.f32 %v5150_v57, %v4978_v37  ;;  %v5156_v7 = vsel %vm1042_vm1, %v5126_v15, 0.0  ;;  %v2145_v50 = vrot.slane %v2041_v54, 2  ;;  %v7160_v54 = vld [vmem:[#allocation12_spill] sm:$0xff]  ;;  %p4200_p1 = scmp.lt.s32.totalorder %s4198_s2, %s4192_s0 }
 0x204   : > { %7159 = vst [vmem:[#allocation30_spill] sm:$0xff] %v5156_v7  ;;  %v2146_v16 = vrot.slane %v5141_v29, 2  ;;  %v2555_v38 = vadd.f32 %v2454_v63, %v2311_v34  ;;  %v2001_v22 = vadd.f32 %v1903_v53, %v1757_v59  ;;  %v2002_v55 = vadd.f32 %v1905_v26, %v1758_v46  ;;  %v7161_v34 = vld [vmem:[#allocation13_spill] sm:$0xff]  ;;  %v7162_v46 = vld [vmem:[#allocation14_spill] sm:$0xff] }
 0x205   : > { %v2556_v9 = vadd.f32 %v2456_v2, %v2312_v4  ;;  %v5160_v11 = vmul.f32 %v4575_v23, %v1151_v17  ;;  %v5163_v52 = vmul.f32 %v4581_v30, %v1151_v17  ;;  %v5166_v36 = vmul.f32 %v4611_v0, %v1151_v17  ;;  %p4201_p2 = por %p4200_p1, %p4199_p0 }
 0x206   : > { %v5169_v37 = vmul.f32 %v4623_v8, %v1151_v17  ;;  %v5172_v41 = vmul.f32 %v4645_v45, %v1151_v17  ;;  %v2698_v5 = vsel %vm1568_vm4, %v2696_v31, %v2697_v25  ;;  %v2700_v56 = vsel %vm1568_vm4, %v2697_v25, %v2699_v32 }
 0x207   : > { %v961_v47 = vmin.f32 %v929_v40, 6.0  ;;  %v896_v49 = vadd.f32 3.0, %v864_v12  ;;  %v2799_v42 = vadd.f32 %v2698_v5, %v2555_v38  ;;  %v828_v48 = vmul.f32 %v5179_v20, %v4675_v3  ;;  %p4202_p3 = pnand %p4201_p2, %p4195_p13 }
 0x208   : > { %v827_v29 = vmul.f32 %v5179_v20, %v7160_v54  ;;  %v830_v59 = vmul.f32 %v5179_v20, %v7161_v34  ;;  %v2800_v31 = vadd.f32 %v2700_v56, %v2556_v9  ;;  %v5189_v40 = vmul.f32 %v4705_v19, %v1151_v17  ;;  %v5209_v56 = vld [vmem:[#allocation2 + $0x90] sm:$0xff]  ;;  %v5211_v54 = vld [vmem:[#allocation2 + $0x98] sm:$0xff] }
 0x209   : > { %v829_v4 = vmul.f32 %v5179_v20, %v7162_v46  ;;  %v1596_v2 = vsel %vm1568_vm4, %v1594_v61, %v1595_v43  ;;  %v7163_v17 = vrot.slane %v5051_v10, 2  ;;  %v993_v38 = vmul.f32 %v961_v47, %v4974_v18 }
 0x20a   : > { %v928_v9 = vmax.f32 %v896_v49, 0.0  ;;  %v2838_v5 = vmul.f32 %v4823_v13, %v2799_v42  ;;  %v867_v34 = vadd.f32 %v5150_v57, %v828_v48  ;;  %v866_v28 = vadd.f32 %v5150_v57, %v827_v29 }
 0x20b   : > { %v1598_v25 = vsel %vm1568_vm4, %v1595_v43, %v7163_v17  ;;  %v869_v61 = vadd.f32 %v5150_v57, %v830_v59  ;;  %v5217_v10 = vmul.f32 %v4823_v13, %v2800_v31  ;;  %v2147_v18 = vsel %vm1568_vm4, %v2145_v50, %v2146_v16 }
 0x20c   : > { %v5222_v43 = vadd.f32 %v5150_v57, %v829_v4  ;;  %v1691_v47 = vadd.f32 %v1596_v2, %v1446_v27  ;;  %v1692_v49 = vadd.f32 %v1598_v25, %v1447_v51  ;;  %v7165_v42 = vrot.slane %v5064_v33, 2 }
 0x20d   : > { %7164 = vst [vmem:[#allocation12_spill] sm:$0xff] %v5217_v10  ;;  %v2245_v46 = vadd.f32 %v2147_v18, %v2001_v22  ;;  %v1245_v29 = vmul.f32 %v4575_v23, %v5209_v56  ;;  %v1246_v59 = vmul.f32 %v4575_v23, %v5211_v54  ;;  %v1025_v31 = vmul.f32 0.16666667, %v993_v38  ;;  %v7167_v22 = vld [vmem:[#allocation15_spill] sm:$0xff] }
 0x20e   : > { %v2149_v48 = vsel %vm1568_vm4, %v2146_v16, %v7165_v42  ;;  %v960_v17 = vmin.f32 %v928_v9, 6.0  ;;  %v5232_v50 = vadd.f32 %v4846_v21, %v2838_v5  ;;  %v899_v4 = vadd.f32 3.0, %v867_v34 }
 0x20f   : > { %v898_v3 = vadd.f32 3.0, %v866_v28  ;;  %v901_v27 = vadd.f32 3.0, %v869_v61  ;;  %v2246_v51 = vadd.f32 %v2149_v48, %v2002_v55  ;;  %1114 = vst.msk [vmem:[#allocation2 + $0xc9] sm:$0xff] %vm1042_vm1, %v1025_v31  ;;  %v5236_v16 = vadd.f32 3.0, %v5222_v43 }
 0x210   : > { %7166 = vst [vmem:[#allocation13_spill] sm:$0xff] %v5232_v50  ;;  %v992_v33 = vmul.f32 %v960_v17, %v864_v12  ;;  %v5240_v2 = vmul.f32 %v5179_v20, %v7167_v22  ;;  %v1203_v25 = vmul.f32 %v4594_v39, %v5209_v56  ;;  %v1204_v21 = vmul.f32 %v4594_v39, %v5211_v54 }
 0x211   : > { %v5248_v38 = vmul.f32 %v4581_v30, %v5209_v56  ;;  %v5252_v12 = vmul.f32 %v4581_v30, %v5211_v54  ;;  %v1354_v55 = vrot.slane %v1245_v29, 1  ;;  %v1355_v9 = vrot.slane %v1246_v59, 1 }
 0x212   : > { %v2353_v5 = vmul.f32 %v4645_v45, %v5209_v56  ;;  %v1024_v18 = vmul.f32 0.16666667, %v992_v33  ;;  %v2354_v42 = vmul.f32 %v4645_v45, %v5211_v54  ;;  %v931_v48 = vmax.f32 %v899_v4, 0.0 }
 0x213   : > { %v930_v31 = vmax.f32 %v898_v3, 0.0  ;;  %v933_v17 = vmax.f32 %v901_v27, 0.0  ;;  %v1727_v22 = vmul.f32 %v4631_v35, %v5209_v56  ;;  %v1728_v63 = vmul.f32 %v4631_v35, %v5211_v54 }
 0x214   : > { %v1800_v29 = vmul.f32 %v4611_v0, %v5209_v56  ;;  %v1801_v59 = vmul.f32 %v4611_v0, %v5211_v54  ;;  %1113 = vst.msk [vmem:[#allocation2 + $0xc1] sm:$0xff] %vm1042_vm1, %v1024_v18  ;;  %v963_v24 = vmin.f32 %v931_v48, 6.0  ;;  %v1356_v27 = vsel %vm1323_vm3, %v1354_v55, %v1355_v9 }
 0x215   : > { %v962_v4 = vmin.f32 %v930_v31, 6.0  ;;  %v965_v3 = vmin.f32 %v933_v17, 6.0  ;;  %v2281_v53 = vmul.f32 %v4654_v14, %v5209_v56  ;;  %v2457_v32 = vrot.slane %v2353_v5, 1  ;;  %v1154_v17 = vld [vmem:[#allocation2 + $0xb8] sm:$0x3] }
 0x216   : > { %v2458_v15 = vrot.slane %v2354_v42, 1  ;;  %v995_v50 = vmul.f32 %v963_v24, %v867_v34  ;;  %v1759_v7 = vadd.f32 %v1727_v22, %v1691_v47  ;;  %v1906_v62 = vrot.slane %v1800_v29, 1 }
 0x217   : > { %v994_v6 = vmul.f32 %v962_v4, %v866_v28  ;;  %v997_v10 = vmul.f32 %v965_v3, %v869_v61  ;;  %v1907_v18 = vrot.slane %v1801_v59, 1  ;;  %v2282_v48 = vmul.f32 %v4654_v14, %v5211_v54 }
 0x218   : > { %v2597_v31 = vmul.f32 %v4705_v19, %v5209_v56  ;;  %v2598_v55 = vmul.f32 %v4705_v19, %v5211_v54  ;;  %v1027_v33 = vmul.f32 0.16666667, %v995_v50  ;;  %v7168_v5 = vrot.slane %v5160_v11, 1 }
 0x219   : > { %v1026_v26 = vmul.f32 0.16666667, %v994_v6  ;;  %v1448_v28 = vadd.f32 %v1356_v27, %v1203_v25  ;;  %v1760_v61 = vadd.f32 %v1728_v63, %v1692_v49  ;;  %v2313_v24 = vadd.f32 %v2281_v53, %v2245_v46  ;;  %v5295_v49 = vld [vmem:[#allocation2 + $0xa8] sm:$0xff] }
 0x21a   : > { %v1358_v34 = vsel %vm1323_vm3, %v1355_v9, %v7168_v5  ;;  %v2044_v47 = vmul.f32 %v4623_v8, %v5209_v56  ;;  %v5285_v42 = vmul.f32 %v4623_v8, %v5211_v54  ;;  %v2459_v22 = vsel %vm1323_vm3, %v2457_v32, %v2458_v15  ;;  %1116 = vst.msk [vmem:[#allocation2 + $0xe1] sm:$0xff] %vm1042_vm1, %v1027_v33  ;;  %v5297_v54 = vld [vmem:[#allocation2 + $0xb0] sm:$0xff] }
 0x21b   : > { %1115 = vst.msk [vmem:[#allocation2 + $0xd9] sm:$0xff] %vm1042_vm1, %v1026_v26  ;;  %v1029_v6 = vmul.f32 0.16666667, %v997_v10  ;;  %v1908_v11 = vsel %vm1323_vm3, %v1906_v62, %v1907_v18  ;;  %v7169_v50 = vrot.slane %v5166_v36, 1  ;;  %v2314_v53 = vadd.f32 %v2282_v48, %v2246_v51 }
 0x21c   : > { %v1250_v56 = vmul.f32 %v4575_v23, %v1154_v17  ;;  %v7170_v32 = vrot.slane %v5172_v41, 1  ;;  %v2701_v25 = vrot.slane %v2597_v31, 2  ;;  %v2702_v26 = vrot.slane %v2598_v55, 2 }
 0x21d   : > { %v1910_v63 = vsel %vm1323_vm3, %v1907_v18, %v7169_v50  ;;  %v5303_v10 = vmul.f32 %v4581_v30, %v1154_v17  ;;  %1118 = vst.msk [vmem:[#allocation2 + $0xf9] sm:$0xff] %vm1042_vm1, %v1029_v6  ;;  %v1449_v62 = vadd.f32 %v1358_v34, %v1204_v21  ;;  %v2557_v36 = vadd.f32 %v2459_v22, %v2313_v24 }
 0x21e   : > { %v2461_v46 = vsel %vm1323_vm3, %v2458_v15, %v7170_v32  ;;  %v5307_v51 = vmul.f32 %v4611_v0, %v1154_v17  ;;  %v5310_v9 = vmul.f32 %v4623_v8, %v1154_v17  ;;  %v2003_v29 = vadd.f32 %v1908_v11, %v1759_v7 }
 0x21f   : > { %v2004_v59 = vadd.f32 %v1910_v63, %v1760_v61  ;;  %v1248_v15 = vmul.f32 %v4575_v23, %v5295_v49  ;;  %v1249_v41 = vmul.f32 %v4575_v23, %v5297_v54  ;;  %v2150_v33 = vrot.slane %v2044_v47, 2 }
 0x220   : > { %v2558_v4 = vadd.f32 %v2461_v46, %v2314_v53  ;;  %v5317_v3 = vmul.f32 %v4645_v45, %v1154_v17  ;;  %v5320_v21 = vmul.f32 %v4705_v19, %v1154_v17  ;;  %v2151_v27 = vrot.slane %v5285_v42, 2 }
 0x221   : > { %v2703_v18 = vsel %vm1568_vm4, %v2701_v25, %v2702_v26  ;;  %v1362_v7 = vrot.slane %v1250_v56, 1  ;;  %v1607_v48 = vrot.slane %v5303_v10, 2  ;;  %v1914_v55 = vrot.slane %v5307_v51, 1 }
 0x222   : > { %v2801_v31 = vadd.f32 %v2703_v18, %v2557_v36  ;;  %v2158_v5 = vrot.slane %v5310_v9, 2  ;;  %v5329_v34 = vmul.f32 %v4581_v30, %v5295_v49  ;;  %v7171_v61 = vrot.slane %v5189_v40, 2 }
 0x223   : > { %v1205_v17 = vmul.f32 %v4594_v39, %v5295_v49  ;;  %v1359_v24 = vrot.slane %v1248_v15, 1  ;;  %v1360_v47 = vrot.slane %v1249_v41, 1  ;;  %v2465_v22 = vrot.slane %v5317_v3, 1 }
 0x224   : > { %v2705_v19 = vsel %vm1568_vm4, %v2702_v26, %v7171_v61  ;;  %v2709_v6 = vrot.slane %v5320_v21, 2  ;;  %v1206_v11 = vmul.f32 %v4594_v39, %v5297_v54  ;;  %v1494_v50 = vmul.f32 %v4581_v30, %v5297_v54 }
 0x225   : > { %v5336_v42 = vadd.f32 %v2705_v19, %v2558_v4  ;;  %v7173_v40 = vrot.slane %v5252_v12, 2  ;;  %v7174_v63 = vrot.slane %v5248_v38, 2  ;;  %v1803_v56 = vmul.f32 %v4611_v0, %v5295_v49 }
 0x226   : > { %v1804_v32 = vmul.f32 %v4611_v0, %v5297_v54  ;;  %v5354_v46 = vmul.f32 %v4823_v13, %v2801_v31  ;;  %v7176_v25 = vrot.slane %v5163_v52, 2  ;;  %v1604_v51 = vrot.slane %v5329_v34, 2 }
 0x227   : > { %7172 = vst [vmem:[#allocation14_spill] sm:$0xff] %v5336_v42  ;;  %v1601_v53 = vsel %vm1568_vm4, %v7174_v63, %v7173_v40  ;;  %v7177_v26 = vmov %v7173_v40  ;;  %v1361_v15 = vsel %vm1323_vm3, %v1359_v24, %v1360_v47  ;;  %v1363_v41 = vsel %vm1323_vm3, %v1360_v47, %v1362_v7  ;;  %v5383_v47 = vld [vmem:[%s7015_s4 + $0x8] ss:$0 sm:$0xff] }
 0x228   : > { %7175 = vst [vmem:[#allocation15_spill] sm:$0xff] %v5354_v46  ;;  %v1603_v36 = vsel %vm1568_vm4, %v7177_v26, %v7176_v25  ;;  %v1693_v38 = vadd.f32 %v1601_v53, %v1448_v28  ;;  %v2356_v4 = vmul.f32 %v4645_v45, %v5295_v49  ;;  %v2357_v13 = vmul.f32 %v4645_v45, %v5297_v54 }
 0x229   : > { %v1694_v3 = vadd.f32 %v1603_v36, %v1449_v62  ;;  %v1729_v52 = vmul.f32 %v4631_v35, %v5295_v49  ;;  %v1730_v12 = vmul.f32 %v4631_v35, %v5297_v54  ;;  %v2152_v18 = vsel %vm1568_vm4, %v2150_v33, %v2151_v27 }
 0x22a   : > { %v1911_v28 = vrot.slane %v1803_v56, 1  ;;  %v1912_v31 = vrot.slane %v1804_v32, 1  ;;  %v7178_v34 = vrot.slane %v5169_v37, 2  ;;  %v2247_v61 = vadd.f32 %v2152_v18, %v2003_v29 }
 0x22b   : > { %v2283_v24 = vmul.f32 %v4654_v14, %v5295_v49  ;;  %v2284_v62 = vmul.f32 %v4654_v14, %v5297_v54  ;;  %v2600_v33 = vmul.f32 %v5383_v47, %v5295_v49  ;;  %v1605_v40 = vrot.slane %v1494_v50, 2 }
 0x22c   : > { %v2154_v7 = vsel %vm1568_vm4, %v2151_v27, %v7178_v34  ;;  %v2462_v37 = vrot.slane %v2356_v4, 1  ;;  %v2463_v63 = vrot.slane %v2357_v13, 1  ;;  %v932_v29 = vmax.f32 %v5236_v16, 0.0 }
 0x22d   : > { %v2248_v19 = vadd.f32 %v2154_v7, %v2004_v59  ;;  %v1450_v59 = vadd.f32 %v1361_v15, %v1205_v17  ;;  %v1451_v27 = vadd.f32 %v1363_v41, %v1206_v11  ;;  %v1761_v53 = vadd.f32 %v1729_v52, %v1693_v38  ;;  %v7179_v15 = vld [vmem:[#allocation16_spill] sm:$0xff]  ;;  %v7180_v52 = vld [vmem:[#allocation17_spill] sm:$0xff] }
 0x22e   : > { %v2601_v56 = vmul.f32 %v5383_v47, %v5297_v54  ;;  %v1762_v32 = vadd.f32 %v1730_v12, %v1694_v3  ;;  %v1913_v25 = vsel %vm1323_vm3, %v1911_v28, %v1912_v31  ;;  %v2047_v26 = vmul.f32 %v4623_v8, %v5295_v49  ;;  %v7181_v12 = vld [vmem:[#allocation18_spill] sm:$0xff] }
 0x22f   : > { %v2048_v36 = vmul.f32 %v4623_v8, %v5297_v54  ;;  %v1915_v50 = vsel %vm1323_vm3, %v1912_v31, %v1914_v55  ;;  %v2315_v4 = vadd.f32 %v2283_v24, %v2247_v61  ;;  %v2316_v13 = vadd.f32 %v2284_v62, %v2248_v19 }
 0x230   : > { %v2706_v16 = vrot.slane %v2600_v33, 2  ;;  %v2464_v17 = vsel %vm1323_vm3, %v2462_v37, %v2463_v63  ;;  %v964_v11 = vmin.f32 %v932_v29, 6.0  ;;  %v871_v38 = vadd.f32 %v5150_v57, %v5240_v2  ;;  %v1157_v2 = vld [vmem:[#allocation2 + $0xd0] sm:$0x3] }
 0x231   : > { %v831_v41 = vmul.f32 %v5179_v20, %v7179_v15  ;;  %v2466_v3 = vsel %vm1323_vm3, %v2463_v63, %v2465_v22  ;;  %v2707_v49 = vrot.slane %v2601_v56, 2  ;;  %v834_v54 = vmul.f32 %v5179_v20, %v7180_v52 }
 0x232   : > { %v833_v55 = vmul.f32 %v5179_v20, %v7181_v12  ;;  %v2005_v18 = vadd.f32 %v1913_v25, %v1761_v53  ;;  %v2155_v28 = vrot.slane %v2047_v26, 2  ;;  %v2156_v31 = vrot.slane %v2048_v36, 2  ;;  %v5447_v25 = vld [vmem:[#allocation2 + $0xc8] sm:$0xff] }
 0x233   : > { %v1606_v34 = vsel %vm1568_vm4, %v1604_v51, %v1605_v40  ;;  %v2006_v7 = vadd.f32 %v1915_v50, %v1762_v32  ;;  %v2559_v61 = vadd.f32 %v2464_v17, %v2315_v4  ;;  %v1608_v19 = vsel %vm1568_vm4, %v1605_v40, %v1607_v48  ;;  %v5445_v32 = vld [vmem:[#allocation2 + $0xc0] sm:$0xff] }
 0x234   : > { %v5410_v22 = vadd.f32 %v1606_v34, %v1450_v59  ;;  %v5412_v24 = vadd.f32 %v2466_v3, %v2316_v13  ;;  %v996_v62 = vmul.f32 %v964_v11, %v5222_v43  ;;  %v903_v33 = vadd.f32 3.0, %v871_v38 }
 0x235   : > { %v870_v37 = vadd.f32 %v5150_v57, %v831_v41  ;;  %v2708_v63 = vsel %vm1568_vm4, %v2706_v16, %v2707_v49  ;;  %v5417_v29 = vadd.f32 %v1608_v19, %v1451_v27  ;;  %v873_v51 = vadd.f32 %v5150_v57, %v834_v54 }
 0x236   : > { %7182 = vst [vmem:[#allocation16_spill] sm:$0xff] %v5412_v24  ;;  %v872_v53 = vadd.f32 %v5150_v57, %v833_v55  ;;  %v5424_v10 = vsel %vm1568_vm4, %v2707_v49, %v2709_v6  ;;  %v5427_v48 = vmul.f32 %v4575_v23, %v1157_v2  ;;  %v2157_v43 = vsel %vm1568_vm4, %v2155_v28, %v2156_v31 }
 0x237   : > { %7183 = vst [vmem:[#allocation17_spill] sm:$0xff] %v5424_v10  ;;  %v2159_v40 = vsel %vm1568_vm4, %v2156_v31, %v2158_v5  ;;  %v5433_v59 = vadd.f32 %v2708_v63, %v2559_v61  ;;  %v5436_v27 = vmul.f32 %v4581_v30, %v1157_v2  ;;  %v5438_v56 = vadd.f32 %v2157_v43, %v2005_v18 }
 0x238   : > { %v5440_v21 = vadd.f32 %v2159_v40, %v2006_v7  ;;  %v5443_v6 = vmul.f32 %v4611_v0, %v1157_v2  ;;  %v1028_v26 = vmul.f32 0.16666667, %v996_v62  ;;  %v935_v9 = vmax.f32 %v903_v33, 0.0 }
 0x239   : > { %7184 = vst [vmem:[#allocation18_spill] sm:$0xff] %v5433_v59  ;;  %v902_v36 = vadd.f32 3.0, %v870_v37  ;;  %v5450_v5 = vmul.f32 %v4623_v8, %v1157_v2  ;;  %v5453_v50 = vmul.f32 %v4645_v45, %v1157_v2  ;;  %v905_v4 = vadd.f32 3.0, %v873_v51 }
 0x23a   : > { %v904_v13 = vadd.f32 3.0, %v872_v53  ;;  %v1367_v16 = vrot.slane %v5427_v48, 1  ;;  %v5457_v17 = vmul.f32 %v5383_v47, %v1157_v2  ;;  %1117 = vst.msk [vmem:[#allocation2 + $0xf1] sm:$0xff] %vm1042_vm1, %v1028_v26  ;;  %v967_v11 = vmin.f32 %v935_v9, 6.0 }
 0x23b   : > { %7185 = vst [vmem:[#allocation31_spill] sm:$0xff] %v5450_v5  ;;  %7186 = vst [vmem:[#allocation32_spill] sm:$0xff] %v5453_v50  ;;  %v934_v15 = vmax.f32 %v902_v36, 0.0  ;;  %v1251_v41 = vmul.f32 %v4575_v23, %v5445_v32  ;;  %v1252_v3 = vmul.f32 %v4575_v23, %v5447_v25  ;;  %v937_v49 = vmax.f32 %v905_v4, 0.0 }
 0x23c   : > { %7187 = vst [vmem:[#allocation33_spill] sm:$0xff] %v5457_v17  ;;  %v936_v52 = vmax.f32 %v904_v13, 0.0  ;;  %v999_v12 = vmul.f32 %v967_v11, %v871_v38  ;;  %v836_v18 = vmul.f32 %v5179_v20, %v4792_v60  ;;  %v1919_v28 = vrot.slane %v5443_v6, 1 }
 0x23d   : > { %v966_v55 = vmin.f32 %v934_v15, 6.0  ;;  %v969_v34 = vmin.f32 %v937_v49, 6.0  ;;  %v1806_v61 = vmul.f32 %v4611_v0, %v5445_v32  ;;  %v1807_v2 = vmul.f32 %v4611_v0, %v5447_v25 }
 0x23e   : > { %v968_v7 = vmin.f32 %v936_v52, 6.0  ;;  %v1031_v19 = vmul.f32 0.16666667, %v999_v12  ;;  %v1364_v33 = vrot.slane %v1251_v41, 1  ;;  %v1365_v38 = vrot.slane %v1252_v3, 1 }
 0x23f   : > { %v998_v62 = vmul.f32 %v966_v55, %v870_v37  ;;  %v1001_v63 = vmul.f32 %v969_v34, %v873_v51  ;;  %v5475_v60 = vmul.f32 %v4581_v30, %v5445_v32  ;;  %v5479_v40 = vadd.f32 %v5150_v57, %v836_v18 }
 0x240   : > { %v1000_v48 = vmul.f32 %v968_v7, %v872_v53  ;;  %1120 = vst.msk [vmem:[#allocation2 + $0x111] sm:$0xff] %vm1042_vm1, %v1031_v19  ;;  %v835_v6 = vmul.f32 %v5179_v20, %v4852_v44  ;;  %v5485_v37 = vmul.f32 %v4581_v30, %v5447_v25  ;;  %v1731_v51 = vmul.f32 %v4631_v35, %v5445_v32 }
 0x241   : > { %v1030_v43 = vmul.f32 0.16666667, %v998_v62  ;;  %v1033_v53 = vmul.f32 0.16666667, %v1001_v63  ;;  %v1732_v36 = vmul.f32 %v4631_v35, %v5447_v25  ;;  %v1916_v4 = vrot.slane %v1806_v61, 1 }
 0x242   : > { %v1032_v26 = vmul.f32 0.16666667, %v1000_v48  ;;  %v1917_v13 = vrot.slane %v1807_v2, 1  ;;  %v1207_v11 = vmul.f32 %v4594_v39, %v5445_v32  ;;  %v1208_v15 = vmul.f32 %v4594_v39, %v5447_v25 }
 0x243   : > { %1119 = vst.msk [vmem:[#allocation2 + $0x109] sm:$0xff] %vm1042_vm1, %v1030_v43  ;;  %v1366_v41 = vsel %vm1323_vm3, %v1364_v33, %v1365_v38  ;;  %1122 = vst.msk [vmem:[#allocation2 + $0x129] sm:$0xff] %vm1042_vm1, %v1033_v53  ;;  %v1368_v3 = vsel %vm1323_vm3, %v1365_v38, %v1367_v16  ;;  %v907_v49 = vadd.f32 3.0, %v5479_v40  ;;  %v874_v52 = vadd.f32 %v5150_v57, %v835_v6  ;;  %v5532_v33 = vld [vmem:[#allocation2 + $0xe8] sm:$0x3] }
 0x244   : > { %1121 = vst.msk [vmem:[#allocation2 + $0x121] sm:$0xff] %vm1042_vm1, %v1032_v26  ;;  %v838_v12 = vmul.f32 %v5179_v20, %v4866_v58  ;;  %v1763_v34 = vadd.f32 %v1731_v51, %v5410_v22  ;;  %v837_v7 = vmul.f32 %v5179_v20, %v4875_v1  ;;  %v1764_v61 = vadd.f32 %v1732_v36, %v5417_v29 }
 0x245   : > { %v1918_v16 = vsel %vm1323_vm3, %v1916_v4, %v1917_v13  ;;  %v5515_v2 = vmul.f32 %v4623_v8, %v5445_v32  ;;  %v5519_v58 = vmul.f32 %v4623_v8, %v5447_v25  ;;  %v5521_v19 = vadd.f32 %v1366_v41, %v1207_v11 }
 0x246   : > { %v5523_v62 = vadd.f32 %v1368_v3, %v1208_v15  ;;  %v1920_v22 = vsel %vm1323_vm3, %v1917_v13, %v1919_v28  ;;  %v2359_v1 = vmul.f32 %v4645_v45, %v5445_v32  ;;  %v5530_v29 = vmul.f32 %v4645_v45, %v5447_v25 }
 0x247   : > { %7188 = vst [vmem:[#allocation34_spill] sm:$0xff] %v5519_v58  ;;  %v939_v38 = vmax.f32 %v907_v49, 0.0  ;;  %v906_v63 = vadd.f32 3.0, %v874_v52  ;;  %v877_v48 = vadd.f32 %v5150_v57, %v838_v12  ;;  %v5535_v43 = vadd.f32 %v1918_v16, %v1763_v34 }
 0x248   : > { %7189 = vst [vmem:[#allocation35_spill] sm:$0xff] %v5530_v29  ;;  %v2285_v6 = vmul.f32 %v4654_v14, %v5445_v32  ;;  %v2286_v28 = vmul.f32 %v4654_v14, %v5447_v25  ;;  %v876_v51 = vadd.f32 %v5150_v57, %v837_v7  ;;  %v5542_v53 = vadd.f32 %v1920_v22, %v1764_v61  ;;  %v7194_v61 = vld [vmem:[#allocation21_spill] sm:$0xff]  ;;  %v7198_v22 = vld [vmem:[#allocation23_spill] sm:$0xff] }
 0x249   : > { %v5548_v4 = vmul.f32 %v5383_v47, %v5445_v32  ;;  %v2467_v13 = vrot.slane %v2359_v1, 1  ;;  %v5552_v11 = vmul.f32 %v5383_v47, %v5447_v25  ;;  %v5556_v15 = vmul.f32 %v4575_v23, %v5532_v33 }
 0x24a   : > { %7190 = vst [vmem:[#allocation36_spill] sm:$0xff] %v5542_v53  ;;  %v5560_v41 = vmul.f32 %v4581_v30, %v5532_v33  ;;  %v7035_v3 = vrot.slane %v5530_v29, 1  ;;  %v971_v49 = vmin.f32 %v939_v38, 6.0  ;;  %v938_v12 = vmax.f32 %v906_v63, 0.0  ;;  %v5578_v63 = vld [vmem:[#allocation2 + $0xd8] sm:$0xff] }
 0x24b   : > { %7191 = vst [vmem:[#allocation37_spill] sm:$0xff] %v5548_v4  ;;  %7192 = vst [vmem:[#allocation38_spill] sm:$0xff] %v5552_v11  ;;  %v909_v34 = vadd.f32 3.0, %v877_v48  ;;  %v2317_v32 = vadd.f32 %v2285_v6, %v5438_v56  ;;  %v5565_v7 = vadd.f32 %v2286_v28, %v5440_v21  ;;  %v908_v25 = vadd.f32 3.0, %v876_v51  ;;  %v5580_v56 = vld [vmem:[#allocation2 + $0xe0] sm:$0xff]  ;;  %v7197_v21 = vld [vmem:[#allocation22_spill] sm:$0xff] }
 0x24c   : > { %v840_v16 = vmul.f32 %v5179_v20, %v7194_v61  ;;  %v5572_v1 = vmul.f32 %v4611_v0, %v5532_v33  ;;  %v5576_v38 = vmul.f32 %v4623_v8, %v5532_v33  ;;  %v839_v6 = vmul.f32 %v5179_v20, %v7197_v21 }
 0x24d   : > { %7193 = vst [vmem:[#allocation39_spill] sm:$0xff] %v5565_v7  ;;  %v842_v9 = vmul.f32 %v5179_v20, %v7198_v22  ;;  %v2469_v31 = vsel %vm1323_vm3, %v2467_v13, %v7035_v3  ;;  %v1003_v26 = vmul.f32 %v971_v49, %v5479_v40  ;;  %v970_v36 = vmin.f32 %v938_v12, 6.0  ;;  %v2974_v22 = vld [vmem:[%s7018_s7] sm:$0xff]  ;;  %v2975_v40 = vld [vmem:[%s7018_s7 + $0x8] sm:$0xff]  ;;  %v5831_v7 = vld [vmem:[#allocation2 + $0x110] sm:$0xff] }
 0x24e   : > { %7195 = vst [vmem:[#allocation21_spill] sm:$0xff] %v5572_v1  ;;  %7196 = vst [vmem:[#allocation40_spill] sm:$0xff] %v5576_v38  ;;  %v941_v54 = vmax.f32 %v909_v34, 0.0  ;;  %v5595_v21 = vmul.f32 %v4575_v23, %v5578_v63  ;;  %v5599_v28 = vmul.f32 %v4575_v23, %v5580_v56  ;;  %v940_v44 = vmax.f32 %v908_v25, 0.0  ;;  %v2976_v25 = vld [vmem:[%s7018_s7 + $0x10] sm:$0xff] }
 0x24f   : > { %v879_v61 = vadd.f32 %v5150_v57, %v840_v16  ;;  %v1035_v13 = vmul.f32 0.16666667, %v1003_v26  ;;  %v1002_v49 = vmul.f32 %v970_v36, %v874_v52  ;;  %v878_v34 = vadd.f32 %v5150_v57, %v839_v6  ;;  %v2977_v16 = vld [vmem:[%s7018_s7 + $0x18] sm:$0xff] }
 0x250   : > { %v973_v12 = vmin.f32 %v941_v54, 6.0  ;;  %v972_v3 = vmin.f32 %v940_v44, 6.0  ;;  %v881_v18 = vadd.f32 %v5150_v57, %v842_v9  ;;  %v4257_v54 = vmov 0.0|0.0   ;;  %v7199_v9 = vld [vmem:[#allocation24_spill] sm:$0xff] }
 0x251   : > { %v911_v55 = vadd.f32 3.0, %v879_v61  ;;  %1124 = vst.msk [vmem:[#allocation2 + $0x141] sm:$0xff] %vm1042_vm1, %v1035_v13  ;;  %v1034_v17 = vmul.f32 0.16666667, %v1002_v49  ;;  %v910_v52 = vadd.f32 3.0, %v878_v34  ;;  %4121 = vmatprep.subr.bf16.mxu0 %v4257_v54  ;;  %v4122_v36 = vpack.c.bf16 %v2975_v40, %v2974_v22 }
 0x252   : > { %v1005_v26 = vmul.f32 %v973_v12, %v877_v48  ;;  %v1004_v44 = vmul.f32 %v972_v3, %v876_v51  ;;  %v913_v46 = vadd.f32 3.0, %v881_v18  ;;  %v841_v59 = vmul.f32 %v5179_v20, %v7199_v9 }
 0x253   : > { %v943_v6 = vmax.f32 %v911_v55, 0.0  ;;  %1123 = vst.msk [vmem:[#allocation2 + $0x139] sm:$0xff] %vm1042_vm1, %v1034_v17  ;;  %v942_v10 = vmax.f32 %v910_v52, 0.0  ;;  %4123 = vmatpush3.bf16.msra.mxu0 %v4122_v36  ;;  %v4125_v24 = vpack.c.bf16 %v2977_v16, %v2976_v25  ;;  %v7200_v22 = vmov 0.0  }
 0x254   : > { %v1037_v42 = vmul.f32 0.16666667, %v1005_v26  ;;  %v1036_v4 = vmul.f32 0.16666667, %v1004_v44  ;;  %v945_v49 = vmax.f32 %v913_v46, 0.0  ;;  %v880_v48 = vadd.f32 %v5150_v57, %v841_v59  ;;  %4124 = vmatprep.subr.bf16.mxu0 %v4257_v54  ;;  %4053 = vmatprep.mubr.msk.f32.mxu0 %vm4258_vm5, %v7200_v22 }
 0x255   : > { %v975_v13 = vmin.f32 %v943_v6, 6.0  ;;  %v5626_v20 = vmul.f32 %v4645_v45, %v5532_v33  ;;  %v974_v17 = vmin.f32 %v942_v10, 6.0  ;;  %4058 = vmatprep.mubr.msk.f32.mxu1 %vm4258_vm5, %v7200_v22  ;;  %v5630_v46 = vadd.f32 %v2469_v31, %v2317_v32 }
 0x256   : > { %1126 = vst.msk [vmem:[#allocation2 + $0x159] sm:$0xff] %vm1042_vm1, %v1037_v42  ;;  %1125 = vst.msk [vmem:[#allocation2 + $0x151] sm:$0xff] %vm1042_vm1, %v1036_v4  ;;  %v977_v59 = vmin.f32 %v945_v49, 6.0  ;;  %v912_v3 = vadd.f32 3.0, %v880_v48  ;;  %v5635_v40 = vmul.f32 %v5383_v47, %v5532_v33  ;;  %v1369_v12 = vrot.slane %v5595_v21, 1 }
 0x257   : > { %7201 = vst [vmem:[#allocation22_spill] sm:$0xff] %v5626_v20  ;;  %7202 = vst [vmem:[#allocation23_spill] sm:$0xff] %v5630_v46  ;;  %v1007_v57 = vmul.f32 %v975_v13, %v879_v61  ;;  %v1370_v25 = vrot.slane %v5599_v28, 1  ;;  %v1006_v16 = vmul.f32 %v974_v17, %v878_v34  ;;  %4126 = vmatpush3.bf16.msra.mxu0 %v4125_v24  ;;  %v7204_v28 = vrot.slane %v5485_v37, 2  ;;  %v1166_v49 = vld [vmem:[#allocation2 + $0x118] sm:$0x3] }
 0x258   : > { %7203 = vst [vmem:[#allocation24_spill] sm:$0xff] %v5635_v40  ;;  %v5641_v42 = vmul.f32 %v4581_v30, %v5578_v63  ;;  %v1009_v31 = vmul.f32 %v977_v59, %v881_v18  ;;  %v944_v4 = vmax.f32 %v912_v3, 0.0  ;;  %v1209_v32 = vmul.f32 %v4594_v39, %v5578_v63  ;;  %v5896_v38 = vld [vmem:[#allocation2 + $0x148] sm:$0x3] }
 0x259   : > { %v1039_v10 = vmul.f32 0.16666667, %v1007_v57  ;;  %v1210_v33 = vmul.f32 %v4594_v39, %v5580_v56  ;;  %v5649_v61 = vmul.f32 %v4581_v30, %v5580_v56  ;;  %v7205_v24 = vrot.slane %v5475_v60, 2  ;;  %7247 = vst [vmem:[#allocation77_spill] sm:$0xff] %v5896_v38 }
 0x25a   : > { %v7206_v34 = vrot.slane %v5436_v27, 2  ;;  %v7207_v18 = vmov %v7204_v28  ;;  %v1038_v54 = vmul.f32 0.16666667, %v1006_v16  ;;  %v1041_v36 = vmul.f32 0.16666667, %v1009_v31 }
 0x25b   : > { %v1611_v21 = vsel %vm1568_vm4, %v7205_v24, %v7204_v28  ;;  %1128 = vst.msk [vmem:[#allocation2 + $0x171] sm:$0xff] %vm1042_vm1, %v1039_v10  ;;  %v1371_v44 = vsel %vm1323_vm3, %v1369_v12, %v1370_v25  ;;  %v7208_v6 = vrot.slane %v5556_v15, 1  ;;  %v976_v13 = vmin.f32 %v944_v4, 6.0 }
 0x25c   : > { %v1613_v26 = vsel %vm1568_vm4, %v7207_v18, %v7206_v34  ;;  %v1697_v52 = vadd.f32 %v1611_v21, %v5521_v19  ;;  %v1733_v19 = vmul.f32 %v4631_v35, %v5578_v63  ;;  %1127 = vst.msk [vmem:[#allocation2 + $0x169] sm:$0xff] %vm1042_vm1, %v1038_v54  ;;  %1130 = vst.msk [vmem:[#allocation2 + $0x189] sm:$0xff] %vm1042_vm1, %v1041_v36  ;;  %v7214_v31 = vrot.slane %v5519_v58, 2 }
 0x25d   : > { %v1373_v60 = vsel %vm1323_vm3, %v1370_v25, %v7208_v6  ;;  %v1698_v9 = vadd.f32 %v1613_v26, %v5523_v62  ;;  %v1734_v22 = vmul.f32 %v4631_v35, %v5580_v56  ;;  %v5680_v62 = vmul.f32 %v4611_v0, %v5578_v63  ;;  %v1163_v25 = vld [vmem:[#allocation2 + $0x100] sm:$0x3] }
 0x25e   : > { %v1008_v17 = vmul.f32 %v976_v13, %v880_v48  ;;  %v5682_v57 = vadd.f32 %v1371_v44, %v1209_v32  ;;  %v5684_v59 = vadd.f32 %v1373_v60, %v1210_v33  ;;  %v5686_v3 = vadd.f32 %v1733_v19, %v1697_v52 }
 0x25f   : > { %7209 = vst [vmem:[#allocation41_spill] sm:$0xff] %v5680_v62  ;;  %v5690_v12 = vmul.f32 %v4611_v0, %v5580_v56  ;;  %v5692_v16 = vadd.f32 %v1734_v22, %v1698_v9  ;;  %v5696_v10 = vmul.f32 %v4623_v8, %v5578_v63  ;;  %v7215_v48 = vrot.slane %v5515_v2, 2 }
 0x260   : > { %7210 = vst [vmem:[#allocation42_spill] sm:$0xff] %v5686_v3  ;;  %v1040_v32 = vmul.f32 0.16666667, %v1008_v17  ;;  %v5705_v33 = vmul.f32 %v4623_v8, %v5580_v56  ;;  %v2287_v24 = vmul.f32 %v4654_v14, %v5578_v63  ;;  %v5712_v21 = vmul.f32 %v4645_v45, %v5578_v63  ;;  %v1161_v17 = vld [vmem:[#allocation2 + $0xf0] sm:$0xff] }
 0x261   : > { %7211 = vst [vmem:[#allocation43_spill] sm:$0xff] %v5690_v12  ;;  %7212 = vst [vmem:[#allocation44_spill] sm:$0xff] %v5692_v16  ;;  %v2162_v4 = vsel %vm1568_vm4, %v7215_v48, %v7214_v31  ;;  %v5716_v34 = vmul.f32 %v4645_v45, %v5580_v56  ;;  %v5720_v2 = vmul.f32 %v5383_v47, %v5578_v63  ;;  %v5756_v31 = vld [vmem:[#allocation2 + $0xf8] sm:$0xff] }
 0x262   : > { %7213 = vst [vmem:[#allocation45_spill] sm:$0xff] %v5696_v10  ;;  %7216 = vst [vmem:[#allocation46_spill] sm:$0xff] %v5705_v33  ;;  %v2251_v28 = vadd.f32 %v2162_v4, %v5535_v43  ;;  %v5724_v18 = vmul.f32 %v5383_v47, %v5580_v56  ;;  %v5727_v43 = vmul.f32 %v4575_v23, %v1163_v25 }
 0x263   : > { %7217 = vst [vmem:[#allocation47_spill] sm:$0xff] %v5712_v21  ;;  %7218 = vst [vmem:[#allocation48_spill] sm:$0xff] %v5716_v34  ;;  %v5731_v26 = vmul.f32 %v4581_v30, %v1163_v25  ;;  %v5734_v52 = vmul.f32 %v4611_v0, %v1163_v25  ;;  %v5737_v54 = vmul.f32 %v4623_v8, %v1163_v25  ;;  %v5951_v3 = vld [vmem:[#allocation2 + $0x168] sm:$0xff] }
 0x264   : > { %7219 = vst [vmem:[#allocation49_spill] sm:$0xff] %v5720_v2  ;;  %7220 = vst [vmem:[#allocation50_spill] sm:$0xff] %v5724_v18  ;;  %v5740_v63 = vmul.f32 %v4645_v45, %v1163_v25  ;;  %v5747_v60 = vmul.f32 %v4654_v14, %v5580_v56  ;;  %v5750_v13 = vadd.f32 %v2287_v24, %v2251_v28  ;;  %v1169_v18 = vld [vmem:[#allocation2 + $0x130] sm:$0x3] }
 0x265   : > { %1129 = vst.msk [vmem:[#allocation2 + $0x181] sm:$0xff] %vm1042_vm1, %v1040_v32  ;;  %7221 = vst [vmem:[#allocation51_spill] sm:$0xff] %v5734_v52  ;;  %v5754_v22 = vmul.f32 %v5383_v47, %v1163_v25  ;;  %v5767_v27 = vmul.f32 %v4575_v23, %v1161_v17  ;;  %v5771_v19 = vmul.f32 %v4575_v23, %v5756_v31  ;;  %v7257_v52 = vrot.slane %v5727_v43, 1 }
 0x266   : > { %7222 = vst [vmem:[#allocation52_spill] sm:$0xff] %v5737_v54  ;;  %7223 = vst [vmem:[#allocation53_spill] sm:$0xff] %v5740_v63  ;;  %v5774_v4 = vmul.f32 %v4581_v30, %v1161_v17  ;;  %v5778_v32 = vmul.f32 %v4581_v30, %v5756_v31  ;;  %v5782_v24 = vmul.f32 %v4611_v0, %v1161_v17  ;;  %v5908_v54 = vld [vmem:[#allocation2 + $0x138] sm:$0xff] }
 0x267   : > { %7224 = vst [vmem:[#allocation54_spill] sm:$0xff] %v5747_v60  ;;  %7225 = vst [vmem:[#allocation55_spill] sm:$0xff] %v5750_v13  ;;  %v5786_v25 = vmul.f32 %v4611_v0, %v5756_v31  ;;  %v5789_v51 = vmul.f32 %v4623_v8, %v1161_v17  ;;  %v5792_v6 = vmul.f32 %v4594_v39, %v1161_v17  ;;  %v5829_v13 = vld [vmem:[#allocation2 + $0x108] sm:$0xff]  ;;  %v5916_v60 = vld [vmem:[#allocation2 + $0x150] sm:$0xff]  ;;  %v7253_v33 = vrot.slane %v5771_v19, 1 }
 0x268   : > { %7226 = vst [vmem:[#allocation56_spill] sm:$0xff] %v5754_v22  ;;  %7227 = vst [vmem:[#allocation57_spill] sm:$0xff] %v5756_v31  ;;  %v5796_v9 = vmul.f32 %v4594_v39, %v5756_v31  ;;  %v5800_v48 = vmul.f32 %v4623_v8, %v5756_v31  ;;  %v5803_v28 = vmul.f32 %v4645_v45, %v1161_v17  ;;  %v7254_v58 = vrot.slane %v5767_v27, 1  ;;  %v5975_v19 = vld [vmem:[#allocation2 + $0x178] sm:$0x3] }
 0x269   : > { %7228 = vst [vmem:[#allocation58_spill] sm:$0xff] %v5782_v24  ;;  %7229 = vst [vmem:[#allocation59_spill] sm:$0xff] %v5786_v25  ;;  %v5806_v55 = vmul.f32 %v4631_v35, %v1161_v17  ;;  %v5810_v36 = vmul.f32 %v4631_v35, %v5756_v31  ;;  %v5814_v44 = vmul.f32 %v4645_v45, %v5756_v31  ;;  %v5891_v31 = vld [vmem:[#allocation2 + $0x120] sm:$0xff]  ;;  %v7258_v24 = vmov %v7253_v33 }
 0x26a   : > { %7230 = vst [vmem:[#allocation60_spill] sm:$0xff] %v5789_v51  ;;  %7231 = vst [vmem:[#allocation61_spill] sm:$0xff] %v5800_v48  ;;  %v5817_v37 = vmul.f32 %v5383_v47, %v1161_v17  ;;  %v5827_v11 = vmul.f32 %v4654_v14, %v1161_v17  ;;  %v5836_v22 = vmul.f32 %v4575_v23, %v1166_v49  ;;  %v5902_v14 = vld [vmem:[#allocation2 + $0x128] sm:$0xff] }
 0x26b   : > { %7232 = vst [vmem:[#allocation62_spill] sm:$0xff] %v5803_v28  ;;  %7233 = vst [vmem:[#allocation63_spill] sm:$0xff] %v5806_v55  ;;  %v5839_v2 = vmul.f32 %v4581_v30, %v1166_v49  ;;  %v5844_v40 = vmul.f32 %v4611_v0, %v1166_v49  ;;  %v5847_v63 = vmul.f32 %v4623_v8, %v1166_v49 }
 0x26c   : > { %7234 = vst [vmem:[#allocation64_spill] sm:$0xff] %v5810_v36  ;;  %7235 = vst [vmem:[#allocation65_spill] sm:$0xff] %v5814_v44  ;;  %v5850_v15 = vmul.f32 %v4645_v45, %v1166_v49  ;;  %v5853_v56 = vmul.f32 %v5383_v47, %v1166_v49  ;;  %v1260_v28 = vmul.f32 %v4575_v23, %v5829_v13 }
 0x26d   : > { %7236 = vst [vmem:[#allocation66_spill] sm:$0xff] %v5817_v37  ;;  %7237 = vst [vmem:[#allocation67_spill] sm:$0xff] %v5827_v11  ;;  %v5859_v46 = vmul.f32 %v4575_v23, %v5831_v7  ;;  %v5863_v17 = vmul.f32 %v4581_v30, %v5829_v13  ;;  %v5867_v37 = vmul.f32 %v4611_v0, %v5829_v13 }
 0x26e   : > { %7238 = vst [vmem:[#allocation68_spill] sm:$0xff] %v5844_v40  ;;  %7239 = vst [vmem:[#allocation69_spill] sm:$0xff] %v5847_v63  ;;  %v5870_v44 = vmul.f32 %v4575_v23, %v1169_v18  ;;  %v5873_v49 = vmul.f32 %v4581_v30, %v1169_v18  ;;  %v5876_v20 = vmul.f32 %v4611_v0, %v1169_v18  ;;  %v1379_v51 = vrot.slane %v1260_v28, 1 }
 0x26f   : > { %7240 = vst [vmem:[#allocation70_spill] sm:$0xff] %v5850_v15  ;;  %7241 = vst [vmem:[#allocation71_spill] sm:$0xff] %v5853_v56  ;;  %v5879_v21 = vmul.f32 %v4623_v8, %v1169_v18  ;;  %v5882_v34 = vmul.f32 %v4645_v45, %v1169_v18  ;;  %v5885_v29 = vmul.f32 %v5383_v47, %v1169_v18  ;;  %v1380_v48 = vrot.slane %v5859_v46, 1  ;;  %v5910_v56 = vld [vmem:[#allocation2 + $0x140] sm:$0xff]  ;;  %v5918_v47 = vld [vmem:[#allocation2 + $0x158] sm:$0xff] }
 0x270   : > { %7242 = vst [vmem:[#allocation72_spill] sm:$0xff] %v5867_v37  ;;  %7243 = vst [vmem:[#allocation73_spill] sm:$0xff] %v5876_v20  ;;  %v1387_v11 = vrot.slane %v5870_v44, 1  ;;  %v1268_v18 = vmul.f32 %v4575_v23, %v5896_v38  ;;  %v5914_v44 = vld [vmem:[#allocation2 + $0x160] sm:$0x3]  ;;  %v1213_v53 = vmul.f32 %v4594_v39, %v5829_v13  ;;  %v1214_v28 = vmul.f32 %v4594_v39, %v5831_v7  ;;  %v5953_v20 = vld [vmem:[#allocation2 + $0x170] sm:$0xff] }
 0x271   : > { %7244 = vst [vmem:[#allocation74_spill] sm:$0xff] %v5879_v21  ;;  %7245 = vst [vmem:[#allocation75_spill] sm:$0xff] %v5882_v34  ;;  %v1215_v46 = vmul.f32 %v4594_v39, %v5891_v31  ;;  %v5928_v50 = vmul.f32 %v4581_v30, %v5896_v38  ;;  %v1263_v34 = vmul.f32 %v4575_v23, %v5891_v31 }
 0x272   : > { %7246 = vst [vmem:[#allocation76_spill] sm:$0xff] %v5885_v29  ;;  %7248 = vst [vmem:[#allocation78_spill] sm:$0xff] %v5910_v56  ;;  %v5932_v29 = vmul.f32 %v4611_v0, %v5896_v38  ;;  %v1264_v15 = vmul.f32 %v4575_v23, %v5902_v14  ;;  %v1216_v21 = vmul.f32 %v4594_v39, %v5902_v14 }
 0x273   : > { %7249 = vst [vmem:[#allocation79_spill] sm:$0xff] %v5914_v44  ;;  %7250 = vst [vmem:[#allocation80_spill] sm:$0xff] %v5916_v60  ;;  %v1266_v63 = vmul.f32 %v4575_v23, %v5908_v54  ;;  %v1267_v10 = vmul.f32 %v4575_v23, %v5910_v56  ;;  %v1376_v5 = vsel %vm1323_vm3, %v7254_v58, %v7253_v33  ;;  %v1392_v58 = vrot.slane %v1268_v18, 1 }
 0x274   : > { %7251 = vst [vmem:[#allocation81_spill] sm:$0xff] %v5918_v47  ;;  %7252 = vst [vmem:[#allocation82_spill] sm:$0xff] %v5932_v29  ;;  %v1271_v16 = vmul.f32 %v4575_v23, %v5914_v44  ;;  %v1269_v40 = vmul.f32 %v4575_v23, %v5916_v60  ;;  %v1270_v37 = vmul.f32 %v4575_v23, %v5918_v47  ;;  %v1384_v43 = vrot.slane %v1263_v34, 1 }
 0x275   : > { %7255 = vst [vmem:[#allocation83_spill] sm:$0xff] %v5951_v3  ;;  %7256 = vst [vmem:[#allocation84_spill] sm:$0xff] %v5953_v20  ;;  %v1378_v27 = vsel %vm1323_vm3, %v7258_v24, %v7257_v52  ;;  %v5966_v33 = vmul.f32 %v4623_v8, %v5896_v38  ;;  %v5970_v25 = vmul.f32 %v4645_v45, %v5896_v38  ;;  %v1385_v0 = vrot.slane %v1264_v15, 1 }
 0x276   : > { %v1381_v1 = vsel %vm1323_vm3, %v1379_v51, %v1380_v48  ;;  %7261 = vst [vmem:[#allocation87_spill] sm:$0xff] %v5975_v19  ;;  %v1272_v52 = vmul.f32 %v4575_v23, %v5951_v3  ;;  %v1273_v24 = vmul.f32 %v4575_v23, %v5953_v20  ;;  %v1389_v18 = vrot.slane %v1266_v63, 1 }
 0x277   : > { %7259 = vst [vmem:[#allocation85_spill] sm:$0xff] %v5966_v33  ;;  %7260 = vst [vmem:[#allocation86_spill] sm:$0xff] %v5970_v25  ;;  %v1390_v33 = vrot.slane %v1267_v10, 1  ;;  %v1217_v38 = vmul.f32 %v4594_v39, %v5908_v54  ;;  %v1394_v51 = vrot.slane %v1269_v40, 1  ;;  %v1395_v25 = vrot.slane %v1270_v37, 1 }
 0x278   : > { %v1397_v62 = vrot.slane %v1271_v16, 1  ;;  %v1218_v34 = vmul.f32 %v4594_v39, %v5910_v56  ;;  %v1219_v15 = vmul.f32 %v4594_v39, %v5916_v60  ;;  %v1220_v12 = vmul.f32 %v4594_v39, %v5918_v47 }
 0x279   : > { %v7262_v45 = vrot.slane %v5836_v22, 1  ;;  %v1274_v10 = vmul.f32 %v4575_v23, %v5975_v19  ;;  %v1386_v40 = vsel %vm1323_vm3, %v1384_v43, %v1385_v0  ;;  %v1388_v37 = vsel %vm1323_vm3, %v1385_v0, %v1387_v11 }
 0x27a   : > { %v1456_v16 = vadd.f32 %v1376_v5, %v5792_v6  ;;  %v1391_v8 = vsel %vm1323_vm3, %v1389_v18, %v1390_v33  ;;  %v1393_v29 = vsel %vm1323_vm3, %v1390_v33, %v1392_v58  ;;  %v1399_v36 = vrot.slane %v1272_v52, 1 }
 0x27b   : > { %v1383_v63 = vsel %vm1323_vm3, %v1380_v48, %v7262_v45  ;;  %v1400_v55 = vrot.slane %v1273_v24, 1  ;;  %v1396_v35 = vsel %vm1323_vm3, %v1394_v51, %v1395_v25  ;;  %v1398_v22 = vsel %vm1323_vm3, %v1395_v25, %v1397_v62 }
 0x27c   : > { %v1457_v45 = vadd.f32 %v1378_v27, %v5796_v9  ;;  %v1458_v48 = vadd.f32 %v1381_v1, %v1213_v53  ;;  %v1221_v23 = vmul.f32 %v4594_v39, %v5951_v3  ;;  %v1459_v43 = vadd.f32 %v1383_v63, %v1214_v28 }
 0x27d   : > { %v1460_v0 = vadd.f32 %v1386_v40, %v1215_v46  ;;  %v1461_v11 = vadd.f32 %v1388_v37, %v1216_v21  ;;  %v1222_v5 = vmul.f32 %v4594_v39, %v5953_v20  ;;  %v1402_v6 = vrot.slane %v1274_v10, 1 }
 0x27e   : > { %v1462_v58 = vadd.f32 %v1391_v8, %v1217_v38  ;;  %v1506_v33 = vmul.f32 %v4581_v30, %v5831_v7  ;;  %v1401_v52 = vsel %vm1323_vm3, %v1399_v36, %v1400_v55  ;;  %v1508_v62 = vmul.f32 %v4581_v30, %v5891_v31 }
 0x27f   : > { %v1509_v53 = vmul.f32 %v4581_v30, %v5902_v14  ;;  %v1511_v1 = vmul.f32 %v4581_v30, %v5908_v54  ;;  %v1512_v21 = vmul.f32 %v4581_v30, %v5910_v56  ;;  %v1514_v39 = vmul.f32 %v4581_v30, %v5916_v60 }
 0x280   : > { %v1515_v8 = vmul.f32 %v4581_v30, %v5918_v47  ;;  %v1516_v38 = vmul.f32 %v4581_v30, %v5914_v44  ;;  %v1463_v36 = vadd.f32 %v1393_v29, %v1218_v34  ;;  %v1464_v9 = vadd.f32 %v1396_v35, %v1219_v15 }
 0x281   : > { %v1517_v25 = vmul.f32 %v4581_v30, %v5951_v3  ;;  %v1518_v28 = vmul.f32 %v4581_v30, %v5953_v20  ;;  %v1403_v46 = vsel %vm1323_vm3, %v1400_v55, %v1402_v6  ;;  %v1465_v27 = vadd.f32 %v1398_v22, %v1220_v12 }
 0x282   : > { %v1466_v24 = vadd.f32 %v1401_v52, %v1221_v23  ;;  %v1519_v18 = vmul.f32 %v4581_v30, %v5975_v19  ;;  %v1625_v51 = vrot.slane %v1506_v33, 2  ;;  %v1629_v63 = vrot.slane %v1508_v62, 2 }
 0x283   : > { %v1630_v10 = vrot.slane %v1509_v53, 2  ;;  %v1634_v40 = vrot.slane %v1511_v1, 2  ;;  %v1635_v37 = vrot.slane %v1512_v21, 2  ;;  %v1639_v29 = vrot.slane %v1514_v39, 2 }
 0x284   : > { %v1640_v35 = vrot.slane %v1515_v8, 2  ;;  %v1642_v34 = vrot.slane %v1516_v38, 2  ;;  %v1467_v15 = vadd.f32 %v1403_v46, %v1222_v5  ;;  %v7263_v44 = vrot.slane %v5649_v61, 2 }
 0x285   : > { %v7264_v20 = vrot.slane %v5641_v42, 2  ;;  %v1644_v12 = vrot.slane %v1517_v25, 2  ;;  %v1645_v22 = vrot.slane %v1518_v28, 2  ;;  %v7265_v23 = vrot.slane %v5560_v41, 2 }
 0x286   : > { %v7266_v30 = vmov %v7263_v44  ;;  %v7267_v33 = vrot.slane %v5778_v32, 2  ;;  %v7268_v52 = vrot.slane %v5774_v4, 2  ;;  %v7269_v62 = vrot.slane %v5731_v26, 2 }
 0x287   : > { %v1616_v55 = vsel %vm1568_vm4, %v7264_v20, %v7263_v44  ;;  %v1618_v6 = vsel %vm1568_vm4, %v7266_v30, %v7265_v23  ;;  %v1647_v44 = vrot.slane %v1519_v18, 2  ;;  %v7271_v53 = vrot.slane %v5863_v17, 2  ;;  %v6070_v23 = vld [vmem:[#allocation2 + $0x180] sm:$0xff] }
 0x288   : > { %v1621_v5 = vsel %vm1568_vm4, %v7268_v52, %v7267_v33  ;;  %v7270_v42 = vmov %v7267_v33  ;;  %v7272_v61 = vrot.slane %v5839_v2, 2  ;;  %v1631_v21 = vsel %vm1568_vm4, %v1629_v63, %v1630_v10  ;;  %7275 = vst [vmem:[#allocation88_spill] sm:$0xff] %v6070_v23 }
 0x289   : > { %v1623_v20 = vsel %vm1568_vm4, %v7270_v42, %v7269_v62  ;;  %v1626_v41 = vsel %vm1568_vm4, %v7271_v53, %v1625_v51  ;;  %v7273_v4 = vrot.slane %v5873_v49, 2  ;;  %v1636_v26 = vsel %vm1568_vm4, %v1634_v40, %v1635_v37 }
 0x28a   : > { %v1628_v1 = vsel %vm1568_vm4, %v1625_v51, %v7272_v61  ;;  %v7274_v32 = vrot.slane %v5928_v50, 2  ;;  %v1641_v17 = vsel %vm1568_vm4, %v1639_v29, %v1640_v35  ;;  %v1643_v38 = vsel %vm1568_vm4, %v1640_v35, %v1642_v34  ;;  %v6072_v29 = vld [vmem:[#allocation2 + $0x188] sm:$0xff] }
 0x28b   : > { %v1633_v39 = vsel %vm1568_vm4, %v1630_v10, %v7273_v4  ;;  %v1646_v2 = vsel %vm1568_vm4, %v1644_v12, %v1645_v22  ;;  %v1699_v25 = vadd.f32 %v1616_v55, %v5682_v57  ;;  %v1700_v28 = vadd.f32 %v1618_v6, %v5684_v59  ;;  %7276 = vst [vmem:[#allocation89_spill] sm:$0xff] %v6072_v29  ;;  %v7277_v59 = vld [vmem:[#allocation9_spill] sm:$0xff]  ;;  %v7280_v6 = vld [vmem:[#allocation64_spill] sm:$0xff] }
 0x28c   : > { %v1638_v8 = vsel %vm1568_vm4, %v1635_v37, %v7274_v32  ;;  %v1701_v46 = vadd.f32 %v1621_v5, %v1456_v16  ;;  %v1648_v49 = vsel %vm1568_vm4, %v1645_v22, %v1647_v44  ;;  %v1702_v18 = vadd.f32 %v1623_v20, %v1457_v45  ;;  %v7279_v22 = vld [vmem:[#allocation63_spill] sm:$0xff] }
 0x28d   : > { %v1703_v51 = vadd.f32 %v1626_v41, %v1458_v48  ;;  %v1704_v63 = vadd.f32 %v1628_v1, %v1459_v43  ;;  %v1705_v10 = vadd.f32 %v1631_v21, %v1460_v0  ;;  %v1706_v50 = vadd.f32 %v1633_v39, %v1461_v11  ;;  %v6100_v21 = vld [vmem:[#allocation2 + $0x190] sm:$0x3] }
 0x28e   : > { %v1707_v40 = vadd.f32 %v1636_v26, %v1462_v58  ;;  %v1708_v37 = vadd.f32 %v1638_v8, %v1463_v36  ;;  %v1709_v35 = vadd.f32 %v1641_v17, %v1464_v9  ;;  %v1710_v34 = vadd.f32 %v1643_v38, %v1465_v27  ;;  %v7278_v27 = vld [vmem:[#allocation84_spill] sm:$0xff]  ;;  %7281 = vst [vmem:[#allocation9_spill] sm:$0xff] %v6100_v21  ;;  %v7282_v26 = vld [vmem:[#allocation7_spill] sm:$0xff] }
 0x28f   : > { %v1711_v12 = vadd.f32 %v1646_v2, %v1466_v24  ;;  %v1712_v57 = vadd.f32 %v1648_v49, %v1467_v15  ;;  %v1737_v16 = vmul.f32 %v7277_v59, %v5829_v13  ;;  %v1738_v45 = vmul.f32 %v7277_v59, %v5831_v7 }
 0x290   : > { %v1739_v48 = vmul.f32 %v7277_v59, %v5891_v31  ;;  %v1740_v43 = vmul.f32 %v7277_v59, %v5902_v14  ;;  %v1741_v0 = vmul.f32 %v7277_v59, %v5908_v54  ;;  %v1742_v11 = vmul.f32 %v7277_v59, %v5910_v56 }
 0x291   : > { %v1743_v58 = vmul.f32 %v7277_v59, %v5916_v60  ;;  %v1744_v36 = vmul.f32 %v7277_v59, %v5918_v47  ;;  %v1745_v9 = vmul.f32 %v7277_v59, %v5951_v3  ;;  %v1746_v24 = vmul.f32 %v7277_v59, %v7278_v27 }
 0x292   : > { %v1747_v15 = vmul.f32 %v7277_v59, %v6070_v23  ;;  %v1748_v55 = vmul.f32 %v7277_v59, %v6072_v29  ;;  %v1767_v30 = vadd.f32 %v7279_v22, %v1699_v25  ;;  %v1768_v33 = vadd.f32 %v7280_v6, %v1700_v28  ;;  %v7288_v59 = vld [vmem:[#allocation21_spill] sm:$0xff]  ;;  %v7291_v6 = vld [vmem:[#allocation59_spill] sm:$0xff] }
 0x293   : > { %v1769_v52 = vadd.f32 %v1737_v16, %v1701_v46  ;;  %v1770_v5 = vadd.f32 %v1738_v45, %v1702_v18  ;;  %v1771_v62 = vadd.f32 %v1739_v48, %v1703_v51  ;;  %v1772_v42 = vadd.f32 %v1740_v43, %v1704_v63  ;;  %v7283_v46 = vld [vmem:[#allocation79_spill] sm:$0xff] }
 0x294   : > { %v1773_v20 = vadd.f32 %v1741_v0, %v1705_v10  ;;  %v1774_v44 = vadd.f32 %v1742_v11, %v1706_v50  ;;  %v1775_v53 = vadd.f32 %v1743_v58, %v1707_v40  ;;  %v1776_v41 = vadd.f32 %v1744_v36, %v1708_v37  ;;  %v7284_v37 = vld [vmem:[#allocation43_spill] sm:$0xff] }
 0x295   : > { %v1777_v61 = vadd.f32 %v1745_v9, %v1709_v35  ;;  %v1778_v1 = vadd.f32 %v1746_v24, %v1710_v34  ;;  %v1779_v4 = vadd.f32 %v1747_v15, %v1711_v12  ;;  %v1780_v39 = vadd.f32 %v1748_v55, %v1712_v57  ;;  %v7286_v34 = vld [vmem:[#allocation41_spill] sm:$0xff] }
 0x296   : > { %v1816_v32 = vmul.f32 %v7282_v26, %v5831_v7  ;;  %v1818_v8 = vmul.f32 %v7282_v26, %v5891_v31  ;;  %v1819_v17 = vmul.f32 %v7282_v26, %v5902_v14  ;;  %v1821_v38 = vmul.f32 %v7282_v26, %v5908_v54 }
 0x297   : > { %v1822_v2 = vmul.f32 %v7282_v26, %v5910_v56  ;;  %v1824_v25 = vmul.f32 %v7282_v26, %v5916_v60  ;;  %v1825_v28 = vmul.f32 %v7282_v26, %v5918_v47  ;;  %v1826_v49 = vmul.f32 %v7282_v26, %v7283_v46 }
 0x298   : > { %v1827_v18 = vmul.f32 %v7282_v26, %v5951_v3  ;;  %v1828_v51 = vmul.f32 %v7282_v26, %v7278_v27  ;;  %v1829_v63 = vmul.f32 %v7282_v26, %v5975_v19  ;;  %v1830_v10 = vmul.f32 %v7282_v26, %v6070_v23 }
 0x299   : > { %v1831_v50 = vmul.f32 %v7282_v26, %v6072_v29  ;;  %v1832_v40 = vmul.f32 %v7282_v26, %v6100_v21  ;;  %v7285_v35 = vrot.slane %v7284_v37, 1  ;;  %v7287_v12 = vrot.slane %v7286_v34, 1  ;;  %v7293_v34 = vld [vmem:[#allocation58_spill] sm:$0xff] }
 0x29a   : > { %v7289_v16 = vrot.slane %v7288_v59, 1  ;;  %v1932_v43 = vrot.slane %v1816_v32, 1  ;;  %v1936_v0 = vrot.slane %v1818_v8, 1  ;;  %v1937_v11 = vrot.slane %v1819_v17, 1 }
 0x29b   : > { %v1923_v57 = vsel %vm1323_vm3, %v7287_v12, %v7285_v35  ;;  %v7290_v45 = vmov %v7285_v35  ;;  %v1941_v58 = vrot.slane %v1821_v38, 1  ;;  %v1942_v36 = vrot.slane %v1822_v2, 1  ;;  %v7298_v38 = vld [vmem:[#allocation72_spill] sm:$0xff] }
 0x29c   : > { %v1925_v48 = vsel %vm1323_vm3, %v7290_v45, %v7289_v16  ;;  %v1946_v9 = vrot.slane %v1824_v25, 1  ;;  %v1947_v24 = vrot.slane %v1825_v28, 1  ;;  %v1949_v15 = vrot.slane %v1826_v49, 1  ;;  %v7295_v16 = vld [vmem:[#allocation51_spill] sm:$0xff]  ;;  %v7300_v28 = vld [vmem:[#allocation68_spill] sm:$0xff] }
 0x29d   : > { %v1951_v55 = vrot.slane %v1827_v18, 1  ;;  %v1952_v22 = vrot.slane %v1828_v51, 1  ;;  %v7292_v26 = vrot.slane %v7291_v6, 1  ;;  %v7294_v35 = vrot.slane %v7293_v34, 1  ;;  %v7304_v6 = vld [vmem:[#allocation82_spill] sm:$0xff] }
 0x29e   : > { %v1954_v59 = vrot.slane %v1829_v63, 1  ;;  %v1956_v37 = vrot.slane %v1830_v10, 1  ;;  %v1957_v21 = vrot.slane %v1831_v50, 1  ;;  %v7296_v32 = vrot.slane %v7295_v16, 1  ;;  %v7302_v63 = vld [vmem:[#allocation73_spill] sm:$0xff] }
 0x29f   : > { %v1928_v12 = vsel %vm1323_vm3, %v7294_v35, %v7292_v26  ;;  %v7297_v8 = vmov %v7292_v26  ;;  %v7299_v2 = vrot.slane %v7298_v38, 1  ;;  %v7301_v49 = vrot.slane %v7300_v28, 1 }
 0x2a0   : > { %v1930_v17 = vsel %vm1323_vm3, %v7297_v8, %v7296_v32  ;;  %v1959_v51 = vrot.slane %v1832_v40, 1  ;;  %v1938_v45 = vsel %vm1323_vm3, %v1936_v0, %v1937_v11  ;;  %v7303_v10 = vrot.slane %v7302_v63, 1  ;;  %v7312_v63 = vld [vmem:[#allocation34_spill] sm:$0xff] }
 0x2a1   : > { %v1933_v25 = vsel %vm1323_vm3, %v7299_v2, %v1932_v43  ;;  %v1935_v18 = vsel %vm1323_vm3, %v1932_v43, %v7301_v49  ;;  %v1943_v26 = vsel %vm1323_vm3, %v1941_v58, %v1942_v36  ;;  %v7305_v34 = vrot.slane %v7304_v6, 1  ;;  %v7306_v43 = vld [vmem:[#allocation42_spill] sm:$0xff]  ;;  %v7309_v49 = vld [vmem:[#allocation9_spill] sm:$0xff] }
 0x2a2   : > { %v1940_v50 = vsel %vm1323_vm3, %v1937_v11, %v7303_v10  ;;  %v1948_v16 = vsel %vm1323_vm3, %v1946_v9, %v1947_v24  ;;  %v1950_v32 = vsel %vm1323_vm3, %v1947_v24, %v1949_v15  ;;  %v1953_v8 = vsel %vm1323_vm3, %v1951_v55, %v1952_v22  ;;  %v7307_v11 = vld [vmem:[#allocation44_spill] sm:$0xff] }
 0x2a3   : > { %v1945_v35 = vsel %vm1323_vm3, %v1942_v36, %v7305_v34  ;;  %v6168_v40 = vadd.f32 %v1923_v57, %v7306_v43  ;;  %v1955_v0 = vsel %vm1323_vm3, %v1952_v22, %v1954_v59  ;;  %v1958_v38 = vsel %vm1323_vm3, %v1956_v37, %v1957_v21  ;;  %v7316_v34 = vld [vmem:[#allocation45_spill] sm:$0xff] }
 0x2a4   : > { %v6173_v2 = vadd.f32 %v1925_v48, %v7307_v11  ;;  %v6175_v58 = vadd.f32 %v1928_v12, %v1767_v30  ;;  %v1960_v36 = vsel %vm1323_vm3, %v1957_v21, %v1959_v51  ;;  %v6178_v28 = vadd.f32 %v1930_v17, %v1768_v33  ;;  %v7310_v51 = vld [vmem:[#allocation31_spill] sm:$0xff] }
 0x2a5   : > { %v6180_v9 = vadd.f32 %v1933_v25, %v1769_v52  ;;  %v6182_v24 = vadd.f32 %v1935_v18, %v1770_v5  ;;  %v6184_v15 = vadd.f32 %v1938_v45, %v1771_v62  ;;  %v6186_v57 = vadd.f32 %v1940_v50, %v1772_v42  ;;  %v7308_v62 = vld [vmem:[#allocation8_spill] sm:$0xff] }
 0x2a6   : > { %v6188_v55 = vadd.f32 %v1943_v26, %v1773_v20  ;;  %v6190_v22 = vadd.f32 %v1945_v35, %v1774_v44  ;;  %v6192_v48 = vadd.f32 %v1948_v16, %v1775_v53  ;;  %v6194_v30 = vadd.f32 %v1950_v32, %v1776_v41  ;;  %v7314_v26 = vld [vmem:[#allocation46_spill] sm:$0xff]  ;;  %v7318_v32 = vld [vmem:[#allocation40_spill] sm:$0xff] }
 0x2a7   : > { %v6196_v12 = vadd.f32 %v1953_v8, %v1777_v61  ;;  %v6198_v33 = vadd.f32 %v1955_v0, %v1778_v1  ;;  %v6200_v52 = vadd.f32 %v1958_v38, %v1779_v4  ;;  %v6202_v5 = vadd.f32 %v1960_v36, %v1780_v39 }
 0x2a8   : > { %v2059_v42 = vmul.f32 %v7308_v62, %v5829_v13  ;;  %v2060_v20 = vmul.f32 %v7308_v62, %v5831_v7  ;;  %v2062_v44 = vmul.f32 %v7308_v62, %v5891_v31  ;;  %v2063_v53 = vmul.f32 %v7308_v62, %v5902_v14 }
 0x2a9   : > { %v2065_v41 = vmul.f32 %v7308_v62, %v5908_v54  ;;  %v2066_v61 = vmul.f32 %v7308_v62, %v5910_v56  ;;  %v2068_v1 = vmul.f32 %v7308_v62, %v5916_v60  ;;  %v2069_v21 = vmul.f32 %v7308_v62, %v5918_v47 }
 0x2aa   : > { %v2070_v4 = vmul.f32 %v7308_v62, %v7283_v46  ;;  %v2071_v39 = vmul.f32 %v7308_v62, %v5951_v3  ;;  %v2072_v59 = vmul.f32 %v7308_v62, %v7278_v27  ;;  %v2073_v37 = vmul.f32 %v7308_v62, %v5975_v19 }
 0x2ab   : > { %v2074_v17 = vmul.f32 %v7308_v62, %v6070_v23  ;;  %v2075_v25 = vmul.f32 %v7308_v62, %v6072_v29  ;;  %v2076_v18 = vmul.f32 %v7308_v62, %v7309_v49  ;;  %v7311_v45 = vrot.slane %v7310_v51, 2  ;;  %v7321_v49 = vld [vmem:[#allocation85_spill] sm:$0xff] }
 0x2ac   : > { %v7313_v10 = vrot.slane %v7312_v63, 2  ;;  %v7315_v6 = vrot.slane %v7314_v26, 2  ;;  %v7317_v35 = vrot.slane %v7316_v34, 2  ;;  %v7319_v8 = vrot.slane %v7318_v32, 2  ;;  %v7324_v32 = vld [vmem:[#allocation60_spill] sm:$0xff] }
 0x2ad   : > { %v2175_v38 = vrot.slane %v2059_v42, 2  ;;  %v2176_v11 = vrot.slane %v2060_v20, 2  ;;  %v2180_v36 = vrot.slane %v2062_v44, 2  ;;  %v2181_v62 = vrot.slane %v2063_v53, 2  ;;  %v7326_v44 = vld [vmem:[#allocation52_spill] sm:$0xff] }
 0x2ae   : > { %v2164_v50 = vsel %vm1568_vm4, %v7313_v10, %v7311_v45  ;;  %v2167_v16 = vsel %vm1568_vm4, %v7317_v35, %v7315_v6  ;;  %v7320_v43 = vmov %v7315_v6  ;;  %v2185_v51 = vrot.slane %v2065_v41, 2  ;;  %v7322_v6 = vld [vmem:[#allocation61_spill] sm:$0xff] }
 0x2af   : > { %v2169_v0 = vsel %vm1568_vm4, %v7320_v43, %v7319_v8  ;;  %v2186_v63 = vrot.slane %v2066_v61, 2  ;;  %v2188_v45 = vrot.slane %v7321_v49, 2  ;;  %v2190_v10 = vrot.slane %v2068_v1, 2  ;;  %v7331_v43 = vld [vmem:[#allocation74_spill] sm:$0xff] }
 0x2b0   : > { %v2191_v19 = vrot.slane %v2069_v21, 2  ;;  %v2193_v46 = vrot.slane %v2070_v4, 2  ;;  %v2195_v34 = vrot.slane %v2071_v39, 2  ;;  %v2196_v29 = vrot.slane %v2072_v59, 2  ;;  %v7329_v21 = vld [vmem:[#allocation69_spill] sm:$0xff] }
 0x2b1   : > { %v7323_v35 = vrot.slane %v7322_v6, 2  ;;  %v7325_v23 = vrot.slane %v7324_v32, 2  ;;  %v2198_v8 = vrot.slane %v2073_v37, 2  ;;  %v2200_v42 = vrot.slane %v2074_v17, 2  ;;  %v7333_v32 = vld [vmem:[#allocation36_spill] sm:$0xff] }
 0x2b2   : > { %v2201_v20 = vrot.slane %v2075_v25, 2  ;;  %v7327_v53 = vrot.slane %v7326_v44, 2  ;;  %v2177_v1 = vsel %vm1568_vm4, %v2175_v38, %v2176_v11  ;;  %v7330_v4 = vrot.slane %v7329_v21, 2 }
 0x2b3   : > { %v2172_v26 = vsel %vm1568_vm4, %v7325_v23, %v7323_v35  ;;  %v7328_v41 = vmov %v7323_v35  ;;  %v2203_v59 = vrot.slane %v2076_v18, 2  ;;  %v2182_v49 = vsel %vm1568_vm4, %v2180_v36, %v2181_v62 }
 0x2b4   : > { %v2174_v61 = vsel %vm1568_vm4, %v7328_v41, %v7327_v53  ;;  %v2179_v39 = vsel %vm1568_vm4, %v2176_v11, %v7330_v4  ;;  %v7332_v23 = vrot.slane %v7331_v43, 2  ;;  %v2187_v17 = vsel %vm1568_vm4, %v2185_v51, %v2186_v63  ;;  %v7339_v41 = vld [vmem:[#allocation89_spill] sm:$0xff]  ;;  %v7340_v4 = vld [vmem:[#allocation54_spill] sm:$0xff] }
 0x2b5   : > { %v2189_v25 = vsel %vm1568_vm4, %v2186_v63, %v2188_v45  ;;  %v2192_v6 = vsel %vm1568_vm4, %v2190_v10, %v2191_v19  ;;  %v2194_v35 = vsel %vm1568_vm4, %v2191_v19, %v2193_v46  ;;  %v2197_v38 = vsel %vm1568_vm4, %v2195_v34, %v2196_v29 }
 0x2b6   : > { %v2184_v37 = vsel %vm1568_vm4, %v2181_v62, %v7332_v23  ;;  %v2252_v44 = vadd.f32 %v2164_v50, %v7333_v32  ;;  %v2199_v18 = vsel %vm1568_vm4, %v2196_v29, %v2198_v8  ;;  %v2202_v11 = vsel %vm1568_vm4, %v2200_v42, %v2201_v20 }
 0x2b7   : > { %v2253_v36 = vadd.f32 %v2167_v16, %v6168_v40  ;;  %v2254_v62 = vadd.f32 %v2169_v0, %v6173_v2  ;;  %v2204_v51 = vsel %vm1568_vm4, %v2201_v20, %v2203_v59  ;;  %v2255_v63 = vadd.f32 %v2172_v26, %v6175_v58  ;;  %v7334_v0 = vld [vmem:[#allocation57_spill] sm:$0xff]  ;;  %v7338_v20 = vld [vmem:[#allocation88_spill] sm:$0xff]  ;;  %v7341_v59 = vld [vmem:[#allocation67_spill] sm:$0xff] }
 0x2b8   : > { %v2256_v45 = vadd.f32 %v2174_v61, %v6178_v28  ;;  %v2257_v19 = vadd.f32 %v2177_v1, %v6180_v9  ;;  %v2258_v46 = vadd.f32 %v2179_v39, %v6182_v24  ;;  %v2259_v50 = vadd.f32 %v2182_v49, %v6184_v15  ;;  %v7335_v15 = vld [vmem:[#allocation11_spill] sm:$0xff] }
 0x2b9   : > { %v2260_v29 = vadd.f32 %v2184_v37, %v6186_v57  ;;  %v2261_v10 = vadd.f32 %v2187_v17, %v6188_v55  ;;  %v2262_v40 = vadd.f32 %v2189_v25, %v6190_v22  ;;  %v2263_v2 = vadd.f32 %v2192_v6, %v6192_v48  ;;  %v6295_v57 = vld [vmem:[#allocation2 + $0x198] sm:$0xff]  ;;  %v6297_v55 = vld [vmem:[#allocation2 + $0x1a0] sm:$0xff] }
 0x2ba   : > { %v2264_v16 = vadd.f32 %v2194_v35, %v6194_v30  ;;  %v2265_v58 = vadd.f32 %v2197_v38, %v6196_v12  ;;  %v2266_v28 = vadd.f32 %v2199_v18, %v6198_v33  ;;  %v2267_v9 = vadd.f32 %v2202_v11, %v6200_v52  ;;  %7336 = vst [vmem:[#allocation63_spill] sm:$0xff] %v6295_v57 }
 0x2bb   : > { %v2268_v24 = vadd.f32 %v2204_v51, %v6202_v5  ;;  %v2290_v34 = vmul.f32 %v7335_v15, %v7334_v0  ;;  %7337 = vst [vmem:[#allocation64_spill] sm:$0xff] %v6297_v55  ;;  %v2291_v22 = vmul.f32 %v7335_v15, %v5829_v13  ;;  %v2292_v48 = vmul.f32 %v7335_v15, %v5831_v7 }
 0x2bc   : > { %v2293_v30 = vmul.f32 %v7335_v15, %v5891_v31  ;;  %v2294_v12 = vmul.f32 %v7335_v15, %v5902_v14  ;;  %v2295_v33 = vmul.f32 %v7335_v15, %v5908_v54  ;;  %v2296_v52 = vmul.f32 %v7335_v15, %v5910_v56 }
 0x2bd   : > { %v2297_v5 = vmul.f32 %v7335_v15, %v5916_v60  ;;  %v2298_v26 = vmul.f32 %v7335_v15, %v5918_v47  ;;  %v2299_v8 = vmul.f32 %v7335_v15, %v5951_v3  ;;  %v2300_v42 = vmul.f32 %v7335_v15, %v7278_v27 }
 0x2be   : > { %v2301_v53 = vmul.f32 %v7335_v15, %v7338_v20  ;;  %v2302_v61 = vmul.f32 %v7335_v15, %v7339_v41  ;;  %v2303_v1 = vmul.f32 %v7335_v15, %v6295_v57  ;;  %v2304_v21 = vmul.f32 %v7335_v15, %v6297_v55  ;;  %v7347_v15 = vld [vmem:[#allocation87_spill] sm:$0xff] }
 0x2bf   : > { %v6328_v39 = vadd.f32 %v7340_v4, %v2252_v44  ;;  %v6331_v49 = vadd.f32 %v7341_v59, %v2253_v36  ;;  %v6333_v43 = vadd.f32 %v2290_v34, %v2254_v62  ;;  %v6335_v23 = vadd.f32 %v2291_v22, %v2255_v63  ;;  %v7344_v63 = vld [vmem:[#allocation10_spill] sm:$0xff]  ;;  %v7355_v4 = vld [vmem:[#allocation47_spill] sm:$0xff] }
 0x2c0   : > { %v6337_v37 = vadd.f32 %v2292_v48, %v2256_v45  ;;  %v6339_v17 = vadd.f32 %v2293_v30, %v2257_v19  ;;  %v6341_v25 = vadd.f32 %v2294_v12, %v2258_v46  ;;  %v6343_v6 = vadd.f32 %v2295_v33, %v2259_v50  ;;  %v7348_v30 = vld [vmem:[#allocation9_spill] sm:$0xff] }
 0x2c1   : > { %v6345_v35 = vadd.f32 %v2296_v52, %v2260_v29  ;;  %v6347_v38 = vadd.f32 %v2297_v5, %v2261_v10  ;;  %v6349_v32 = vadd.f32 %v2298_v26, %v2262_v40  ;;  %v6351_v44 = vadd.f32 %v2299_v8, %v2263_v2  ;;  %v6373_v10 = vld [vmem:[#allocation2 + $0x1a8] sm:$0x3]  ;;  %v7349_v26 = vld [vmem:[#allocation32_spill] sm:$0xff] }
 0x2c2   : > { %v6353_v18 = vadd.f32 %v2300_v42, %v2264_v16  ;;  %v6355_v11 = vadd.f32 %v2301_v53, %v2265_v58  ;;  %v6357_v36 = vadd.f32 %v2302_v61, %v2266_v28  ;;  %v6359_v62 = vadd.f32 %v2303_v1, %v2267_v9  ;;  %7345 = vst [vmem:[#allocation41_spill] sm:$0xff] %v6373_v10  ;;  %v7346_v58 = vld [vmem:[#allocation79_spill] sm:$0xff]  ;;  %v7353_v1 = vld [vmem:[#allocation48_spill] sm:$0xff] }
 0x2c3   : > { %v6361_v51 = vadd.f32 %v2304_v21, %v2268_v24  ;;  %v2368_v45 = vmul.f32 %v7344_v63, %v5829_v13  ;;  %v2369_v19 = vmul.f32 %v7344_v63, %v5831_v7  ;;  %v2371_v46 = vmul.f32 %v7344_v63, %v5891_v31  ;;  %v7351_v42 = vld [vmem:[#allocation35_spill] sm:$0xff] }
 0x2c4   : > { %7342 = vst [vmem:[#allocation7_spill] sm:$0xff] %v6359_v62  ;;  %v2372_v50 = vmul.f32 %v7344_v63, %v5902_v14  ;;  %v2374_v29 = vmul.f32 %v7344_v63, %v5908_v54  ;;  %v2375_v40 = vmul.f32 %v7344_v63, %v5910_v56  ;;  %v2377_v2 = vmul.f32 %v7344_v63, %v5916_v60  ;;  %v7357_v62 = vld [vmem:[#allocation22_spill] sm:$0xff]  ;;  %v7365_v56 = vld [vmem:[#allocation53_spill] sm:$0xff] }
 0x2c5   : > { %7343 = vst [vmem:[#allocation43_spill] sm:$0xff] %v6361_v51  ;;  %v2378_v16 = vmul.f32 %v7344_v63, %v5918_v47  ;;  %v2379_v28 = vmul.f32 %v7344_v63, %v7346_v58  ;;  %v2380_v9 = vmul.f32 %v7344_v63, %v5951_v3  ;;  %v2381_v24 = vmul.f32 %v7344_v63, %v7278_v27  ;;  %v7364_v3 = vld [vmem:[#allocation86_spill] sm:$0xff] }
 0x2c6   : > { %v2382_v34 = vmul.f32 %v7344_v63, %v7347_v15  ;;  %v2383_v22 = vmul.f32 %v7344_v63, %v7338_v20  ;;  %v2384_v48 = vmul.f32 %v7344_v63, %v7339_v41  ;;  %v2385_v12 = vmul.f32 %v7344_v63, %v7348_v30  ;;  %v7360_v41 = vld [vmem:[#allocation65_spill] sm:$0xff] }
 0x2c7   : > { %v2386_v33 = vmul.f32 %v7344_v63, %v6295_v57  ;;  %v2387_v52 = vmul.f32 %v7344_v63, %v6297_v55  ;;  %v2388_v5 = vmul.f32 %v7344_v63, %v6373_v10  ;;  %v7350_v8 = vrot.slane %v7349_v26, 1  ;;  %v7362_v10 = vld [vmem:[#allocation62_spill] sm:$0xff] }
 0x2c8   : > { %v7352_v53 = vrot.slane %v7351_v42, 1  ;;  %v7354_v21 = vrot.slane %v7353_v1, 1  ;;  %v7356_v59 = vrot.slane %v7355_v4, 1  ;;  %v7358_v57 = vrot.slane %v7357_v62, 1 }
 0x2c9   : > { %v7361_v63 = vrot.slane %v7360_v41, 1  ;;  %v7363_v26 = vrot.slane %v7362_v10, 1  ;;  %v2482_v20 = vrot.slane %v2368_v45, 1  ;;  %v2488_v15 = vrot.slane %v2372_v50, 1 }
 0x2ca   : > { %v2471_v61 = vsel %vm1323_vm3, %v7352_v53, %v7350_v8  ;;  %v2474_v51 = vsel %vm1323_vm3, %v7356_v59, %v7354_v21  ;;  %v7359_v30 = vmov %v7354_v21  ;;  %v2483_v8 = vrot.slane %v2369_v19, 1 }
 0x2cb   : > { %v2476_v55 = vsel %vm1323_vm3, %v7359_v30, %v7358_v57  ;;  %v2479_v42 = vsel %vm1323_vm3, %v7363_v26, %v7361_v63  ;;  %v2487_v53 = vrot.slane %v2371_v46, 1  ;;  %v2492_v27 = vrot.slane %v2374_v29, 1 }
 0x2cc   : > { %v2493_v4 = vrot.slane %v2375_v40, 1  ;;  %v2495_v21 = vrot.slane %v7364_v3, 1  ;;  %v2497_v59 = vrot.slane %v2377_v2, 1  ;;  %v2498_v62 = vrot.slane %v2378_v16, 1  ;;  %v7367_v3 = vld [vmem:[#allocation70_spill] sm:$0xff] }
 0x2cd   : > { %v2500_v58 = vrot.slane %v2379_v28, 1  ;;  %v2502_v1 = vrot.slane %v2380_v9, 1  ;;  %v2503_v47 = vrot.slane %v2381_v24, 1  ;;  %v2505_v57 = vrot.slane %v2382_v34, 1  ;;  %v7369_v9 = vld [vmem:[#allocation75_spill] sm:$0xff] }
 0x2ce   : > { %v2507_v30 = vrot.slane %v2383_v22, 1  ;;  %v2508_v60 = vrot.slane %v2384_v48, 1  ;;  %v7366_v10 = vrot.slane %v7365_v56, 1  ;;  %v2510_v19 = vrot.slane %v2385_v12, 1 }
 0x2cf   : > { %v2512_v46 = vrot.slane %v2386_v33, 1  ;;  %v2513_v50 = vrot.slane %v2387_v52, 1  ;;  %v2484_v29 = vsel %vm1323_vm3, %v2482_v20, %v2483_v8  ;;  %v7368_v40 = vrot.slane %v7367_v3, 1 }
 0x2d0   : > { %v2481_v45 = vsel %vm1323_vm3, %v7361_v63, %v7366_v10  ;;  %v2489_v16 = vsel %vm1323_vm3, %v2487_v53, %v2488_v15  ;;  %v2515_v28 = vrot.slane %v2388_v5, 1  ;;  %v7370_v24 = vrot.slane %v7369_v9, 1  ;;  %v7381_v10 = vld [vmem:[#allocation16_spill] sm:$0xff]  ;;  %v7382_v63 = vld [vmem:[#allocation17_spill] sm:$0xff] }
 0x2d1   : > { %v2486_v2 = vsel %vm1323_vm3, %v2483_v8, %v7368_v40  ;;  %v2494_v41 = vsel %vm1323_vm3, %v2492_v27, %v2493_v4  ;;  %v2496_v34 = vsel %vm1323_vm3, %v2493_v4, %v2495_v21  ;;  %v2499_v22 = vsel %vm1323_vm3, %v2497_v59, %v2498_v62  ;;  %v7372_v27 = vld [vmem:[#allocation55_spill] sm:$0xff]  ;;  %v7385_v40 = vld [vmem:[#allocation18_spill] sm:$0xff] }
 0x2d2   : > { %v2491_v56 = vsel %vm1323_vm3, %v2488_v15, %v7370_v24  ;;  %v2501_v48 = vsel %vm1323_vm3, %v2498_v62, %v2500_v58  ;;  %v2504_v20 = vsel %vm1323_vm3, %v2502_v1, %v2503_v47  ;;  %v2506_v12 = vsel %vm1323_vm3, %v2503_v47, %v2505_v57  ;;  %v7371_v15 = vld [vmem:[#allocation39_spill] sm:$0xff]  ;;  %v7377_v62 = vld [vmem:[#allocation38_spill] sm:$0xff]  ;;  %v6555_v24 = vld [vmem:[%s7017_s6] ss:$0 sm:$0xff] }
 0x2d3   : > { %v2509_v33 = vsel %vm1323_vm3, %v2507_v30, %v2508_v60  ;;  %v2511_v52 = vsel %vm1323_vm3, %v2508_v60, %v2510_v19  ;;  %v6444_v5 = vsel %vm1323_vm3, %v2512_v46, %v2513_v50  ;;  %v2562_v26 = vadd.f32 %v2471_v61, %v7371_v15  ;;  %v7383_v19 = vld [vmem:[#allocation23_spill] sm:$0xff] }
 0x2d4   : > { %v2563_v8 = vadd.f32 %v2474_v51, %v7372_v27  ;;  %v6449_v53 = vsel %vm1323_vm3, %v2513_v50, %v2515_v28  ;;  %v2564_v58 = vadd.f32 %v2476_v55, %v6328_v39  ;;  %v2565_v4 = vadd.f32 %v2479_v42, %v6331_v49  ;;  %v7376_v42 = vld [vmem:[#allocation81_spill] sm:$0xff]  ;;  %v6544_v50 = vld [vmem:[%s7016_s5] ss:$0 sm:$0xff]  ;;  %v7387_v28 = vld [vmem:[#allocation30_spill] sm:$0xff] }
 0x2d5   : > { %v6454_v47 = vadd.f32 %v2481_v45, %v6333_v43  ;;  %v6457_v21 = vadd.f32 %v2484_v29, %v6335_v23  ;;  %v6460_v60 = vadd.f32 %v2486_v2, %v6337_v37  ;;  %v6463_v61 = vadd.f32 %v2489_v16, %v6339_v17  ;;  %v7384_v29 = vld [vmem:[#allocation14_spill] sm:$0xff]  ;;  %v7386_v16 = vld [vmem:[#allocation27_spill] sm:$0xff] }
 0x2d6   : > { %v6466_v51 = vadd.f32 %v2491_v56, %v6341_v25  ;;  %v6469_v59 = vadd.f32 %v2494_v41, %v6343_v6  ;;  %v6472_v55 = vadd.f32 %v2496_v34, %v6345_v35  ;;  %v6475_v39 = vadd.f32 %v2499_v22, %v6347_v38  ;;  %v6495_v25 = vld [vmem:[%s7015_s4 + $0x8] ss:$0 sm:$0xff]  ;;  %v7388_v56 = vld [vmem:[#allocation12_spill] sm:$0xff]  ;;  %v7389_v34 = vld [vmem:[#allocation15_spill] sm:$0xff] }
 0x2d7   : > { %v6478_v49 = vadd.f32 %v2501_v48, %v6349_v32  ;;  %v6481_v43 = vadd.f32 %v2504_v20, %v6351_v44  ;;  %v6484_v23 = vadd.f32 %v2506_v12, %v6353_v18  ;;  %v6487_v37 = vadd.f32 %v2509_v33, %v6355_v11  ;;  %v7390_v48 = vld [vmem:[#allocation29_spill] sm:$0xff]  ;;  %v7393_v27 = vld [vmem:[#allocation83_spill] sm:$0xff] }
 0x2d8   : > { %v6490_v17 = vadd.f32 %v2511_v52, %v6357_v36  ;;  %v2610_v6 = vmul.f32 %v6495_v25, %v7334_v0  ;;  %v2612_v35 = vmul.f32 %v6495_v25, %v5829_v13  ;;  %v6503_v38 = vmul.f32 %v6495_v25, %v5831_v7  ;;  %v7373_v0 = vld [vmem:[#allocation78_spill] sm:$0xff]  ;;  %v7374_v13 = vld [vmem:[#allocation77_spill] sm:$0xff]  ;;  %v7375_v36 = vld [vmem:[#allocation80_spill] sm:$0xff] }
 0x2d9   : > { %v6507_v32 = vmul.f32 %v6495_v25, %v5891_v31  ;;  %v6511_v44 = vmul.f32 %v6495_v25, %v5902_v14  ;;  %v6515_v18 = vmul.f32 %v6495_v25, %v5908_v54  ;;  %v6519_v11 = vmul.f32 %v6495_v25, %v7373_v0  ;;  %v7379_v54 = vld [vmem:[#allocation37_spill] sm:$0xff]  ;;  %v7392_v52 = vld [vmem:[#allocation79_spill] sm:$0xff] }
 0x2da   : > { %v6523_v7 = vmul.f32 %v6495_v25, %v7374_v13  ;;  %v6527_v31 = vmul.f32 %v6495_v25, %v7375_v36  ;;  %v6531_v14 = vmul.f32 %v6495_v25, %v7376_v42  ;;  %v7378_v1 = vrot.slane %v7377_v62, 2  ;;  %v7391_v12 = vld [vmem:[#allocation13_spill] sm:$0xff] }
 0x2db   : > { %v7380_v57 = vrot.slane %v7379_v54, 2  ;;  %v2804_v45 = vadd.f32 %v7382_v63, %v7381_v10  ;;  %v2841_v3 = vmul.f32 %v6544_v50, %v7384_v29  ;;  %v2842_v2 = vmul.f32 %v6544_v50, %v7385_v40  ;;  %v7394_v13 = vld [vmem:[#allocation33_spill] sm:$0xff]  ;;  %v7398_v10 = vld [vmem:[#allocation50_spill] sm:$0xff] }
 0x2dc   : > { %v2911_v9 = vadd.f32 %v7387_v28, %v7386_v16  ;;  %v6559_v41 = vadd.f32 %v6555_v24, %v7388_v56  ;;  %v6563_v22 = vadd.f32 %v6555_v24, %v7389_v34  ;;  %v2912_v20 = vsel %vm1042_vm1, %v7390_v48, 0.0 }
 0x2dd   : > { %v2713_v30 = vsel %vm1568_vm4, %v7380_v57, %v7378_v1  ;;  %v2914_v33 = vsel %vm1042_vm1, %v7391_v12, 0.0  ;;  %v6571_v15 = vmul.f32 %v6495_v25, %v7392_v52  ;;  %v6575_v0 = vmul.f32 %v6495_v25, %v7393_v27  ;;  %v7397_v57 = vld [vmem:[#allocation84_spill] sm:$0xff] }
 0x2de   : > { %v2805_v46 = vadd.f32 %v2713_v30, %v7383_v19  ;;  %v7395_v36 = vrot.slane %v7394_v13, 2  ;;  %v7396_v42 = vmov %v7378_v1  ;;  %v2913_v54 = vadd.f32 %v2912_v20, %v2911_v9  ;;  %v7400_v19 = vld [vmem:[#allocation49_spill] sm:$0xff] }
 0x2df   : > { %v6584_v30 = vmul.f32 %v6495_v25, %v7397_v57  ;;  %v7399_v63 = vrot.slane %v7398_v10, 2  ;;  %v7401_v29 = vrot.slane %v7400_v19, 2  ;;  %v2722_v16 = vrot.slane %v2610_v6, 2  ;;  %v7402_v6 = vld [vmem:[#allocation87_spill] sm:$0xff] }
 0x2e0   : > { %v2715_v1 = vsel %vm1568_vm4, %v7396_v42, %v7395_v36  ;;  %v2843_v34 = vmul.f32 %v6544_v50, %v2804_v45  ;;  %v2844_v62 = vmul.f32 %v6544_v50, %v2805_v46  ;;  %v2915_v52 = vadd.f32 %v2914_v33, %v2913_v54  ;;  %v7404_v46 = vld [vmem:[#allocation24_spill] sm:$0xff]  ;;  %v7407_v42 = vld [vmem:[#allocation66_spill] sm:$0xff] }
 0x2e1   : > { %v2718_v40 = vsel %vm1568_vm4, %v7401_v29, %v7399_v63  ;;  %v2806_v28 = vadd.f32 %v2715_v1, %v2562_v26  ;;  %v6594_v9 = vadd.f32 %v6555_v24, %v2841_v3  ;;  %v6597_v20 = vadd.f32 %v6555_v24, %v2842_v2 }
 0x2e2   : > { %v2807_v56 = vadd.f32 %v2718_v40, %v2563_v8  ;;  %v2916_v27 = vsel %vm1042_vm1, %v6559_v41, 0.0  ;;  %v2918_v13 = vsel %vm1042_vm1, %v6563_v22, 0.0  ;;  %v6605_v26 = vmul.f32 %v6495_v25, %v7402_v6  ;;  %v7403_v8 = vld [vmem:[#allocation88_spill] sm:$0xff] }
 0x2e3   : > { %v6609_v45 = vmul.f32 %v6495_v25, %v7403_v8  ;;  %v7405_v3 = vrot.slane %v7404_v46, 2  ;;  %v7406_v33 = vmov %v7399_v63  ;;  %v2917_v36 = vadd.f32 %v2916_v27, %v2915_v52 }
 0x2e4   : > { %v7408_v1 = vrot.slane %v7407_v42, 2  ;;  %v2726_v57 = vrot.slane %v2612_v35, 2  ;;  %v2727_v63 = vrot.slane %v6503_v38, 2  ;;  %v2845_v40 = vmul.f32 %v6544_v50, %v2806_v28  ;;  %v7409_v38 = vld [vmem:[#allocation89_spill] sm:$0xff] }
 0x2e5   : > { %v2720_v2 = vsel %vm1568_vm4, %v7406_v33, %v7405_v3  ;;  %v2846_v6 = vmul.f32 %v6544_v50, %v2807_v56  ;;  %v2919_v8 = vadd.f32 %v2918_v13, %v2917_v36  ;;  %v6623_v46 = vadd.f32 %v6555_v24, %v2843_v34  ;;  %v7411_v56 = vld [vmem:[#allocation56_spill] sm:$0xff] }
 0x2e6   : > { %v2723_v54 = vsel %vm1568_vm4, %v7408_v1, %v2722_v16  ;;  %v2808_v19 = vadd.f32 %v2720_v2, %v2564_v58  ;;  %v6626_v10 = vadd.f32 %v6555_v24, %v2844_v62  ;;  %v2920_v52 = vsel %vm1042_vm1, %v6594_v9, 0.0 }
 0x2e7   : > { %v2809_v29 = vadd.f32 %v2723_v54, %v2565_v4  ;;  %v2922_v35 = vsel %vm1042_vm1, %v6597_v20, 0.0  ;;  %v6634_v58 = vmul.f32 %v6495_v25, %v7409_v38  ;;  %v7410_v4 = vld [vmem:[#allocation9_spill] sm:$0xff]  ;;  %v7412_v34 = vrot.slane %v7411_v56, 2 }
 0x2e8   : > { %v6638_v28 = vmul.f32 %v6495_v25, %v7410_v4  ;;  %v2921_v62 = vadd.f32 %v2920_v52, %v2919_v8  ;;  %v2728_v13 = vsel %vm1568_vm4, %v2726_v57, %v2727_v63  ;;  %v2731_v3 = vrot.slane %v6507_v32, 2  ;;  %v7414_v57 = vld [vmem:[#allocation64_spill] sm:$0xff] }
 0x2e9   : > { %v2725_v27 = vsel %vm1568_vm4, %v2722_v16, %v7412_v34  ;;  %v2732_v33 = vrot.slane %v6511_v44, 2  ;;  %v2811_v36 = vadd.f32 %v2728_v13, %v6457_v21  ;;  %v2847_v42 = vmul.f32 %v6544_v50, %v2808_v19 }
 0x2ea   : > { %v2810_v2 = vadd.f32 %v2725_v27, %v6454_v47  ;;  %v2848_v1 = vmul.f32 %v6544_v50, %v2809_v29  ;;  %v2923_v54 = vadd.f32 %v2922_v35, %v2921_v62  ;;  %v6651_v38 = vadd.f32 %v6555_v24, %v2845_v40  ;;  %v7413_v47 = vld [vmem:[#allocation63_spill] sm:$0xff] }
 0x2eb   : > { %v6654_v16 = vadd.f32 %v6555_v24, %v2846_v6  ;;  %v2924_v32 = vsel %vm1042_vm1, %v6623_v46, 0.0  ;;  %v2926_v44 = vsel %vm1042_vm1, %v6626_v10, 0.0  ;;  %v6662_v21 = vmul.f32 %v6495_v25, %v7413_v47  ;;  %v7415_v29 = vld [vmem:[#allocation71_spill] sm:$0xff] }
 0x2ec   : > { %v6666_v19 = vmul.f32 %v6495_v25, %v7414_v57  ;;  %v7416_v40 = vrot.slane %v7415_v29, 2  ;;  %v2925_v6 = vadd.f32 %v2924_v32, %v2923_v54  ;;  %v2733_v52 = vsel %vm1568_vm4, %v2731_v3, %v2732_v33  ;;  %v7418_v3 = vld [vmem:[#allocation76_spill] sm:$0xff] }
 0x2ed   : > { %v2736_v35 = vrot.slane %v6515_v18, 2  ;;  %v2737_v4 = vrot.slane %v6519_v11, 2  ;;  %v2813_v34 = vadd.f32 %v2733_v52, %v6463_v61  ;;  %v2849_v27 = vmul.f32 %v6544_v50, %v2810_v2 }
 0x2ee   : > { %v2730_v8 = vsel %vm1568_vm4, %v2727_v63, %v7416_v40  ;;  %v2850_v62 = vmul.f32 %v6544_v50, %v2811_v36  ;;  %v2927_v13 = vadd.f32 %v2926_v44, %v2925_v6  ;;  %v6679_v47 = vadd.f32 %v6555_v24, %v2847_v42 }
 0x2ef   : > { %v2812_v56 = vadd.f32 %v2730_v8, %v6460_v60  ;;  %v6682_v63 = vadd.f32 %v6555_v24, %v2848_v1  ;;  %v2928_v18 = vsel %vm1042_vm1, %v6651_v38, 0.0  ;;  %v2930_v11 = vsel %vm1042_vm1, %v6654_v16, 0.0  ;;  %v7417_v60 = vld [vmem:[#allocation41_spill] sm:$0xff] }
 0x2f0   : > { %v6690_v61 = vmul.f32 %v6495_v25, %v7417_v60  ;;  %v7419_v2 = vrot.slane %v7418_v3, 2  ;;  %v2739_v42 = vrot.slane %v6523_v7, 2  ;;  %v2929_v54 = vadd.f32 %v2928_v18, %v2927_v13 }
 0x2f1   : > { %v2738_v1 = vsel %vm1568_vm4, %v2736_v35, %v2737_v4  ;;  %v2741_v32 = vrot.slane %v6527_v31, 2  ;;  %v2742_v44 = vrot.slane %v6531_v14, 2  ;;  %v2851_v25 = vmul.f32 %v6544_v50, %v2812_v56 }
 0x2f2   : > { %v2735_v36 = vsel %vm1568_vm4, %v2732_v33, %v7419_v2  ;;  %v2815_v29 = vadd.f32 %v2738_v1, %v6469_v59  ;;  %v2852_v40 = vmul.f32 %v6544_v50, %v2813_v34  ;;  %v2931_v8 = vadd.f32 %v2930_v11, %v2929_v54 }
 0x2f3   : > { %v2814_v57 = vadd.f32 %v2735_v36, %v6466_v51  ;;  %v6704_v33 = vadd.f32 %v6555_v24, %v2849_v27  ;;  %v6707_v7 = vadd.f32 %v6555_v24, %v2850_v62  ;;  %v2932_v31 = vsel %vm1042_vm1, %v6679_v47, 0.0 }
 0x2f4   : > { %v2934_v14 = vsel %vm1042_vm1, %v6682_v63, 0.0  ;;  %v2740_v51 = vsel %vm1568_vm4, %v2737_v4, %v2739_v42  ;;  %v2744_v59 = vrot.slane %v6571_v15, 2  ;;  %v2746_v6 = vrot.slane %v6575_v0, 2 }
 0x2f5   : > { %v2933_v52 = vadd.f32 %v2932_v31, %v2931_v8  ;;  %v2743_v35 = vsel %vm1568_vm4, %v2741_v32, %v2742_v44  ;;  %v2747_v56 = vrot.slane %v6584_v30, 2  ;;  %v2749_v34 = vrot.slane %v6605_v26, 2 }
 0x2f6   : > { %v2816_v27 = vadd.f32 %v2740_v51, %v6472_v55  ;;  %v2817_v62 = vadd.f32 %v2743_v35, %v6475_v39  ;;  %v2853_v13 = vmul.f32 %v6544_v50, %v2814_v57  ;;  %v2854_v18 = vmul.f32 %v6544_v50, %v2815_v29 }
 0x2f7   : > { %v2935_v4 = vadd.f32 %v2934_v14, %v2933_v52  ;;  %v6724_v15 = vadd.f32 %v6555_v24, %v2851_v25  ;;  %v6727_v0 = vadd.f32 %v6555_v24, %v2852_v40  ;;  %v2936_v30 = vsel %vm1042_vm1, %v6704_v33, 0.0 }
 0x2f8   : > { %v2938_v26 = vsel %vm1042_vm1, %v6707_v7, 0.0  ;;  %v2745_v55 = vsel %vm1568_vm4, %v2742_v44, %v2744_v59  ;;  %v2751_v39 = vrot.slane %v6609_v45, 2  ;;  %v2752_v11 = vrot.slane %v6634_v58, 2 }
 0x2f9   : > { %v2937_v60 = vadd.f32 %v2936_v30, %v2935_v4  ;;  %v2748_v3 = vsel %vm1568_vm4, %v2746_v6, %v2747_v56  ;;  %v2756_v2 = vrot.slane %v6662_v21, 2  ;;  %v2757_v36 = vrot.slane %v6666_v19, 2 }
 0x2fa   : > { %v2818_v42 = vadd.f32 %v2745_v55, %v6478_v49  ;;  %v2819_v54 = vadd.f32 %v2748_v3, %v6481_v43  ;;  %v2855_v1 = vmul.f32 %v6544_v50, %v2816_v27  ;;  %v2856_v32 = vmul.f32 %v6544_v50, %v2817_v62  ;;  %v7420_v49 = vld [vmem:[#allocation7_spill] sm:$0xff] }
 0x2fb   : > { %v2939_v44 = vadd.f32 %v2938_v26, %v2937_v60  ;;  %v6744_v45 = vadd.f32 %v6555_v24, %v2853_v13  ;;  %v6747_v58 = vadd.f32 %v6555_v24, %v2854_v18  ;;  %v2940_v21 = vsel %vm1042_vm1, %v6724_v15, 0.0 }
 0x2fc   : > { %v2942_v19 = vsel %vm1042_vm1, %v6727_v0, 0.0  ;;  %v2579_v43 = vadd.f32 %v6444_v5, %v7420_v49  ;;  %v2750_v57 = vsel %vm1568_vm4, %v2747_v56, %v2749_v34  ;;  %v2754_v29 = vrot.slane %v6638_v28, 2  ;;  %v7421_v56 = vld [vmem:[#allocation43_spill] sm:$0xff] }
 0x2fd   : > { %v2941_v25 = vadd.f32 %v2940_v21, %v2939_v44  ;;  %v2753_v40 = vsel %vm1568_vm4, %v2751_v39, %v2752_v11  ;;  %v2758_v8 = vsel %vm1568_vm4, %v2756_v2, %v2757_v36  ;;  %v2759_v31 = vrot.slane %v6690_v61, 2 }
 0x2fe   : > { %v2820_v14 = vadd.f32 %v2750_v57, %v6484_v23  ;;  %v2821_v51 = vadd.f32 %v2753_v40, %v6487_v37  ;;  %v2857_v59 = vmul.f32 %v6544_v50, %v2818_v42  ;;  %v2858_v6 = vmul.f32 %v6544_v50, %v2819_v54 }
 0x2ff   : > { %v2943_v5 = vadd.f32 %v2942_v19, %v2941_v25  ;;  %v6765_v52 = vadd.f32 %v6555_v24, %v2855_v1  ;;  %v6768_v28 = vadd.f32 %v6555_v24, %v2856_v32  ;;  %v2944_v35 = vsel %vm1042_vm1, %v6744_v45, 0.0 }
 0x300   : > { %v2946_v61 = vsel %vm1042_vm1, %v6747_v58, 0.0  ;;  %v2755_v23 = vsel %vm1568_vm4, %v2752_v11, %v2754_v29  ;;  %v2580_v34 = vadd.f32 %v6449_v53, %v7421_v56  ;;  %v2760_v27 = vsel %vm1568_vm4, %v2757_v36, %v2759_v31  ;;  %v3052_v56 = vld [vmem:[%s7019_s8] sm:$0xff] }
 0x301   : > { %v2945_v37 = vadd.f32 %v2944_v35, %v2943_v5  ;;  %v2822_v62 = vadd.f32 %v2755_v23, %v6490_v17  ;;  %v2823_v13 = vadd.f32 %v2758_v8, %v2579_v43  ;;  %v2859_v18 = vmul.f32 %v6544_v50, %v2820_v14  ;;  %4057 = vmatpush3.msra.mxu1 %v3052_v56 }
 0x302   : > { %v2860_v4 = vmul.f32 %v6544_v50, %v2821_v51  ;;  %v6782_v26 = vadd.f32 %v6555_v24, %v2857_v59  ;;  %v6785_v55 = vadd.f32 %v6555_v24, %v2858_v6  ;;  %v2948_v39 = vsel %vm1042_vm1, %v6765_v52, 0.0 }
 0x303   : > { %v2947_v30 = vadd.f32 %v2946_v61, %v2945_v37  ;;  %v2950_v53 = vsel %vm1042_vm1, %v6768_v28, 0.0  ;;  %v2824_v17 = vadd.f32 %v2760_v27, %v2580_v34  ;;  %v2861_v60 = vmul.f32 %v6544_v50, %v2822_v62 }
 0x304   : > { %v2862_v3 = vmul.f32 %v6544_v50, %v2823_v13  ;;  %v6794_v36 = vadd.f32 %v6555_v24, %v2859_v18  ;;  %v6797_v42 = vadd.f32 %v6555_v24, %v2860_v4  ;;  %v2952_v54 = vsel %vm1042_vm1, %v6782_v26, 0.0  ;;  %v3326_v13 = vld [vmem:[%s7020_s9] sm:$0xff]  ;;  %v3327_v18 = vld [vmem:[%s7020_s9 + $0x8] sm:$0xff]  ;;  %v3328_v4 = vld [vmem:[%s7020_s9 + $0x10] sm:$0xff] }
 0x305   : > { %v2949_v11 = vadd.f32 %v2948_v39, %v2947_v30  ;;  %v2954_v1 = vsel %vm1042_vm1, %v6785_v55, 0.0  ;;  %v2863_v44 = vmul.f32 %v6544_v50, %v2824_v17  ;;  %v6805_v19 = vadd.f32 %v6555_v24, %v2861_v60  ;;  %v3329_v39 = vld [vmem:[%s7020_s9 + $0x18] sm:$0xff]  ;;  %v3716_v60 = vld [vmem:[%s7021_s10 + $0x8] sm:$0xff] }
 0x306   : > { %v6808_v49 = vadd.f32 %v6555_v24, %v2862_v3  ;;  %v2956_v43 = vsel %vm1042_vm1, %v6794_v36, 0.0  ;;  %v2958_v57 = vsel %vm1042_vm1, %v6797_v42, 0.0  ;;  %v4127_v30 = vpack.c.bf16 %v3327_v18, %v3326_v13  ;;  %v3731_v3 = vld [vmem:[%s7022_s11] sm:$0xff] }
 0x307   : > { %v2951_v2 = vadd.f32 %v2950_v53, %v2949_v11  ;;  %v6815_v40 = vadd.f32 %v6555_v24, %v2863_v44  ;;  %v2960_v50 = vsel %vm1042_vm1, %v6805_v19, 0.0  ;;  %v4131_v53 = vpack.c.bf16 %v3329_v39, %v3328_v4  ;;  %v3715_v11 = vld [vmem:[%s7021_s10] sm:$0xff] }
 0x308   : > { %v2962_v8 = vsel %vm1042_vm1, %v6808_v49, 0.0  ;;  %4128 = vmatprep.subr.bf16.mxu1 %v4127_v30  ;;  %v4259_v17 = vmov 0  }
 0x309   : > { %v2953_v32 = vadd.f32 %v2952_v54, %v2951_v2  ;;  %v2964_v51 = vsel %vm1042_vm1, %v6815_v40, 0.0  ;;  %4180 = vset.pattern.permute.xlu1 %v4259_v17  ;;  %v3732_v2 = vld [vmem:[%s7022_s11 + $0x8] sm:$0xff] }
 0x30a   : > { %3719 = vperm.xlu1 %4180, %v3715_v11  }
 0x30b   : > { %v2955_v21 = vadd.f32 %v2954_v1, %v2953_v32 }
 0x30d   : > { %v2957_v29 = vadd.f32 %v2956_v43, %v2955_v21 }
 0x30e   : > { %3724 = vperm.xlu1 %4180, %v3716_v60  }
 0x30f   : > { %v2959_v25 = vadd.f32 %v2958_v57, %v2957_v29  ;;  %v7422_v57 = vld [vmem:[#allocation6_spill] sm:$0xff] }
 0x310   : > { %v7423_v29 = vsub.s32 0, %v7422_v57 }
 0x311   : > { %v2961_v31 = vadd.f32 %v2960_v50, %v2959_v25  ;;  %v7424_v50 = vld [vmem:[#allocation19_spill] sm:$0xff] }
 0x312   : > { %3735 = vperm.xlu1 %4180, %v3731_v3  }
 0x313   : > { %v2963_v14 = vadd.f32 %v2962_v8, %v2961_v31  ;;  %v7425_v31 = vld [vmem:[#allocation20_spill] sm:$0xff] }
 0x315   : > { %v2965_v59 = vadd.f32 %v2964_v51, %v2963_v14  ;;  %v7426_v51 = vld [vmem:[#allocation25_spill] sm:$0xff] }
 0x316   : > { %3740 = vperm.xlu1 %4180, %v3732_v2  }
 0x317   : > { %v2966_v6 = vrot.slane %v2965_v59, 4 }
 0x319   : > { %v2967_v5 = vadd.f32 %v2966_v6, %v2965_v59  ;;  %v7427_v6 = vld [vmem:[#allocation26_spill] sm:$0xff] }
 0x31b   : > { %v2968_v35 = vrot.slane %v2967_v5, 2 }
 0x31d   : > { %v2969_v61 = vadd.f32 %v2968_v35, %v2967_v5  ;;  %v7428_v35 = vld [vmem:[#allocation28_spill] sm:$0xff] }
 0x31f   : > { %v2970_v23 = vrot.slane %v2969_v61, 1 }
 0x321   : > { %v2971_v37 = vadd.f32 %v2970_v23, %v2969_v61 }
 0x323   : > { %v2973_v24 = vmul.f32 0.00390625, %v2971_v37 }
 0x325   : > { %4054 = vmatmul.mubr.msk.f32.vlgmr.msra.gmra.mrb[32].mxu0 %vm1042_vm1, %v2973_v24 }
 0x3f8   : > { %v3047_v34 = vpop.f32.mrb[32].mxu0 }
 0x3f9   : > { %v3051_v27 = vmax.f32 %v3047_v34, 0.0  ;;  %v4055_v62 = vpop.f32.mrb[33].mxu0 }
 0x3fb   : > { %4059 = vmatmul.mubr.msk.f32.vlgmr.msra.gmra.mrb[0].mxu1 %vm3053_vm6, %v3051_v27 }
 0x3fc   : > { %4130 = vmatpush3.bf16.msra.mxu1 %v4127_v30 }
 0x3fd   : > { %4132 = vmatprep.subr.bf16.mxu1 %v4131_v53 }
 0x400   : > { %4134 = vmatpush3.bf16.msra.mxu1 %v4131_v53 }
 0x4ce   : > { %v3123_v54 = vpop.f32.mrb[0].mxu1 }
 0x4cf   : > { %v3124_v1 = vadd.f32 3.0, %v3123_v54  ;;  %v4060_v32 = vpop.f32.mrb[1].mxu1 }
 0x4d1   : > { %v3127_v44 = vmax.f32 %v3124_v1, 0.0 }
 0x4d3   : > { %v3128_v21 = vmin.f32 %v3127_v44, 6.0 }
 0x4d5   : > { %v3129_v43 = vmul.f32 0.16666667, %v3128_v21 }
 0x4d7   : > { %v6854_v25 = vrot.slane %v3129_v43, %v7423_v29 }
 0x4d9   : > { %v3134_v8 = vmul.f32 %v6854_v25, %v7424_v50  ;;  %v3135_v14 = vmul.f32 %v6854_v25, %v7425_v31  ;;  %v3136_v59 = vmul.f32 %v6854_v25, %v7426_v51  ;;  %v3137_v5 = vmul.f32 %v6854_v25, %v7427_v6 }
 0x4da   : > { %v3138_v61 = vmul.f32 %v6854_v25, %v7428_v35  ;;  %v3139_v23 = vmul.f32 %v6854_v25, %v7390_v48  ;;  %v3140_v37 = vmul.f32 %v6854_v25, %v7391_v12  ;;  %v3141_v24 = vmul.f32 %v6854_v25, %v6559_v41 }
 0x4db   : > { %v3166_v56 = vadd.f32 3.0, %v3134_v8  ;;  %v3167_v34 = vadd.f32 3.0, %v3135_v14  ;;  %v3168_v27 = vadd.f32 3.0, %v3136_v59  ;;  %v3169_v62 = vadd.f32 3.0, %v3137_v5 }
 0x4dc   : > { %v3170_v13 = vadd.f32 3.0, %v3138_v61  ;;  %v3171_v18 = vadd.f32 3.0, %v3139_v23  ;;  %v3172_v4 = vadd.f32 3.0, %v3140_v37  ;;  %v3173_v30 = vadd.f32 3.0, %v3141_v24 }
 0x4dd   : > { %v3198_v39 = vmax.f32 %v3166_v56, 0.0  ;;  %v3199_v53 = vmax.f32 %v3167_v34, 0.0  ;;  %v3200_v11 = vmax.f32 %v3168_v27, 0.0  ;;  %v3201_v60 = vmax.f32 %v3169_v62, 0.0 }
 0x4de   : > { %v3202_v3 = vmax.f32 %v3170_v13, 0.0  ;;  %v3203_v48 = vmax.f32 %v3171_v18, 0.0  ;;  %v3204_v32 = vmax.f32 %v3172_v4, 0.0  ;;  %v3205_v41 = vmax.f32 %v3173_v30, 0.0 }
 0x4df   : > { %v3230_v2 = vmin.f32 %v3198_v39, 6.0  ;;  %v3231_v54 = vmin.f32 %v3199_v53, 6.0  ;;  %v3232_v12 = vmin.f32 %v3200_v11, 6.0  ;;  %v3233_v1 = vmin.f32 %v3201_v60, 6.0 }
 0x4e0   : > { %v3234_v57 = vmin.f32 %v3202_v3, 6.0  ;;  %v3235_v29 = vmin.f32 %v3203_v48, 6.0  ;;  %v3142_v51 = vmul.f32 %v6854_v25, %v6563_v22  ;;  %v3236_v35 = vmin.f32 %v3204_v32, 6.0 }
 0x4e1   : > { %v3262_v44 = vmul.f32 %v3230_v2, %v3134_v8  ;;  %v3263_v21 = vmul.f32 %v3231_v54, %v3135_v14  ;;  %v3264_v43 = vmul.f32 %v3232_v12, %v3136_v59  ;;  %v3265_v6 = vmul.f32 %v3233_v1, %v3137_v5 }
 0x4e2   : > { %v3237_v56 = vmin.f32 %v3205_v41, 6.0  ;;  %v3143_v34 = vmul.f32 %v6854_v25, %v6594_v9  ;;  %v3266_v62 = vmul.f32 %v3234_v57, %v3138_v61  ;;  %v3174_v8 = vadd.f32 3.0, %v3142_v51 }
 0x4e3   : > { %v3294_v50 = vmul.f32 0.16666667, %v3262_v44  ;;  %v3295_v31 = vmul.f32 0.16666667, %v3263_v21  ;;  %v3296_v27 = vmul.f32 0.16666667, %v3264_v43  ;;  %v3144_v14 = vmul.f32 %v6854_v25, %v6597_v20 }
 0x4e4   : > { %v3267_v59 = vmul.f32 %v3235_v29, %v3139_v23  ;;  %v3175_v13 = vadd.f32 3.0, %v3143_v34  ;;  %v3145_v22 = vmul.f32 %v6854_v25, %v6623_v46  ;;  %v3146_v5 = vmul.f32 %v6854_v25, %v6626_v10 }
 0x4e5   : > { %4069 = vmatprep.mubr.msk.f32.mxu1 %vm1042_vm1, %v3294_v50  ;;  %v3206_v9 = vmax.f32 %v3174_v8, 0.0  ;;  %v3176_v18 = vadd.f32 3.0, %v3144_v14  ;;  %v3147_v61 = vmul.f32 %v6854_v25, %v6651_v38  ;;  %v3148_v20 = vmul.f32 %v6854_v25, %v6654_v16 }
 0x4e6   : > { %4070 = vmatmul.mubr.msk.f32.vlgmr.msra.gmra.mrb[2].mxu1 %vm1042_vm1, %v3295_v31  ;;  %v3297_v4 = vmul.f32 0.16666667, %v3265_v6  ;;  %v3207_v30 = vmax.f32 %v3175_v13, 0.0  ;;  %v3177_v23 = vadd.f32 3.0, %v3145_v22  ;;  %v3178_v39 = vadd.f32 3.0, %v3146_v5 }
 0x4e7   : > { %4072 = vmatprep.mubr.msk.f32.mxu1 %vm1042_vm1, %v3296_v27  ;;  %v3298_v53 = vmul.f32 0.16666667, %v3266_v62  ;;  %v3268_v11 = vmul.f32 %v3236_v35, %v3140_v37  ;;  %v3238_v46 = vmin.f32 %v3206_v9, 6.0  ;;  %v3208_v60 = vmax.f32 %v3176_v18, 0.0 }
 0x4e8   : > { %v3269_v10 = vmul.f32 %v3237_v56, %v3141_v24  ;;  %v3179_v3 = vadd.f32 3.0, %v3147_v61  ;;  %v3180_v48 = vadd.f32 3.0, %v3148_v20  ;;  %v3149_v38 = vmul.f32 %v6854_v25, %v6679_v47 }
 0x4e9   : > { %v3299_v2 = vmul.f32 0.16666667, %v3267_v59  ;;  %v3239_v16 = vmin.f32 %v3207_v30, 6.0  ;;  %v3209_v54 = vmax.f32 %v3177_v23, 0.0  ;;  %v3210_v12 = vmax.f32 %v3178_v39, 0.0 }
 0x4ea   : > { %4073 = vmatmul.mubr.msk.f32.gmra.mrb[4].mxu1 %vm1042_vm1, %v3297_v4  ;;  %v3300_v1 = vmul.f32 0.16666667, %v3268_v11  ;;  %v3270_v32 = vmul.f32 %v3238_v46, %v3142_v51  ;;  %v3240_v41 = vmin.f32 %v3208_v60, 6.0  ;;  %v3301_v37 = vmul.f32 0.16666667, %v3269_v10 }
 0x4eb   : > { %4075 = vmatprep.mubr.msk.f32.mxu1 %vm1042_vm1, %v3298_v53  ;;  %v3211_v24 = vmax.f32 %v3179_v3, 0.0  ;;  %v3212_v44 = vmax.f32 %v3180_v48, 0.0  ;;  %v3181_v21 = vadd.f32 3.0, %v3149_v38  ;;  %v3150_v43 = vmul.f32 %v6854_v25, %v6682_v63 }
 0x4ec   : > { %v3271_v57 = vmul.f32 %v3239_v16, %v3143_v34  ;;  %v3241_v47 = vmin.f32 %v3209_v54, 6.0  ;;  %v3242_v29 = vmin.f32 %v3210_v12, 6.0  ;;  %v3151_v50 = vmul.f32 %v6854_v25, %v6704_v33 }
 0x4ed   : > { %v3302_v31 = vmul.f32 0.16666667, %v3270_v32  ;;  %v3272_v51 = vmul.f32 %v3240_v41, %v3144_v14  ;;  %v3182_v6 = vadd.f32 3.0, %v3150_v43  ;;  %v3152_v35 = vmul.f32 %v6854_v25, %v6707_v7 }
 0x4ee   : > { %4076 = vmatmul.mubr.msk.f32.gmra.mrb[6].mxu1 %vm1042_vm1, %v3299_v2  ;;  %v3243_v56 = vmin.f32 %v3211_v24, 6.0  ;;  %v3244_v27 = vmin.f32 %v3212_v44, 6.0  ;;  %v3213_v62 = vmax.f32 %v3181_v21, 0.0  ;;  %v3153_v63 = vmul.f32 %v6854_v25, %v6724_v15 }
 0x4ef   : > { %4078 = vmatprep.mubr.msk.f32.mxu1 %vm1042_vm1, %v3300_v1  ;;  %v3303_v34 = vmul.f32 0.16666667, %v3271_v57  ;;  %v3273_v8 = vmul.f32 %v3241_v47, %v3145_v22  ;;  %v3183_v59 = vadd.f32 3.0, %v3151_v50  ;;  %v3154_v33 = vmul.f32 %v6854_v25, %v6727_v0 }
 0x4f0   : > { %v3304_v14 = vmul.f32 0.16666667, %v3272_v51  ;;  %v3274_v13 = vmul.f32 %v3242_v29, %v3146_v5  ;;  %v3214_v9 = vmax.f32 %v3182_v6, 0.0  ;;  %v3184_v7 = vadd.f32 3.0, %v3152_v35 }
 0x4f1   : > { %v3245_v18 = vmin.f32 %v3213_v62, 6.0  ;;  %v3185_v4 = vadd.f32 3.0, %v3153_v63  ;;  %v3155_v30 = vmul.f32 %v6854_v25, %v6744_v45  ;;  %v3156_v15 = vmul.f32 %v6854_v25, %v6747_v58 }
 0x4f2   : > { %4079 = vmatmul.mubr.msk.f32.gmra.mrb[8].mxu1 %vm1042_vm1, %v3301_v37  ;;  %v3305_v22 = vmul.f32 0.16666667, %v3273_v8  ;;  %v3275_v23 = vmul.f32 %v3243_v56, %v3147_v61  ;;  %v3215_v39 = vmax.f32 %v3183_v59, 0.0  ;;  %v3186_v0 = vadd.f32 3.0, %v3154_v33 }
 0x4f3   : > { %4081 = vmatprep.mubr.msk.f32.mxu1 %vm1042_vm1, %v3302_v31  ;;  %v3306_v53 = vmul.f32 0.16666667, %v3274_v13  ;;  %v3276_v5 = vmul.f32 %v3244_v27, %v3148_v20  ;;  %v3246_v11 = vmin.f32 %v3214_v9, 6.0  ;;  %v3216_v46 = vmax.f32 %v3184_v7, 0.0 }
 0x4f4   : > { %v3217_v60 = vmax.f32 %v3185_v4, 0.0  ;;  %v3187_v10 = vadd.f32 3.0, %v3155_v30  ;;  %v3188_v3 = vadd.f32 3.0, %v3156_v15  ;;  %v3157_v45 = vmul.f32 %v6854_v25, %v6765_v52 }
 0x4f5   : > { %v3307_v48 = vmul.f32 0.16666667, %v3275_v23  ;;  %v3277_v58 = vmul.f32 %v3245_v18, %v3149_v38  ;;  %v3247_v2 = vmin.f32 %v3215_v39, 6.0  ;;  %v3218_v61 = vmax.f32 %v3186_v0, 0.0 }
 0x4f6   : > { %4082 = vmatmul.mubr.msk.f32.gmra.mrb[10].mxu1 %vm1042_vm1, %v3303_v34  ;;  %v3308_v16 = vmul.f32 0.16666667, %v3276_v5  ;;  %v3278_v54 = vmul.f32 %v3246_v11, %v3150_v43  ;;  %v3248_v12 = vmin.f32 %v3216_v46, 6.0  ;;  %v3158_v20 = vmul.f32 %v6854_v25, %v6768_v28 }
 0x4f7   : > { %4084 = vmatprep.mubr.msk.f32.mxu1 %vm1042_vm1, %v3304_v14  ;;  %v3249_v1 = vmin.f32 %v3217_v60, 6.0  ;;  %v3219_v32 = vmax.f32 %v3187_v10, 0.0  ;;  %v3220_v41 = vmax.f32 %v3188_v3, 0.0  ;;  %v3189_v37 = vadd.f32 3.0, %v3157_v45 }
 0x4f8   : > { %v3309_v24 = vmul.f32 0.16666667, %v3277_v58  ;;  %v3279_v52 = vmul.f32 %v3247_v2, %v3151_v50  ;;  %v3250_v44 = vmin.f32 %v3218_v61, 6.0  ;;  %v3159_v38 = vmul.f32 %v6854_v25, %v6782_v26 }
 0x4f9   : > { %v3310_v21 = vmul.f32 0.16666667, %v3278_v54  ;;  %v3280_v43 = vmul.f32 %v3248_v12, %v3152_v35  ;;  %v3190_v57 = vadd.f32 3.0, %v3158_v20  ;;  %v3160_v28 = vmul.f32 %v6854_v25, %v6785_v55 }
 0x4fa   : > { %4085 = vmatmul.mubr.msk.f32.gmra.mrb[12].mxu1 %vm1042_vm1, %v3305_v22  ;;  %v3281_v47 = vmul.f32 %v3249_v1, %v3153_v63  ;;  %v3251_v29 = vmin.f32 %v3219_v32, 6.0  ;;  %v3252_v31 = vmin.f32 %v3220_v41, 6.0  ;;  %v3221_v51 = vmax.f32 %v3189_v37, 0.0 }
 0x4fb   : > { %4087 = vmatprep.mubr.msk.f32.mxu1 %vm1042_vm1, %v3306_v53  ;;  %v3311_v6 = vmul.f32 0.16666667, %v3279_v52  ;;  %v3282_v50 = vmul.f32 %v3250_v44, %v3154_v33  ;;  %v3191_v56 = vadd.f32 3.0, %v3159_v38  ;;  %v3161_v26 = vmul.f32 %v6854_v25, %v6794_v36 }
 0x4fc   : > { %v3312_v27 = vmul.f32 0.16666667, %v3280_v43  ;;  %v3222_v35 = vmax.f32 %v3190_v57, 0.0  ;;  %v3192_v62 = vadd.f32 3.0, %v3160_v28  ;;  %v3162_v55 = vmul.f32 %v6854_v25, %v6797_v42 }
 0x4fd   : > { %v3313_v63 = vmul.f32 0.16666667, %v3281_v47  ;;  %v3283_v34 = vmul.f32 %v3251_v29, %v3155_v30  ;;  %v3284_v8 = vmul.f32 %v3252_v31, %v3156_v15  ;;  %v3253_v59 = vmin.f32 %v3221_v51, 6.0 }
 0x4fe   : > { %4088 = vmatmul.mubr.msk.f32.gmra.mrb[14].mxu1 %vm1042_vm1, %v3307_v48  ;;  %v3314_v14 = vmul.f32 0.16666667, %v3282_v50  ;;  %v3223_v33 = vmax.f32 %v3191_v56, 0.0  ;;  %v3193_v13 = vadd.f32 3.0, %v3161_v26  ;;  %v3163_v36 = vmul.f32 %v6854_v25, %v6805_v19 }
 0x4ff   : > { %4090 = vmatprep.mubr.msk.f32.mxu1 %vm1042_vm1, %v3308_v16  ;;  %v3254_v9 = vmin.f32 %v3222_v35, 6.0  ;;  %v3224_v7 = vmax.f32 %v3192_v62, 0.0  ;;  %v3194_v18 = vadd.f32 3.0, %v3162_v55  ;;  %v3164_v42 = vmul.f32 %v6854_v25, %v6808_v49 }
 0x500   : > { %v3315_v4 = vmul.f32 0.16666667, %v3283_v34  ;;  %v3316_v30 = vmul.f32 0.16666667, %v3284_v8  ;;  %v3285_v15 = vmul.f32 %v3253_v59, %v3157_v45  ;;  %v3255_v22 = vmin.f32 %v3223_v33, 6.0 }
 0x501   : > { %v3225_v23 = vmax.f32 %v3193_v13, 0.0  ;;  %v3195_v39 = vadd.f32 3.0, %v3163_v36  ;;  %v3165_v0 = vmul.f32 %v6854_v25, %v6815_v40  ;;  %v3286_v19 = vmul.f32 %v3254_v9, %v3158_v20 }
 0x502   : > { %4091 = vmatmul.mubr.msk.f32.gmra.mrb[16].mxu1 %vm1042_vm1, %v3309_v24  ;;  %v3256_v53 = vmin.f32 %v3224_v7, 6.0  ;;  %v3226_v5 = vmax.f32 %v3194_v18, 0.0  ;;  %v3196_v11 = vadd.f32 3.0, %v3164_v42  ;;  %v3317_v49 = vmul.f32 0.16666667, %v3285_v15 }
 0x503   : > { %4093 = vmatprep.mubr.msk.f32.mxu1 %vm1042_vm1, %v3310_v21  ;;  %v3287_v46 = vmul.f32 %v3255_v22, %v3159_v38  ;;  %v3257_v60 = vmin.f32 %v3225_v23, 6.0  ;;  %v3227_v10 = vmax.f32 %v3195_v39, 0.0  ;;  %v3197_v3 = vadd.f32 3.0, %v3165_v0  ;;  %v3720_v39 = vpop.permute.xlu1 %3719 }
 0x504   : > { %v3318_v45 = vmul.f32 0.16666667, %v3286_v19  ;;  %v3288_v48 = vmul.f32 %v3256_v53, %v3160_v28  ;;  %v3258_v58 = vmin.f32 %v3226_v5, 6.0  ;;  %v3228_v2 = vmax.f32 %v3196_v11, 0.0 }
 0x505   : > { %v3319_v40 = vmul.f32 0.16666667, %v3287_v46  ;;  %v3289_v25 = vmul.f32 %v3257_v60, %v3161_v26  ;;  %v3259_v61 = vmin.f32 %v3227_v10, 6.0  ;;  %v3229_v16 = vmax.f32 %v3197_v3, 0.0  ;;  %v4188_v46 = vld [vmem:[%s4381_s19] sm:$0xff] }
 0x506   : > { %4094 = vmatmul.mubr.msk.f32.gmra.mrb[18].mxu1 %vm1042_vm1, %v3311_v6  ;;  %v3320_v54 = vmul.f32 0.16666667, %v3288_v48  ;;  %v3290_v12 = vmul.f32 %v3258_v58, %v3162_v55  ;;  %v3260_v20 = vmin.f32 %v3228_v2, 6.0 }
 0x507   : > { %4096 = vmatprep.mubr.msk.f32.mxu1 %vm1042_vm1, %v3312_v27  ;;  %v3321_v1 = vmul.f32 0.16666667, %v3289_v25  ;;  %v3291_v32 = vmul.f32 %v3259_v61, %v3163_v36  ;;  %v3261_v41 = vmin.f32 %v3229_v16, 6.0  ;;  %v4190_v61 = vld [vmem:[%s4381_s19 + $0x8] sm:$0xff] }
 0x508   : > { %v3322_v37 = vmul.f32 0.16666667, %v3290_v12  ;;  %v3292_v24 = vmul.f32 %v3260_v20, %v3164_v42  ;;  %v4191_v20 = vld [vmem:[%s4381_s19 + $0x18] sm:$0xff] }
 0x509   : > { %v3323_v52 = vmul.f32 0.16666667, %v3291_v32  ;;  %v3293_v44 = vmul.f32 %v3261_v41, %v3165_v0  ;;  %v3725_v0 = vpop.permute.xlu1 %3724 }
 0x50a   : > { %4097 = vmatmul.mubr.msk.f32.gmra.mrb[20].mxu1 %vm1042_vm1, %v3313_v63  ;;  %v3324_v38 = vmul.f32 0.16666667, %v3292_v24 }
 0x50b   : > { %4099 = vmatprep.mubr.msk.f32.mxu1 %vm1042_vm1, %v3314_v14  ;;  %v3325_v21 = vmul.f32 0.16666667, %v3293_v44 }
 0x50d   : > { %v3736_v19 = vpop.permute.xlu1 %3735 }
 0x50e   : > { %4100 = vmatmul.mubr.msk.f32.gmra.mrb[22].mxu1 %vm1042_vm1, %v3315_v4 }
 0x50f   : > { %4102 = vmatprep.mubr.msk.f32.mxu1 %vm1042_vm1, %v3316_v30 }
 0x511   : > { %v3741_v3 = vpop.permute.xlu1 %3740 }
 0x512   : > { %4103 = vmatmul.mubr.msk.f32.gmra.mrb[24].mxu1 %vm1042_vm1, %v3317_v49 }
 0x513   : > { %4105 = vmatprep.mubr.msk.f32.mxu1 %vm1042_vm1, %v3318_v45  ;;  %v4189_v45 = vld [vmem:[%s4381_s19 + $0x10] sm:$0xff] }
 0x516   : > { %4106 = vmatmul.mubr.msk.f32.gmra.mrb[26].mxu1 %vm1042_vm1, %v3319_v40 }
 0x517   : > { %4108 = vmatprep.mubr.msk.f32.mxu1 %vm1042_vm1, %v3320_v54 }
 0x51a   : > { %4109 = vmatmul.mubr.msk.f32.gmra.mrb[28].mxu1 %vm1042_vm1, %v3321_v1 }
 0x51b   : > { %4111 = vmatprep.mubr.msk.f32.mxu1 %vm1042_vm1, %v3322_v37 }
 0x51e   : > { %4112 = vmatmul.mubr.msk.f32.gmra.mrb[30].mxu1 %vm1042_vm1, %v3323_v52 }
 0x51f   : > { %4114 = vmatprep.mubr.msk.f32.mxu1 %vm1042_vm1, %v3324_v38 }
 0x522   : > { %4115 = vmatmul.mubr.msk.f32.gmra.mrb[32].mxu1 %vm1042_vm1, %v3325_v21 }
 0x5b9   : > { %v4071_v43 = vpop.f32.mrb[2].mxu1 }
 0x5ba   : > { %v3492_v57 = vpop.f32.mrb[3].mxu1 }
 0x5bb   : > { %3651 = vxpose.xlu0.b32.start [1/16] (narrow) %v3492_v57, 16 }
 0x5bd   : > { %v4074_v28 = vpop.f32.mrb[4].mxu1 }
 0x5be   : > { %v3502_v47 = vpop.f32.mrb[5].mxu1 }
 0x5bf   : > { %3652 = vxpose.xlu0.b32.cont [2/16] (narrow) %v4071_v43, 16 }
 0x5c1   : > { %v4077_v29 = vpop.f32.mrb[6].mxu1 }
 0x5c2   : > { %v3512_v31 = vpop.f32.mrb[7].mxu1 }
 0x5c3   : > { %3653 = vxpose.xlu0.b32.cont [3/16] (narrow) %v3502_v47, 16 }
 0x5c5   : > { %v4080_v51 = vpop.f32.mrb[8].mxu1 }
 0x5c6   : > { %v3522_v6 = vpop.f32.mrb[9].mxu1 }
 0x5c7   : > { %3654 = vxpose.xlu0.b32.cont [4/16] (narrow) %v4074_v28, 16 }
 0x5c9   : > { %v4083_v50 = vpop.f32.mrb[10].mxu1 }
 0x5ca   : > { %v3532_v56 = vpop.f32.mrb[11].mxu1 }
 0x5cb   : > { %3655 = vxpose.xlu0.b32.cont [5/16] (narrow) %v3512_v31, 16 }
 0x5cd   : > { %v4086_v26 = vpop.f32.mrb[12].mxu1 }
 0x5ce   : > { %v3542_v27 = vpop.f32.mrb[13].mxu1 }
 0x5cf   : > { %3656 = vxpose.xlu0.b32.cont [6/16] (narrow) %v4077_v29, 16 }
 0x5d1   : > { %v4089_v35 = vpop.f32.mrb[14].mxu1 }
 0x5d2   : > { %v3552_v62 = vpop.f32.mrb[15].mxu1 }
 0x5d3   : > { %3657 = vxpose.xlu0.b32.cont [7/16] (narrow) %v3522_v6, 16 }
 0x5d5   : > { %v4092_v55 = vpop.f32.mrb[16].mxu1 }
 0x5d6   : > { %v3562_v63 = vpop.f32.mrb[17].mxu1 }
 0x5d7   : > { %3658 = vxpose.xlu0.b32.cont [8/16] (narrow) %v4080_v51, 16 }
 0x5d9   : > { %v4095_v34 = vpop.f32.mrb[18].mxu1 }
 0x5da   : > { %v3572_v8 = vpop.f32.mrb[19].mxu1 }
 0x5db   : > { %3659 = vxpose.xlu0.b32.cont [9/16] (narrow) %v3532_v56, 16  ;;  %3683 = vxpose.xlu1.b32.start [1/16] (narrow) %v3572_v8, 16 }
 0x5dd   : > { %v4098_v59 = vpop.f32.mrb[20].mxu1 }
 0x5de   : > { %v3582_v14 = vpop.f32.mrb[21].mxu1 }
 0x5df   : > { %3660 = vxpose.xlu0.b32.cont [10/16] (narrow) %v4083_v50, 16  ;;  %3684 = vxpose.xlu1.b32.cont [2/16] (narrow) %v4095_v34, 16 }
 0x5e1   : > { %v4101_v33 = vpop.f32.mrb[22].mxu1 }
 0x5e2   : > { %v3592_v13 = vpop.f32.mrb[23].mxu1 }
 0x5e3   : > { %3661 = vxpose.xlu0.b32.cont [11/16] (narrow) %v3542_v27, 16  ;;  %3685 = vxpose.xlu1.b32.cont [3/16] (narrow) %v3582_v14, 16 }
 0x5e5   : > { %v4104_v36 = vpop.f32.mrb[24].mxu1 }
 0x5e6   : > { %v3602_v9 = vpop.f32.mrb[25].mxu1 }
 0x5e7   : > { %3662 = vxpose.xlu0.b32.cont [12/16] (narrow) %v4086_v26, 16  ;;  %3686 = vxpose.xlu1.b32.cont [4/16] (narrow) %v4098_v59, 16 }
 0x5e9   : > { %v4107_v7 = vpop.f32.mrb[26].mxu1 }
 0x5ea   : > { %v3612_v18 = vpop.f32.mrb[27].mxu1 }
 0x5eb   : > { %3663 = vxpose.xlu0.b32.cont [13/16] (narrow) %v3552_v62, 16  ;;  %3687 = vxpose.xlu1.b32.cont [5/16] (narrow) %v3592_v13, 16 }
 0x5ed   : > { %v4110_v42 = vpop.f32.mrb[28].mxu1 }
 0x5ee   : > { %v3622_v4 = vpop.f32.mrb[29].mxu1 }
 0x5ef   : > { %3664 = vxpose.xlu0.b32.cont [14/16] (narrow) %v4089_v35, 16  ;;  %3688 = vxpose.xlu1.b32.cont [6/16] (narrow) %v4101_v33, 16 }
 0x5f1   : > { %v4113_v30 = vpop.f32.mrb[30].mxu1 }
 0x5f2   : > { %v3632_v15 = vpop.f32.mrb[31].mxu1 }
 0x5f3   : > { %3665 = vxpose.xlu0.b32.cont [15/16] (narrow) %v3562_v63, 16  ;;  %3689 = vxpose.xlu1.b32.cont [7/16] (narrow) %v3602_v9, 16 }
 0x5f5   : > { %v4116_v22 = vpop.f32.mrb[32].mxu1 }
 0x5f6   : > { %v3642_v23 = vpop.f32.mrb[33].mxu1 }
 0x5f7   : > { %3666 = vxpose.xlu0.b32.end [16/16] (narrow) %v4092_v55, 16  ;;  %3690 = vxpose.xlu1.b32.cont [8/16] (narrow) %v4104_v36, 16 }
 0x5fb   : > { %3691 = vxpose.xlu1.b32.cont [9/16] (narrow) %v3612_v18, 16 }
 0x5ff   : > { %3692 = vxpose.xlu1.b32.cont [10/16] (narrow) %v4107_v7, 16 }
 0x603   : > { %3693 = vxpose.xlu1.b32.cont [11/16] (narrow) %v3622_v4, 16 }
 0x607   : > { %3694 = vxpose.xlu1.b32.cont [12/16] (narrow) %v4110_v42, 16 }
 0x60b   : > { %3695 = vxpose.xlu1.b32.cont [13/16] (narrow) %v3632_v15, 16 }
 0x60f   : > { %3696 = vxpose.xlu1.b32.cont [14/16] (narrow) %v4113_v30, 16 }
 0x613   : > { %3697 = vxpose.xlu1.b32.cont [15/16] (narrow) %v3642_v23, 16 }
 0x617   : > { %3698 = vxpose.xlu1.b32.end [16/16] (narrow) %v4116_v22, 16 }
 0x620   : > { %4181 = vset.pattern.permute.xlu0 %v4259_v17 }
 0x63b   : > { %v3667_v53 = vpop.trf.xlu0 }
 0x63c   : > { %v3727_v5 = vmul.f32 %v3720_v39, %v3667_v53 }
 0x63e   : > { %v3743_v11 = vadd.f32 %v3736_v19, %v3727_v5 }
 0x63f   : > { %v3668_v49 = vpop.trf.xlu0 }
 0x640   : > { %v3747_v60 = vadd.f32 %v4188_v46, %v3743_v11  ;;  %v3729_v10 = vmul.f32 %v3725_v0, %v3668_v49 }
 0x642   : > { %3751 = vst [vmem:[%s406_s20] sm:$0xff] %v3747_v60  ;;  %v3745_v17 = vadd.f32 %v3741_v3, %v3729_v10 }
 0x644   : > { %v3749_v48 = vadd.f32 %v4189_v45, %v3745_v17 }
 0x646   : > { %3753 = vst [vmem:[%s406_s20 + $0x10] sm:$0xff] %v3749_v48 }
 0x65b   : > { %v3699_v58 = vpop.trf.xlu1 }
 0x65c   : > { %v3728_v2 = vmul.f32 %v3720_v39, %v3699_v58 }
 0x65e   : > { %v3744_v40 = vadd.f32 %v3736_v19, %v3728_v2 }
 0x65f   : > { %v3700_v25 = vpop.trf.xlu1 }
 0x660   : > { %v3748_v16 = vadd.f32 %v4190_v61, %v3744_v40  ;;  %v3730_v54 = vmul.f32 %v3725_v0, %v3700_v25 }
 0x662   : > { %3752 = vst [vmem:[%s406_s20 + $0x8] sm:$0xff] %v3748_v16  ;;  %v3746_v12 = vadd.f32 %v3741_v3, %v3730_v54 }
 0x664   : > { %v3750_v1 = vadd.f32 %v4191_v20, %v3746_v12 }
 0x666   : > { %3754 = vst [vmem:[%s406_s20 + $0x18] sm:$0xff] %v3750_v1 }
 0x667   : > { %4205 = shalt.err (!%p4202_p3)
}
 0x668   : > { %s4206_s19 = scalar_lea.hbm %s6966_s16, 512  ;;  %s4210_s28 = scalar_lea.hbm %s7023_s12, 1024 }
 0x669   : > { %p4207_p4 = scmp.ne.s32.totalorder %s6966_s16, %s4206_s19  ;;  %p4211_p9 = scmp.lt.u32.totalorder %s6966_s16, %s7023_s12 }
 0x66a   : > { %p4212_p10 = scmp.lt.u32.totalorder %s4210_s28, %s4206_s19  ;;  %p4214_p12 = scmp.lt.u32.totalorder %s4206_s19, %s6966_s16 }
 0x66b   : > { %p4208_p7 = pnand %p4207_p4, %p4366_p5 }
 0x66c   : > { %p4213_p11 = por %p4212_p10, %p4211_p9 }
 0x66d   : > { %p4209_p8 = pneg %p4208_p7 }
 0x66e   : > { %p4215_p13 = por %p4214_p12, %p4213_p11 }
 0x670   : > { %p4216_p0 = pnand %p4215_p13, %p4209_p8 }
 0x672   : > { %4219 = shalt.err (!%p4216_p0)
}
 0x673   : > { %s4261_s0 = smov 256   ;;  %s4262_s2 = smov 16  }
 0x674   : > { %4135 = dma.vmem_to_hbm [thread:$0]  (%p4366_p5), %s6960_s26, 512, %s6966_s16, %s6970_s18, %s4261_s0, %s4261_s0, %s4262_s2  }
 0x675 PF: > { %p4141_p1 = scmp.ge.s32.totalorder %s4254_s24, 2  ;;  %s3784_s15 = sand.u32 1, %s4242_s21  }
 0x676   : > { %s3785_s25 = scalar_lea.sflag [#allocation4], %s3784_s15 }
 0x677   : > { %p4138_p2 = pnand %p4141_p1, %p4370_p6 }
 0x679   : > { %4237 = dma.done.wait (!%p4138_p2), %s3785_s25, 512  }
 0x67a   : > { %4239 = vsyncadd (!%p4138_p2), %s3785_s25, 4294966784  ;;  %p22_p3 = scmp.ge.s32.totalorder %s4353_s27, 4   ;;  %s7429_s21 = smov %s4246_s22 }
 0x67b   : > { %s7430_s22 = smov %s4250_s23  ;;  %s7431_s23 = smov %s4364_s30 }
 0x67c   : > { %s7432_s24 = smov %s4353_s27  ;;  %24 = sbr.rel (!%p22_p3) target bundleno = 7 (0x7), region = 104 }
 0x683   :  { %3790 = vsyncpa [#allocation4], 1 }
 0x684   :  { %3792 = vsyncpa [#allocation4 + $0x1], 1 }

</bundles_post_ra>
